<compile_context>
chip_gen: v7x
topology: tpu7x:2x2x1
jax: 0.10.0
libtpu: 0.0.40
codegen_flags: <defaults>
</compile_context>

<pallas_src>
import functools

import jax
import jax.numpy as jnp
from jax.experimental import pallas as pl
from jax.experimental.pallas import tpu as pltpu


def _linear_attention_kernel(x_ref, wqkv_t_ref, wout_ref, bout_ref, g_ref,
                             mask_ref, o_ref, *, pair, heads, dim_head, eps,
                             matmul_dtype):
    _, c, n = x_ref.shape                       # (pair, c, n)
    hidden = heads * dim_head
    md = matmul_dtype

    w_qkv_t = wqkv_t_ref[...].astype(md)        # (c, 3*hidden), lane-dense
    w_out = wout_ref[...].astype(md)            # (c, hidden)
    bias = bout_ref[...]                        # (c, 1) -- implicit lane bcast
    gamma = g_ref[...]                          # (c, 1)
    mask = mask_ref[...]                        # (pair*hidden, pair*hidden)

    # ---- to_qkv: 1x1 conv (no bias) == channel matmul, one per element of the
    # pair.  Contract dim 0 of the lane-dense (c, 3*hidden) weight.
    qs, ks, vs = [], [], []
    for e in range(pair):                       # pair <= 2; cheap stage only
        x = x_ref[e].astype(md)                                        # (c, n)
        qkv = jax.lax.dot_general(w_qkv_t, x, (((0,), (0,)), ((), ())),
                                  preferred_element_type=jnp.float32)  # (3h,n)
        qs.append(qkv[0:hidden])
        ks.append(qkv[hidden:2 * hidden])
        vs.append(qkv[2 * hidden:3 * hidden])
    if pair == 1:
        q, k, v = qs[0], ks[0], vs[0]
    else:
        # Stack the pair along the head (sublane) axis -> (2*hidden, n) slabs.
        q = jnp.concatenate(qs, axis=0)
        k = jnp.concatenate(ks, axis=0)
        v = jnp.concatenate(vs, axis=0)

    # ---- q: softmax over dim_head (PyTorch dim=-2), segment-wise on the slab;
    # the dim_head**-0.5 scale is folded into `mask`.
    q3 = q.reshape(pair * heads, dim_head, n)
    q3 = jnp.exp(q3 - jnp.max(q3, axis=1, keepdims=True))
    q3 = q3 * pl.reciprocal(jnp.sum(q3, axis=1, keepdims=True), approx=True)
    q = q3.reshape(pair * hidden, n)

    # ---- k: softmax over the sequence axis (PyTorch dim=-1).
    k = jnp.exp(k - jnp.max(k, axis=1, keepdims=True))
    k = k * pl.reciprocal(jnp.sum(k, axis=1, keepdims=True), approx=True)

    # ---- context[d, e] = sum_n k[d, n] * v[e, n]: all heads (and both pair
    # elements) in ONE full-width MXU pass; the precomputed block-diagonal mask
    # kills cross-head / cross-batch terms and applies scale/(h*w).
    ctx = jax.lax.dot_general(k.astype(md), v.astype(md),
                              (((1,), (1,)), ((), ())),
                              preferred_element_type=jnp.float32)
    ctx = ctx * mask                                         # (P*h, P*h)

    # ---- out[e, n] = sum_d ctx[d, e] * q[d, n]: second full-width matmul.
    out = jax.lax.dot_general(ctx.astype(md), q.astype(md),
                              (((0,), (0,)), ((), ())),
                              preferred_element_type=jnp.float32)   # (P*h, n)

    # ---- to_out[0] (1x1 conv + bias) and to_out[1] (LayerNorm2D) per element;
    # only tiny (c, n) intermediates live here.
    for e in range(pair):
        out_e = out[e * hidden:(e + 1) * hidden].astype(md)          # (h, n)
        y = jnp.dot(w_out, out_e, preferred_element_type=jnp.float32) + bias
        mean = jnp.mean(y, axis=0, keepdims=True)
        var = jnp.mean((y - mean) ** 2, axis=0, keepdims=True)
        o_ref[e] = ((y - mean) * jax.lax.rsqrt(var + eps) * gamma).astype(
            o_ref.dtype)


def linear_attention_2d(x, w_qkv, w_out, b_out, g, *, heads, dim_head,
                        pair=None, matmul_dtype=jnp.bfloat16):
    """x: (b, c, h, w) NCHW.  Returns (b, c, h, w).

    pair=2 fuses two batch elements per grid step (fills the 256x256 MXU on
    v6e/v7x); pass pair=1 on v5e or when more grid steps are wanted for
    megacore sharding.  matmul_dtype=jnp.float32 is the strict-accuracy mode.
    """
    b, c, h, w = x.shape
    n = h * w
    hidden = heads * dim_head
    assert w_qkv.shape == (3 * hidden, c)
    assert w_out.shape == (c, hidden)

    if pair is None:
        pair = 2 if b % 2 == 0 else 1
    assert pair in (1, 2) and b % pair == 0
    grid = (b // pair,)

    eps = 1e-5 if x.dtype == jnp.float32 else 1e-3   # matches LayerNorm2D
    fold = (dim_head ** -0.5) / n                    # q-scale and v/(h*w)

    x_flat = x.reshape(b, c, n)
    w_qkv_t = jnp.transpose(w_qkv).astype(jnp.float32)       # (c, 3*hidden)
    w_out_f = w_out.astype(jnp.float32)
    b_col = b_out.reshape(c, 1).astype(jnp.float32)
    g_col = g.reshape(c, 1).astype(jnp.float32)

    # Hoisted block-diagonal mask (pair*heads blocks of dim_head), fold baked in.
    seg = jnp.arange(pair * hidden, dtype=jnp.int32) // dim_head
    mask = jnp.where(seg[:, None] == seg[None, :], jnp.float32(fold),
                     jnp.float32(0.0))

    kernel = functools.partial(_linear_attention_kernel, pair=pair, heads=heads,
                               dim_head=dim_head, eps=eps,
                               matmul_dtype=matmul_dtype)

    # --- generation-aware VMEM budget + cost hint for XLA's scheduler ---
    itemsize = jnp.dtype(x.dtype).itemsize
    block_bytes = pair * c * n * itemsize                    # per in/out block
    param_bytes = (c * 3 * hidden + c * hidden + 2 * c
                   + (pair * hidden) ** 2) * 4
    interm_bytes = (pair * 3 * hidden * n       # per-element qkv slabs
                    + 3 * pair * hidden * n     # stacked q, k, v
                    + pair * hidden * n         # out slab
                    + 4 * c * n) * 4 + (pair * hidden) ** 2 * 4
    vmem_est = 2 * (2 * block_bytes) + 2 * param_bytes + interm_bytes
    try:
        phys_vmem = int(getattr(pltpu.get_tpu_info(), "vmem_capacity_bytes",
                                128 * 2 ** 20))
    except Exception:  # not on TPU / query unavailable
        phys_vmem = 128 * 2 ** 20
    vmem_limit = int(min(int(0.8 * phys_vmem),
                         max(2 * vmem_est, 32 * 2 ** 20)))

    steps = b // pair
    cost = pl.CostEstimate(
        flops=int(steps * (pair * 2 * n * 3 * hidden * c
                           + 2 * 2 * n * (pair * hidden) ** 2
                           + pair * 2 * n * c * hidden)),
        transcendentals=int(2 * b * hidden * n),
        bytes_accessed=int(2 * b * c * n * itemsize
                           + (w_qkv.size + w_out.size + b_out.size + g.size
                              + (pair * hidden) ** 2) * 4))

    out = pl.pallas_call(
        kernel,
        out_shape=jax.ShapeDtypeStruct((b, c, n), x.dtype),
        grid_spec=pltpu.PrefetchScalarGridSpec(
            num_scalar_prefetch=0,
            grid=grid,
            in_specs=[
                pl.BlockSpec((pair, c, n), lambda i: (i, 0, 0)),          # x
                # Grid-invariant parameter blocks (tiny, constant index maps).
                pl.BlockSpec((c, 3 * hidden), lambda i: (0, 0)),          # Wqkv^T
                pl.BlockSpec((c, hidden), lambda i: (0, 0)),              # Wout
                pl.BlockSpec((c, 1), lambda i: (0, 0)),                   # bias
                pl.BlockSpec((c, 1), lambda i: (0, 0)),                   # gamma
                pl.BlockSpec((pair * hidden, pair * hidden),
                             lambda i: (0, 0)),                           # mask
            ],
            out_specs=pl.BlockSpec((pair, c, n), lambda i: (i, 0, 0)),
        ),
        compiler_params=pltpu.CompilerParams(
            dimension_semantics=("parallel",),
            vmem_limit_bytes=vmem_limit),
        cost_estimate=cost,
    )(x_flat, w_qkv_t, w_out_f, b_col, g_col, mask)

    return out.reshape(b, c, h, w)


def _reference(x, w_qkv, w_out, b_out, g, *, heads, dim_head):
    """Pure-JAX fp32 reference mirroring the PyTorch forward."""
    b, c, h, w = x.shape
    n = h * w
    hidden = heads * dim_head
    xf = x.reshape(b, c, n).astype(jnp.float32)
    qkv = jnp.einsum('oc,bcn->bon', w_qkv, xf)
    q, k, v = jnp.split(qkv, 3, axis=1)
    q = q.reshape(b, heads, dim_head, n)
    k = k.reshape(b, heads, dim_head, n)
    v = v.reshape(b, heads, dim_head, n)
    q = jax.nn.softmax(q, axis=-2) * dim_head ** (-0.5)
    k = jax.nn.softmax(k, axis=-1)
    v = v / n
    context = jnp.einsum('bhdn,bhen->bhde', k, v)
    out = jnp.einsum('bhde,bhdn->bhen', context, q).reshape(b, hidden, n)
    y = jnp.einsum('oc,bcn->bon', w_out, out) + b_out.reshape(1, c, 1)
    mean = jnp.mean(y, axis=1, keepdims=True)
    var = jnp.mean((y - mean) ** 2, axis=1, keepdims=True)
    y = (y - mean) * jax.lax.rsqrt(var + 1e-5) * g.reshape(1, c, 1)
    return y.reshape(b, c, h, w).astype(x.dtype)


if __name__ == "__main__":
    # Module hyperparameters (defaults: heads=4, dim_head=32 -> hidden=128).
    DIM, HEADS, DIM_HEAD = 8, 4, 32
    HIDDEN = HEADS * DIM_HEAD
    B, H, W = 2, 16, 16

    key = jax.random.PRNGKey(0)
    kx, kq, ko, kb, kg = jax.random.split(key, 5)

    x = jax.random.normal(kx, (B, DIM, H, W), dtype=jnp.float32)
    # Synthetic parameters (shapes from the module __init__).  Scales chosen so
    # the attention path (not the bias) dominates the LayerNorm'd output, which
    # makes the checks sensitive to the fused-head / mask / softmax structure.
    w_qkv = jax.random.normal(kq, (3 * HIDDEN, DIM), dtype=jnp.float32)
    w_out = jax.random.normal(ko, (DIM, HIDDEN), dtype=jnp.float32) * 8.0
    b_out = jax.random.normal(kb, (DIM,), dtype=jnp.float32) * 1e-4
    g = 1.0 + 0.2 * jax.random.normal(kg, (DIM,), dtype=jnp.float32)

    ref = _reference(x, w_qkv, w_out, b_out, g, heads=HEADS, dim_head=DIM_HEAD)

    # Paired path: 2 batch elements fused per step (256-wide MXU on v6e/v7x),
    # bf16 operands with fp32 accumulation.
    out_pair = jax.block_until_ready(linear_attention_2d(
        x, w_qkv, w_out, b_out, g, heads=HEADS, dim_head=DIM_HEAD,
        pair=2, matmul_dtype=jnp.bfloat16))
    assert out_pair.shape == (B, DIM, H, W)
    assert jnp.allclose(out_pair, ref, rtol=5e-2, atol=5e-2), \
        "paired bf16 kernel mismatch"

    # Unpaired path (v5e-friendly / more grid steps for megacore), fp32
    # operands for a tight structural check of the block-diag / softmax /
    # LayerNorm rewrite; tolerance absorbs the approximate EUP reciprocals.
    out_single = jax.block_until_ready(linear_attention_2d(
        x, w_qkv, w_out, b_out, g, heads=HEADS, dim_head=DIM_HEAD,
        pair=1, matmul_dtype=jnp.float32))
    assert out_single.shape == (B, DIM, H, W)
    assert jnp.allclose(out_single, ref, rtol=2e-2, atol=2e-2), \
        "fp32 kernel mismatch"

    print("KERNEL_OK")
</pallas_src>

<mosaic_0001>
module attributes {stable_mosaic.version = 11 : i64} {
  func.func @_linear_attention_kernel(%arg0: i32, %arg1: memref<2x8x256xf32, #tpu.memory_space<vmem>>, %arg2: memref<8x384xf32, #tpu.memory_space<vmem>>, %arg3: memref<8x128xf32, #tpu.memory_space<vmem>>, %arg4: memref<8x1xf32, #tpu.memory_space<vmem>>, %arg5: memref<8x1xf32, #tpu.memory_space<vmem>>, %arg6: memref<256x256xf32, #tpu.memory_space<vmem>>, %arg7: memref<2x8x256xf32, #tpu.memory_space<vmem>>) attributes {dimension_semantics = [#tpu.dimension_semantics<parallel>], iteration_bounds = array<i64: 1>, scalar_prefetch = 0 : i64, scratch_operands = 0 : i64, tpu.core_type = #tpu.core_type<tc>, window_params = [{transform_indices = @transform_0, window_bounds = array<i64: 2, 8, 256>}, {pipeline_mode = #tpu.pipeline_mode<synchronous>, transform_indices = @transform_1, window_bounds = array<i64: 8, 384>}, {pipeline_mode = #tpu.pipeline_mode<synchronous>, transform_indices = @transform_2, window_bounds = array<i64: 8, 128>}, {pipeline_mode = #tpu.pipeline_mode<synchronous>, transform_indices = @transform_3, window_bounds = array<i64: 8, 1>}, {pipeline_mode = #tpu.pipeline_mode<synchronous>, transform_indices = @transform_4, window_bounds = array<i64: 8, 1>}, {pipeline_mode = #tpu.pipeline_mode<synchronous>, transform_indices = @transform_5, window_bounds = array<i64: 256, 256>}, {transform_indices = @transform_6, window_bounds = array<i64: 2, 8, 256>}]} {
    %c0 = arith.constant 0 : index
    %c0_0 = arith.constant 0 : index
    %0 = vector.load %arg2[%c0, %c0_0] : memref<8x384xf32, #tpu.memory_space<vmem>>, vector<8x384xf32>
    %1 = arith.truncf %0 : vector<8x384xf32> to vector<8x384xbf16>
    %c0_1 = arith.constant 0 : index
    %c0_2 = arith.constant 0 : index
    %2 = vector.load %arg3[%c0_1, %c0_2] : memref<8x128xf32, #tpu.memory_space<vmem>>, vector<8x128xf32>
    %3 = arith.truncf %2 : vector<8x128xf32> to vector<8x128xbf16>
    %c0_3 = arith.constant 0 : index
    %c0_4 = arith.constant 0 : index
    %4 = vector.load %arg4[%c0_3, %c0_4] : memref<8x1xf32, #tpu.memory_space<vmem>>, vector<8x1xf32>
    %c0_5 = arith.constant 0 : index
    %c0_6 = arith.constant 0 : index
    %5 = vector.load %arg5[%c0_5, %c0_6] : memref<8x1xf32, #tpu.memory_space<vmem>>, vector<8x1xf32>
    %c0_7 = arith.constant 0 : index
    %c0_8 = arith.constant 0 : index
    %6 = vector.load %arg6[%c0_7, %c0_8] : memref<256x256xf32, #tpu.memory_space<vmem>>, vector<256x256xf32>
    %c0_9 = arith.constant 0 : index
    %c0_10 = arith.constant 0 : index
    %c0_11 = arith.constant 0 : index
    %7 = vector.load %arg1[%c0_9, %c0_10, %c0_11] : memref<2x8x256xf32, #tpu.memory_space<vmem>>, vector<1x8x256xf32>
    %8 = vector.shape_cast %7 : vector<1x8x256xf32> to vector<8x256xf32>
    %9 = arith.truncf %8 : vector<8x256xf32> to vector<8x256xbf16>
    %cst = arith.constant dense<0.000000e+00> : vector<384x256xf32>
    %10 = tpu.matmul %1, %9, %cst {dimension_numbers = #tpu.dot_dimension_numbers<[0], [0], [1], [1], [0, 1, 1, 1], [], []>} : vector<8x384xbf16>, vector<8x256xbf16>, vector<384x256xf32> -> vector<384x256xf32>
    %11 = vector.extract_strided_slice %10 {offsets = [0, 0], sizes = [128, 256], strides = [1, 1]} : vector<384x256xf32> to vector<128x256xf32>
    %12 = vector.extract_strided_slice %10 {offsets = [128, 0], sizes = [128, 256], strides = [1, 1]} : vector<384x256xf32> to vector<128x256xf32>
    %13 = vector.extract_strided_slice %10 {offsets = [256, 0], sizes = [128, 256], strides = [1, 1]} : vector<384x256xf32> to vector<128x256xf32>
    %c1 = arith.constant 1 : index
    %c0_12 = arith.constant 0 : index
    %c0_13 = arith.constant 0 : index
    %14 = vector.load %arg1[%c1, %c0_12, %c0_13] : memref<2x8x256xf32, #tpu.memory_space<vmem>>, vector<1x8x256xf32>
    %15 = vector.shape_cast %14 : vector<1x8x256xf32> to vector<8x256xf32>
    %16 = arith.truncf %15 : vector<8x256xf32> to vector<8x256xbf16>
    %cst_14 = arith.constant dense<0.000000e+00> : vector<384x256xf32>
    %17 = tpu.matmul %1, %16, %cst_14 {dimension_numbers = #tpu.dot_dimension_numbers<[0], [0], [1], [1], [0, 1, 1, 1], [], []>} : vector<8x384xbf16>, vector<8x256xbf16>, vector<384x256xf32> -> vector<384x256xf32>
    %18 = vector.extract_strided_slice %17 {offsets = [0, 0], sizes = [128, 256], strides = [1, 1]} : vector<384x256xf32> to vector<128x256xf32>
    %19 = vector.extract_strided_slice %17 {offsets = [128, 0], sizes = [128, 256], strides = [1, 1]} : vector<384x256xf32> to vector<128x256xf32>
    %20 = vector.extract_strided_slice %17 {offsets = [256, 0], sizes = [128, 256], strides = [1, 1]} : vector<384x256xf32> to vector<128x256xf32>
    %21 = tpu.concatenate %11, %18 in 0 : vector<128x256xf32>, vector<128x256xf32> -> vector<256x256xf32>
    %22 = tpu.concatenate %12, %19 in 0 : vector<128x256xf32>, vector<128x256xf32> -> vector<256x256xf32>
    %23 = tpu.concatenate %13, %20 in 0 : vector<128x256xf32>, vector<128x256xf32> -> vector<256x256xf32>
    %24 = vector.shape_cast %21 : vector<256x256xf32> to vector<8x32x256xf32>
    %cst_15 = arith.constant dense<0xFF800000> : vector<8x256xf32>
    %25 = vector.multi_reduction <maximumf>, %24, %cst_15 [1] : vector<8x32x256xf32> to vector<8x256xf32>
    %26 = vector.shape_cast %25 : vector<8x256xf32> to vector<8x1x256xf32>
    %27 = vector.broadcast %26 : vector<8x1x256xf32> to vector<8x32x256xf32>
    %28 = arith.subf %24, %27 : vector<8x32x256xf32>
    %29 = math.exp %28 : vector<8x32x256xf32>
    %cst_16 = arith.constant dense<0.000000e+00> : vector<8x256xf32>
    %30 = vector.multi_reduction <add>, %29, %cst_16 [1] : vector<8x32x256xf32> to vector<8x256xf32>
    %31 = vector.shape_cast %30 : vector<8x256xf32> to vector<8x1x256xf32>
    %32 = tpu.reciprocal %31 {approx = true} : vector<8x1x256xf32> -> vector<8x1x256xf32>
    %33 = vector.broadcast %32 : vector<8x1x256xf32> to vector<8x32x256xf32>
    %34 = arith.mulf %29, %33 : vector<8x32x256xf32>
    %35 = vector.shape_cast %34 : vector<8x32x256xf32> to vector<256x256xf32>
    %cst_17 = arith.constant dense<0xFF800000> : vector<256xf32>
    %36 = vector.multi_reduction <maximumf>, %22, %cst_17 [1] : vector<256x256xf32> to vector<256xf32>
    %37 = vector.shape_cast %36 : vector<256xf32> to vector<256x1xf32>
    %38 = vector.broadcast %37 : vector<256x1xf32> to vector<256x256xf32>
    %39 = arith.subf %22, %38 : vector<256x256xf32>
    %40 = math.exp %39 : vector<256x256xf32>
    %cst_18 = arith.constant dense<0.000000e+00> : vector<256xf32>
    %41 = vector.multi_reduction <add>, %40, %cst_18 [1] : vector<256x256xf32> to vector<256xf32>
    %42 = vector.shape_cast %41 : vector<256xf32> to vector<256x1xf32>
    %43 = tpu.reciprocal %42 {approx = true} : vector<256x1xf32> -> vector<256x1xf32>
    %44 = vector.broadcast %43 : vector<256x1xf32> to vector<256x256xf32>
    %45 = arith.mulf %40, %44 : vector<256x256xf32>
    %46 = arith.truncf %45 : vector<256x256xf32> to vector<256x256xbf16>
    %47 = arith.truncf %23 : vector<256x256xf32> to vector<256x256xbf16>
    %cst_19 = arith.constant dense<0.000000e+00> : vector<256x256xf32>
    %48 = tpu.matmul %46, %47, %cst_19 {dimension_numbers = #tpu.dot_dimension_numbers<[1], [1], [0], [0], [0, 0, 1, 0], [], []>} : vector<256x256xbf16>, vector<256x256xbf16>, vector<256x256xf32> -> vector<256x256xf32>
    %49 = arith.mulf %48, %6 : vector<256x256xf32>
    %50 = arith.truncf %49 : vector<256x256xf32> to vector<256x256xbf16>
    %51 = arith.truncf %35 : vector<256x256xf32> to vector<256x256xbf16>
    %cst_20 = arith.constant dense<0.000000e+00> : vector<256x256xf32>
    %52 = tpu.matmul %50, %51, %cst_20 {dimension_numbers = #tpu.dot_dimension_numbers<[0], [0], [1], [1], [0, 1, 1, 1], [], []>} : vector<256x256xbf16>, vector<256x256xbf16>, vector<256x256xf32> -> vector<256x256xf32>
    %53 = vector.extract_strided_slice %52 {offsets = [0, 0], sizes = [128, 256], strides = [1, 1]} : vector<256x256xf32> to vector<128x256xf32>
    %54 = arith.truncf %53 : vector<128x256xf32> to vector<128x256xbf16>
    %cst_21 = arith.constant dense<0.000000e+00> : vector<8x256xf32>
    %55 = tpu.matmul %3, %54, %cst_21 {dimension_numbers = #tpu.dot_dimension_numbers<[1], [0], [0], [1], [0, 0, 1, 1], [], []>} : vector<8x128xbf16>, vector<128x256xbf16>, vector<8x256xf32> -> vector<8x256xf32>
    %56 = vector.broadcast %4 : vector<8x1xf32> to vector<8x256xf32>
    %57 = arith.addf %55, %56 : vector<8x256xf32>
    %cst_22 = arith.constant dense<0.000000e+00> : vector<256xf32>
    %58 = vector.multi_reduction <add>, %57, %cst_22 [0] : vector<8x256xf32> to vector<256xf32>
    %59 = vector.shape_cast %58 : vector<256xf32> to vector<1x256xf32>
    %cst_23 = arith.constant 8.000000e+00 : f32
    %60 = vector.broadcast %cst_23 : f32 to vector<1x256xf32>
    %61 = arith.divf %59, %60 : vector<1x256xf32>
    %62 = vector.broadcast %61 : vector<1x256xf32> to vector<8x256xf32>
    %63 = arith.subf %57, %62 : vector<8x256xf32>
    %64 = arith.mulf %63, %63 : vector<8x256xf32>
    %cst_24 = arith.constant dense<0.000000e+00> : vector<256xf32>
    %65 = vector.multi_reduction <add>, %64, %cst_24 [0] : vector<8x256xf32> to vector<256xf32>
    %66 = vector.shape_cast %65 : vector<256xf32> to vector<1x256xf32>
    %cst_25 = arith.constant 8.000000e+00 : f32
    %67 = vector.broadcast %cst_25 : f32 to vector<1x256xf32>
    %68 = arith.divf %66, %67 : vector<1x256xf32>
    %69 = vector.broadcast %61 : vector<1x256xf32> to vector<8x256xf32>
    %70 = arith.subf %57, %69 : vector<8x256xf32>
    %cst_26 = arith.constant 9.99999974E-6 : f32
    %71 = vector.broadcast %cst_26 : f32 to vector<1x256xf32>
    %72 = arith.addf %68, %71 : vector<1x256xf32>
    %73 = math.rsqrt %72 : vector<1x256xf32>
    %74 = vector.broadcast %73 : vector<1x256xf32> to vector<8x256xf32>
    %75 = arith.mulf %70, %74 : vector<8x256xf32>
    %76 = vector.broadcast %5 : vector<8x1xf32> to vector<8x256xf32>
    %77 = arith.mulf %75, %76 : vector<8x256xf32>
    %c0_27 = arith.constant 0 : index
    %c0_28 = arith.constant 0 : index
    %c0_29 = arith.constant 0 : index
    %78 = vector.load %arg7[%c0_27, %c0_28, %c0_29] : memref<2x8x256xf32, #tpu.memory_space<vmem>>, vector<1x8x256xf32>
    %79 = vector.shape_cast %78 : vector<1x8x256xf32> to vector<8x256xf32>
    %80 = vector.shape_cast %77 : vector<8x256xf32> to vector<1x8x256xf32>
    tpu.vector_store %arg7[%c0_27, %c0_28, %c0_29], %80 {strides = array<i32>} : memref<2x8x256xf32, #tpu.memory_space<vmem>>, vector<1x8x256xf32>,
    %81 = vector.extract_strided_slice %52 {offsets = [128, 0], sizes = [128, 256], strides = [1, 1]} : vector<256x256xf32> to vector<128x256xf32>
    %82 = arith.truncf %81 : vector<128x256xf32> to vector<128x256xbf16>
    %cst_30 = arith.constant dense<0.000000e+00> : vector<8x256xf32>
    %83 = tpu.matmul %3, %82, %cst_30 {dimension_numbers = #tpu.dot_dimension_numbers<[1], [0], [0], [1], [0, 0, 1, 1], [], []>} : vector<8x128xbf16>, vector<128x256xbf16>, vector<8x256xf32> -> vector<8x256xf32>
    %84 = vector.broadcast %4 : vector<8x1xf32> to vector<8x256xf32>
    %85 = arith.addf %83, %84 : vector<8x256xf32>
    %cst_31 = arith.constant dense<0.000000e+00> : vector<256xf32>
    %86 = vector.multi_reduction <add>, %85, %cst_31 [0] : vector<8x256xf32> to vector<256xf32>
    %87 = vector.shape_cast %86 : vector<256xf32> to vector<1x256xf32>
    %cst_32 = arith.constant 8.000000e+00 : f32
    %88 = vector.broadcast %cst_32 : f32 to vector<1x256xf32>
    %89 = arith.divf %87, %88 : vector<1x256xf32>
    %90 = vector.broadcast %89 : vector<1x256xf32> to vector<8x256xf32>
    %91 = arith.subf %85, %90 : vector<8x256xf32>
    %92 = arith.mulf %91, %91 : vector<8x256xf32>
    %cst_33 = arith.constant dense<0.000000e+00> : vector<256xf32>
    %93 = vector.multi_reduction <add>, %92, %cst_33 [0] : vector<8x256xf32> to vector<256xf32>
    %94 = vector.shape_cast %93 : vector<256xf32> to vector<1x256xf32>
    %cst_34 = arith.constant 8.000000e+00 : f32
    %95 = vector.broadcast %cst_34 : f32 to vector<1x256xf32>
    %96 = arith.divf %94, %95 : vector<1x256xf32>
    %97 = vector.broadcast %89 : vector<1x256xf32> to vector<8x256xf32>
    %98 = arith.subf %85, %97 : vector<8x256xf32>
    %cst_35 = arith.constant 9.99999974E-6 : f32
    %99 = vector.broadcast %cst_35 : f32 to vector<1x256xf32>
    %100 = arith.addf %96, %99 : vector<1x256xf32>
    %101 = math.rsqrt %100 : vector<1x256xf32>
    %102 = vector.broadcast %101 : vector<1x256xf32> to vector<8x256xf32>
    %103 = arith.mulf %98, %102 : vector<8x256xf32>
    %104 = vector.broadcast %5 : vector<8x1xf32> to vector<8x256xf32>
    %105 = arith.mulf %103, %104 : vector<8x256xf32>
    %c1_36 = arith.constant 1 : index
    %c0_37 = arith.constant 0 : index
    %c0_38 = arith.constant 0 : index
    %106 = vector.load %arg7[%c1_36, %c0_37, %c0_38] : memref<2x8x256xf32, #tpu.memory_space<vmem>>, vector<1x8x256xf32>
    %107 = vector.shape_cast %106 : vector<1x8x256xf32> to vector<8x256xf32>
    %108 = vector.shape_cast %105 : vector<8x256xf32> to vector<1x8x256xf32>
    tpu.vector_store %arg7[%c1_36, %c0_37, %c0_38], %108 {strides = array<i32>} : memref<2x8x256xf32, #tpu.memory_space<vmem>>, vector<1x8x256xf32>,
    return
  }
  func.func @transform_0(%arg0: i32) -> (i32, i32, i32) {
    %c0_i32 = arith.constant 0 : i32
    %c0_i32_0 = arith.constant 0 : i32
    %c0_i32_1 = arith.constant 0 : i32
    return %arg0, %c0_i32, %c0_i32_0 : i32, i32, i32
  }
  func.func @transform_1(%arg0: i32) -> (i32, i32) {
    %c0_i32 = arith.constant 0 : i32
    %c0_i32_0 = arith.constant 0 : i32
    %c0_i32_1 = arith.constant 0 : i32
    return %c0_i32, %c0_i32_0 : i32, i32
  }
  func.func @transform_2(%arg0: i32) -> (i32, i32) {
    %c0_i32 = arith.constant 0 : i32
    %c0_i32_0 = arith.constant 0 : i32
    %c0_i32_1 = arith.constant 0 : i32
    return %c0_i32, %c0_i32_0 : i32, i32
  }
  func.func @transform_3(%arg0: i32) -> (i32, i32) {
    %c0_i32 = arith.constant 0 : i32
    %c0_i32_0 = arith.constant 0 : i32
    %c0_i32_1 = arith.constant 0 : i32
    return %c0_i32, %c0_i32_0 : i32, i32
  }
  func.func @transform_4(%arg0: i32) -> (i32, i32) {
    %c0_i32 = arith.constant 0 : i32
    %c0_i32_0 = arith.constant 0 : i32
    %c0_i32_1 = arith.constant 0 : i32
    return %c0_i32, %c0_i32_0 : i32, i32
  }
  func.func @transform_5(%arg0: i32) -> (i32, i32) {
    %c0_i32 = arith.constant 0 : i32
    %c0_i32_0 = arith.constant 0 : i32
    %c0_i32_1 = arith.constant 0 : i32
    return %c0_i32, %c0_i32_0 : i32, i32
  }
  func.func @transform_6(%arg0: i32) -> (i32, i32, i32) {
    %c0_i32 = arith.constant 0 : i32
    %c0_i32_0 = arith.constant 0 : i32
    %c0_i32_1 = arith.constant 0 : i32
    return %arg0, %c0_i32, %c0_i32_0 : i32, i32, i32
  }
}

</mosaic_0001>

<bundles_post_ra>
// kernel: tpu_custom_call.1
= control target key start
LH: loop header
LB: loop body
LE: loop exit
PB: predicated region body
PF: predicated region fallthrough
CT: control target
= control target key end

     0   :  { %11 = vsyncpa [#allocation3], 0  ;;  %s5050_s0 = inlined_call_operand.hbm [shape: f32[2,8,256], index: 0, kind: input, shape index: {}]   ;;  %s5051_s1 = inlined_call_operand.hbm [shape: f32[8,384], index: 1, kind: input, shape index: {}]   ;;  %s5052_s2 = inlined_call_operand.vmem [shape: f32[8,128], index: 2, kind: input, shape index: {}]   ;;  %s5053_s3 = inlined_call_operand.vmem [shape: f32[8,1], index: 3, kind: input, shape index: {}]   ;;  %s5054_s4 = inlined_call_operand.vmem [shape: f32[8,1], index: 4, kind: input, shape index: {}]   ;;  %s5055_s5 = inlined_call_operand.hbm [shape: f32[256,256], index: 5, kind: input, shape index: {}]   ;;  %s5056_s6 = inlined_call_operand.hbm [shape: f32[2,8,256], index: 6, kind: output, shape index: {}]  }
   0x1   :  { %12 = vsyncpa [#allocation6], 0 }
   0x2   :  { %13 = vsyncpa [#allocation4], 0  ;;  %s3250_s21 = smov [#allocation5]   ;;  %s3251_s23 = smov [#allocation2]  }
   0x3   :  { %s32_s22 = sshll.u32 %s3250_s21, 4  ;;  %s19_s24 = sshll.u32 %s3251_s23, 4  ;;  %s33_s22 = int_to_ptr.vmem [resolvable:$true] %s32_s22  ;;  %s3292_s24 = int_to_ptr.vmem [resolvable:$true] %s19_s24 }
   0x4   :  { %s3156_s27 = scalar_lea.hbm %s5051_s1, 384 }
   0x5   :  { %p3157_p0 = scmp.ne.s32.totalorder %s5051_s1, %s3156_s27  ;;  %p3160_p1 = scmp.lt.u32.totalorder %s3156_s27, %s5051_s1 }
   0x7   :  { %p3162_p2 = pnand %p3160_p1, %p3157_p0 }
   0x9   :  { %3165 = shalt.err (!%p3162_p2)
}
   0xa   :  { %s3166_s8 = scalar_lea.vmem %s33_s22, 384  ;;  %p3171_p4 = scmp.lt.s32.totalorder %s33_s22, %s33_s22 }
   0xb   :  { %p3167_p3 = scmp.ne.s32.totalorder %s33_s22, %s3166_s8  ;;  %p3172_p5 = scmp.lt.s32.totalorder %s3166_s8, %s3166_s8 }
   0xd   :  { %p3173_p6 = por %p3172_p5, %p3171_p4 }
   0xf   :  { %p3174_p7 = pnand %p3173_p6, %p3167_p3 }
  0x11   :  { %3177 = shalt.err (!%p3174_p7)
}
  0x12   :  { %35 = dma.hbm_to_vmem [thread:$0]  %s5051_s1, 384, %s33_s22, [#allocation6]  }
  0x13   :  { %s3178_s13 = scalar_lea.hbm %s5050_s0, 512 }
  0x14   :  { %p3179_p8 = scmp.ne.s32.totalorder %s5050_s0, %s3178_s13  ;;  %p3182_p9 = scmp.lt.u32.totalorder %s3178_s13, %s5050_s0 }
  0x16   :  { %p3184_p10 = pnand %p3182_p9, %p3179_p8 }
  0x18   :  { %3187 = shalt.err (!%p3184_p10)
}
  0x19   :  { %s3188_s18 = scalar_lea.vmem %s3292_s24, 512  ;;  %p3193_p12 = scmp.lt.s32.totalorder %s3292_s24, %s3292_s24 }
  0x1a   :  { %p3189_p11 = scmp.ne.s32.totalorder %s3292_s24, %s3188_s18  ;;  %p3194_p13 = scmp.lt.s32.totalorder %s3188_s18, %s3188_s18 }
  0x1c   :  { %p3195_p0 = por %p3194_p13, %p3193_p12 }
  0x1e   :  { %p3196_p1 = pnand %p3195_p0, %p3189_p11 }
  0x20   :  { %3199 = shalt.err (!%p3196_p1)
}
  0x21   :  { %s3252_s1 = smov 256   ;;  %s3253_s19 = smov 16  }
  0x22   :  { %25 = dma.hbm_to_vmem [thread:$0]  %s5050_s0, 512, %s3292_s24, [#allocation3], %s3252_s1, %s3252_s1, %s3253_s19  }
  0x23   :  { %s3254_s22 = smov [#allocation7]   ;;  %s3200_s27 = scalar_lea.hbm %s5055_s5, 8192 }
  0x24   :  { %s47_s23 = sshll.u32 %s3254_s22, 4  ;;  %p3201_p2 = scmp.ne.s32.totalorder %s5055_s5, %s3200_s27  ;;  %s48_s23 = int_to_ptr.vmem [resolvable:$true] %s47_s23 }
  0x25   :  { %p3204_p3 = scmp.lt.u32.totalorder %s3200_s27, %s5055_s5 }
  0x27   :  { %p3206_p4 = pnand %p3204_p3, %p3201_p2 }
  0x29   :  { %3209 = shalt.err (!%p3206_p4)
}
  0x2a   :  { %s3210_s8 = scalar_lea.vmem %s48_s23, 8192  ;;  %p3215_p6 = scmp.lt.s32.totalorder %s48_s23, %s48_s23 }
  0x2b   :  { %p3211_p5 = scmp.ne.s32.totalorder %s48_s23, %s3210_s8  ;;  %p3216_p7 = scmp.lt.s32.totalorder %s3210_s8, %s3210_s8 }
  0x2d   :  { %p3217_p8 = por %p3216_p7, %p3215_p6 }
  0x2f   :  { %p3218_p9 = pnand %p3217_p8, %p3211_p5 }
  0x31   :  { %3221 = shalt.err (!%p3218_p9)
}
  0x32   :  { %53 = dma.hbm_to_vmem [thread:$0]  %s5055_s5, 8192, %s48_s23, [#allocation6], %s3252_s1, %s3252_s1, %s3253_s19  }
  0x33   :  { %3244 = dma.done.wait [#allocation3], 512  }
  0x34   :  { %3245 = vsyncadd [#allocation3], 4294966784 }
  0x35   :  { %3246 = dma.done.wait [#allocation6], 8576  }
  0x36   :  { %3247 = vsyncadd [#allocation6], 4294958720  ;;  %v5057_v0 = vmov 0   ;;  %v64_v1 = vld [vmem:[#allocation5] sm:$0xff]  ;;  %v139_v2 = vld [vmem:[#allocation2 + $0x8] sm:$0xff]  ;;  %vm263_vm0 = vcmask 1043456  }
  0x37   :  { %302 = vmatprep.mubr.bf16.mxu0 %v5057_v0  ;;  %586 = vmatprep.mubr.bf16.mxu1 %v5057_v0  ;;  %v67_v3 = vpack.c.bf16 %v64_v1, %v64_v1  ;;  %v141_v4 = vpack.c.bf16 %v139_v2, %v139_v2  ;;  %v545_v5 = vld [vmem:[#allocation2 + $0x18] sm:$0xff]  ;;  %v138_v6 = vld [vmem:[#allocation2] sm:$0xff]  ;;  %v544_v7 = vld [vmem:[#allocation2 + $0x10] sm:$0xff]  ;;  %vm190_vm1 = vcmask 64512  }
  0x38   :  { %v547_v8 = vpack.c.bf16 %v545_v5, %v545_v5  ;;  %v140_v9 = vpack.c.bf16 %v138_v6, %v138_v6  ;;  %v546_v10 = vpack.c.bf16 %v544_v7, %v544_v7  ;;  %v65_v13 = vld [vmem:[#allocation5 + $0x8] sm:$0xff]  ;;  %v66_v15 = vld [vmem:[#allocation5 + $0x10] sm:$0xff] }
  0x39   :  { %142 = vxpose.xlu0.c.b16.start.end [1/1] (short) %v67_v3, 128  ;;  %2737 = vmatprep.subr.msk.bf16.mxu0 %vm263_vm0, %v141_v4  ;;  %v68_v14 = vpack.c.bf16 %v65_v13, %v65_v13  ;;  %v69_v16 = vpack.c.bf16 %v66_v15, %v66_v15 }
  0x3a   :  { %2762 = vmatprep.subr.msk.bf16.mxu1 %vm263_vm0, %v547_v8  ;;  %v265_v11 = vsel %vm263_vm0, %v140_v9, 0  ;;  %v549_v12 = vsel %vm263_vm0, %v546_v10, 0 }
  0x3b   :  { %271 = vmatpush1.bf16.msra.mxu0 %v265_v11  ;;  %555 = vmatpush1.bf16.msra.mxu1 %v549_v12 }
  0x3c   :  { %174 = vxpose.xlu1.c.b16.start.end [1/1] (short) %v69_v16, 128 }
  0x56   :  { %158 = vxpose.xlu0.c.b16.start.end [1/1] (short) %v68_v14, 128 }
  0x9f   :  { %v150_v17 = vpop.trf.xlu0 }
  0xa0   :  { %2738 = vmatmul.mubr.msk.bf16.vlgmr.msra.gmra.mrb[0].mxu0 %vm190_vm1, %v150_v17  ;;  %2763 = vmatmul.mubr.msk.bf16.vlgmr.msra.gmra.mrb[0].mxu1 %vm190_vm1, %v150_v17 }
  0xa1   :  { %312 = vmatprep.mubr.bf16.mxu0 %v5057_v0  ;;  %596 = vmatprep.mubr.bf16.mxu1 %v5057_v0 }
  0xa2   :  { %v182_v33 = vpop.trf.xlu1 }
  0xa3   :  { %v151_v18 = vpop.trf.xlu0 }
  0xa6   :  { %v183_v34 = vpop.trf.xlu1 }
  0xa7   :  { %v152_v19 = vpop.trf.xlu0 }
  0xa8   :  { %2739 = vmatmul.mubr.msk.bf16.gmra.mrb[4].mxu0 %vm190_vm1, %v151_v18  ;;  %2764 = vmatmul.mubr.msk.bf16.gmra.mrb[4].mxu1 %vm190_vm1, %v151_v18 }
  0xa9   :  { %322 = vmatprep.mubr.bf16.mxu0 %v5057_v0  ;;  %606 = vmatprep.mubr.bf16.mxu1 %v5057_v0 }
  0xaa   :  { %v184_v35 = vpop.trf.xlu1 }
  0xab   :  { %v153_v20 = vpop.trf.xlu0 }
  0xae   :  { %v185_v36 = vpop.trf.xlu1 }
  0xaf   :  { %v154_v21 = vpop.trf.xlu0 }
  0xb0   :  { %2740 = vmatmul.mubr.msk.bf16.gmra.mrb[8].mxu0 %vm190_vm1, %v152_v19  ;;  %2765 = vmatmul.mubr.msk.bf16.gmra.mrb[8].mxu1 %vm190_vm1, %v152_v19 }
  0xb1   :  { %332 = vmatprep.mubr.bf16.mxu0 %v5057_v0  ;;  %616 = vmatprep.mubr.bf16.mxu1 %v5057_v0 }
  0xb2   :  { %v186_v49 = vpop.trf.xlu1 }
  0xb3   :  { %v155_v22 = vpop.trf.xlu0 }
  0xb6   :  { %v187_v9 = vpop.trf.xlu1 }
  0xb7   :  { %v156_v23 = vpop.trf.xlu0 }
  0xb8   :  { %2741 = vmatmul.mubr.msk.bf16.gmra.mrb[12].mxu0 %vm190_vm1, %v153_v20  ;;  %2766 = vmatmul.mubr.msk.bf16.gmra.mrb[12].mxu1 %vm190_vm1, %v153_v20 }
  0xb9   :  { %342 = vmatprep.mubr.bf16.mxu0 %v5057_v0  ;;  %626 = vmatprep.mubr.bf16.mxu1 %v5057_v0 }
  0xbb   :  { %v157_v24 = vpop.trf.xlu0 }
  0xbf   :  { %v166_v25 = vpop.trf.xlu0 }
  0xc0   :  { %2742 = vmatmul.mubr.msk.bf16.gmra.mrb[16].mxu0 %vm190_vm1, %v154_v21  ;;  %2767 = vmatmul.mubr.msk.bf16.gmra.mrb[16].mxu1 %vm190_vm1, %v154_v21 }
  0xc1   :  { %352 = vmatprep.mubr.bf16.mxu0 %v5057_v0  ;;  %636 = vmatprep.mubr.bf16.mxu1 %v5057_v0 }
  0xc3   :  { %v167_v26 = vpop.trf.xlu0 }
  0xc7   :  { %v168_v27 = vpop.trf.xlu0 }
  0xc8   :  { %2743 = vmatmul.mubr.msk.bf16.gmra.mrb[20].mxu0 %vm190_vm1, %v155_v22  ;;  %2768 = vmatmul.mubr.msk.bf16.gmra.mrb[20].mxu1 %vm190_vm1, %v155_v22 }
  0xc9   :  { %362 = vmatprep.mubr.bf16.mxu0 %v5057_v0  ;;  %646 = vmatprep.mubr.bf16.mxu1 %v5057_v0 }
  0xcb   :  { %v169_v28 = vpop.trf.xlu0 }
  0xcf   :  { %v170_v29 = vpop.trf.xlu0 }
  0xd0   :  { %2744 = vmatmul.mubr.msk.bf16.gmra.mrb[24].mxu0 %vm190_vm1, %v156_v23  ;;  %2769 = vmatmul.mubr.msk.bf16.gmra.mrb[24].mxu1 %vm190_vm1, %v156_v23 }
  0xd1   :  { %372 = vmatprep.mubr.bf16.mxu0 %v5057_v0  ;;  %656 = vmatprep.mubr.bf16.mxu1 %v5057_v0 }
  0xd3   :  { %v171_v30 = vpop.trf.xlu0 }
  0xd7   :  { %v172_v31 = vpop.trf.xlu0 }
  0xd8   :  { %2745 = vmatmul.mubr.msk.bf16.gmra.mrb[28].mxu0 %vm190_vm1, %v157_v24  ;;  %2770 = vmatmul.mubr.msk.bf16.gmra.mrb[28].mxu1 %vm190_vm1, %v157_v24 }
  0xd9   :  { %382 = vmatprep.mubr.bf16.mxu0 %v5057_v0  ;;  %666 = vmatprep.mubr.bf16.mxu1 %v5057_v0 }
  0xdb   :  { %v173_v32 = vpop.trf.xlu0 }
  0xe0   :  { %2746 = vmatmul.mubr.msk.bf16.gmra.mrb[32].mxu0 %vm190_vm1, %v166_v25  ;;  %2771 = vmatmul.mubr.msk.bf16.gmra.mrb[32].mxu1 %vm190_vm1, %v166_v25 }
  0xe1   :  { %392 = vmatprep.mubr.bf16.mxu0 %v5057_v0  ;;  %676 = vmatprep.mubr.bf16.mxu1 %v5057_v0 }
  0xe8   :  { %2747 = vmatmul.mubr.msk.bf16.gmra.mrb[36].mxu0 %vm190_vm1, %v167_v26  ;;  %2772 = vmatmul.mubr.msk.bf16.gmra.mrb[36].mxu1 %vm190_vm1, %v167_v26 }
  0xe9   :  { %402 = vmatprep.mubr.bf16.mxu0 %v5057_v0  ;;  %686 = vmatprep.mubr.bf16.mxu1 %v5057_v0 }
  0xf0   :  { %2748 = vmatmul.mubr.msk.bf16.gmra.mrb[40].mxu0 %vm190_vm1, %v168_v27  ;;  %2773 = vmatmul.mubr.msk.bf16.gmra.mrb[40].mxu1 %vm190_vm1, %v168_v27 }
  0xf1   :  { %412 = vmatprep.mubr.bf16.mxu0 %v5057_v0  ;;  %696 = vmatprep.mubr.bf16.mxu1 %v5057_v0 }
  0xf8   :  { %2749 = vmatmul.mubr.msk.bf16.gmra.mrb[44].mxu0 %vm190_vm1, %v169_v28  ;;  %2774 = vmatmul.mubr.msk.bf16.gmra.mrb[44].mxu1 %vm190_vm1, %v169_v28 }
  0xf9   :  { %422 = vmatprep.mubr.bf16.mxu0 %v5057_v0  ;;  %706 = vmatprep.mubr.bf16.mxu1 %v5057_v0 }
 0x100   :  { %2750 = vmatmul.mubr.msk.bf16.gmra.mrb[48].mxu0 %vm190_vm1, %v170_v29  ;;  %2775 = vmatmul.mubr.msk.bf16.gmra.mrb[48].mxu1 %vm190_vm1, %v170_v29 }
 0x101   :  { %432 = vmatprep.mubr.bf16.mxu0 %v5057_v0  ;;  %716 = vmatprep.mubr.bf16.mxu1 %v5057_v0 }
 0x108   :  { %2751 = vmatmul.mubr.msk.bf16.gmra.mrb[52].mxu0 %vm190_vm1, %v171_v30  ;;  %2776 = vmatmul.mubr.msk.bf16.gmra.mrb[52].mxu1 %vm190_vm1, %v171_v30 }
 0x109   :  { %442 = vmatprep.mubr.bf16.mxu0 %v5057_v0  ;;  %726 = vmatprep.mubr.bf16.mxu1 %v5057_v0 }
 0x110   :  { %2752 = vmatmul.mubr.msk.bf16.gmra.mrb[56].mxu0 %vm190_vm1, %v172_v31  ;;  %2777 = vmatmul.mubr.msk.bf16.gmra.mrb[56].mxu1 %vm190_vm1, %v172_v31 }
 0x111   :  { %452 = vmatprep.mubr.bf16.mxu0 %v5057_v0  ;;  %736 = vmatprep.mubr.bf16.mxu1 %v5057_v0 }
 0x118   :  { %2753 = vmatmul.mubr.msk.bf16.gmra.mrb[60].mxu0 %vm190_vm1, %v173_v32  ;;  %2778 = vmatmul.mubr.msk.bf16.gmra.mrb[60].mxu1 %vm190_vm1, %v173_v32 }
 0x119   :  { %462 = vmatprep.mubr.bf16.mxu0 %v5057_v0  ;;  %746 = vmatprep.mubr.bf16.mxu1 %v5057_v0 }
 0x120   :  { %2754 = vmatmul.mubr.msk.bf16.gmra.mrb[64].mxu0 %vm190_vm1, %v182_v33  ;;  %2779 = vmatmul.mubr.msk.bf16.gmra.mrb[64].mxu1 %vm190_vm1, %v182_v33 }
 0x121   :  { %472 = vmatprep.mubr.bf16.mxu0 %v5057_v0  ;;  %756 = vmatprep.mubr.bf16.mxu1 %v5057_v0 }
 0x128   :  { %2755 = vmatmul.mubr.msk.bf16.gmra.mrb[68].mxu0 %vm190_vm1, %v183_v34  ;;  %2780 = vmatmul.mubr.msk.bf16.gmra.mrb[68].mxu1 %vm190_vm1, %v183_v34 }
 0x129   :  { %482 = vmatprep.mubr.bf16.mxu0 %v5057_v0  ;;  %766 = vmatprep.mubr.bf16.mxu1 %v5057_v0 }
 0x130   :  { %2756 = vmatmul.mubr.msk.bf16.gmra.mrb[72].mxu0 %vm190_vm1, %v184_v35  ;;  %2781 = vmatmul.mubr.msk.bf16.gmra.mrb[72].mxu1 %vm190_vm1, %v184_v35 }
 0x131   :  { %492 = vmatprep.mubr.bf16.mxu0 %v5057_v0  ;;  %776 = vmatprep.mubr.bf16.mxu1 %v5057_v0 }
 0x138   :  { %2757 = vmatmul.mubr.msk.bf16.gmra.mrb[76].mxu0 %vm190_vm1, %v185_v36  ;;  %2782 = vmatmul.mubr.msk.bf16.gmra.mrb[76].mxu1 %vm190_vm1, %v185_v36 }
 0x139   :  { %502 = vmatprep.mubr.bf16.mxu0 %v5057_v0  ;;  %786 = vmatprep.mubr.bf16.mxu1 %v5057_v0 }
 0x140   :  { %2758 = vmatmul.mubr.msk.bf16.gmra.mrb[80].mxu0 %vm190_vm1, %v186_v49  ;;  %2783 = vmatmul.mubr.msk.bf16.gmra.mrb[80].mxu1 %vm190_vm1, %v186_v49 }
 0x141   :  { %512 = vmatprep.mubr.bf16.mxu0 %v5057_v0  ;;  %796 = vmatprep.mubr.bf16.mxu1 %v5057_v0 }
 0x148   :  { %2759 = vmatmul.mubr.msk.bf16.gmra.mrb[84].mxu0 %vm190_vm1, %v187_v9  ;;  %2784 = vmatmul.mubr.msk.bf16.gmra.mrb[84].mxu1 %vm190_vm1, %v187_v9 }
 0x149   :  { %522 = vmatprep.mubr.bf16.mxu0 %v5057_v0  ;;  %806 = vmatprep.mubr.bf16.mxu1 %v5057_v0 }
 0x173   :  { %v3423_v37 = vpop.f32.mrb[0].mxu0  ;;  %v3425_v38 = vpop.f32.mrb[0].mxu1 }
 0x174   :  { %v3427_v39 = vpop.f32.mrb[1].mxu0  ;;  %v3429_v40 = vpop.f32.mrb[1].mxu1 }
 0x175   :  { %v3431_v41 = vpop.f32.mrb[2].mxu0  ;;  %v3433_v42 = vpop.f32.mrb[2].mxu1 }
 0x176   :  { %v827_v43 = vmax.f32 %v3423_v37, %v3431_v41  ;;  %v899_v44 = vmax.f32 %v3425_v38, %v3433_v42  ;;  %v3439_v45 = vpop.f32.mrb[3].mxu0  ;;  %v3441_v46 = vpop.f32.mrb[3].mxu1 }
 0x177   :  { %v836_v47 = vmax.f32 %v3427_v39, %v3439_v45  ;;  %v908_v48 = vmax.f32 %v3429_v40, %v3441_v46 }
 0x17b   :  { %v3451_v50 = vpop.f32.mrb[4].mxu0  ;;  %v3453_v51 = vpop.f32.mrb[4].mxu1 }
 0x17c   :  { %v828_v52 = vmax.f32 %v827_v43, %v3451_v50  ;;  %v900_v53 = vmax.f32 %v899_v44, %v3453_v51  ;;  %v3457_v54 = vpop.f32.mrb[5].mxu0  ;;  %v3459_v55 = vpop.f32.mrb[5].mxu1 }
 0x17d   :  { %v837_v56 = vmax.f32 %v836_v47, %v3457_v54  ;;  %v909_v57 = vmax.f32 %v908_v48, %v3459_v55  ;;  %v3463_v58 = vpop.f32.mrb[6].mxu0  ;;  %v3465_v59 = vpop.f32.mrb[6].mxu1 }
 0x17e   :  { %v829_v60 = vmax.f32 %v828_v52, %v3463_v58  ;;  %v901_v61 = vmax.f32 %v900_v53, %v3465_v59  ;;  %v3469_v62 = vpop.f32.mrb[7].mxu0  ;;  %v3471_v63 = vpop.f32.mrb[7].mxu1 }
 0x17f   :  { %v838_v1 = vmax.f32 %v837_v56, %v3469_v62  ;;  %v910_v2 = vmax.f32 %v909_v57, %v3471_v63  ;;  %v188_v44 = vpop.trf.xlu1 }
 0x180   :  { %v830_v3 = vrot.slane %v829_v60, 4  ;;  %v902_v4 = vrot.slane %v901_v61, 4  ;;  %2760 = vmatmul.mubr.msk.bf16.gmra.mrb[88].mxu0 %vm190_vm1, %v188_v44  ;;  %2785 = vmatmul.mubr.msk.bf16.gmra.mrb[88].mxu1 %vm190_vm1, %v188_v44 }
 0x181   :  { %v839_v5 = vrot.slane %v838_v1, 4  ;;  %v911_v6 = vrot.slane %v910_v2, 4  ;;  %532 = vmatprep.mubr.bf16.mxu0 %v5057_v0  ;;  %816 = vmatprep.mubr.bf16.mxu1 %v5057_v0 }
 0x182   :  { %v831_v7 = vmax.f32 %v829_v60, %v830_v3  ;;  %v903_v8 = vmax.f32 %v901_v61, %v902_v4 }
 0x183   :  { %v840_v10 = vmax.f32 %v838_v1, %v839_v5  ;;  %v912_v11 = vmax.f32 %v910_v2, %v911_v6  ;;  %v3475_v12 = vpop.f32.mrb[8].mxu0  ;;  %v3477_v13 = vpop.f32.mrb[8].mxu1 }
 0x184   :  { %v832_v14 = vrot.slane %v831_v7, 2  ;;  %v904_v15 = vrot.slane %v903_v8, 2  ;;  %v3481_v16 = vpop.f32.mrb[9].mxu0  ;;  %v3483_v17 = vpop.f32.mrb[9].mxu1 }
 0x185   :  { %v841_v18 = vrot.slane %v840_v10, 2  ;;  %v913_v19 = vrot.slane %v912_v11, 2  ;;  %v3487_v20 = vpop.f32.mrb[10].mxu0  ;;  %v3489_v21 = vpop.f32.mrb[10].mxu1 }
 0x186   :  { %v833_v22 = vmax.f32 %v831_v7, %v832_v14  ;;  %v905_v23 = vmax.f32 %v903_v8, %v904_v15  ;;  %v845_v24 = vmax.f32 %v3475_v12, %v3487_v20  ;;  %v917_v25 = vmax.f32 %v3477_v13, %v3489_v21  ;;  %v3495_v26 = vpop.f32.mrb[11].mxu0  ;;  %v3497_v27 = vpop.f32.mrb[11].mxu1 }
 0x187   :  { %v842_v28 = vmax.f32 %v840_v10, %v841_v18  ;;  %v914_v29 = vmax.f32 %v912_v11, %v913_v19  ;;  %v854_v30 = vmax.f32 %v3481_v16, %v3495_v26  ;;  %v926_v31 = vmax.f32 %v3483_v17, %v3497_v27 }
 0x188   :  { %v834_v32 = vrot.slane %v833_v22, 1  ;;  %v906_v33 = vrot.slane %v905_v23, 1 }
 0x189   :  { %v843_v34 = vrot.slane %v842_v28, 1  ;;  %v915_v35 = vrot.slane %v914_v29, 1 }
 0x18a   :  { %v835_v36 = vmax.f32 %v833_v22, %v834_v32  ;;  %v907_v43 = vmax.f32 %v905_v23, %v906_v33  ;;  %v189_v22 = vpop.trf.xlu1 }
 0x18b   :  { %v844_v47 = vmax.f32 %v842_v28, %v843_v34  ;;  %v3503_v48 = vmax.f32 %v914_v29, %v915_v35  ;;  %v3505_v49 = vpop.f32.mrb[12].mxu0  ;;  %v3507_v52 = vpop.f32.mrb[12].mxu1  ;;  %2761 = vmatmul.mubr.msk.bf16.gmra.mrb[92].mxu0 %vm190_vm1, %v189_v22  ;;  %2786 = vmatmul.mubr.msk.bf16.gmra.mrb[92].mxu1 %vm190_vm1, %v189_v22 }
 0x18c   :  { %v971_v53 = vsub.f32 %v3423_v37, %v835_v36  ;;  %v973_v56 = vsub.f32 %v3431_v41, %v835_v36  ;;  %v975_v57 = vsub.f32 %v3451_v50, %v835_v36  ;;  %v977_v60 = vsub.f32 %v3463_v58, %v835_v36  ;;  %v3515_v61 = vpop.f32.mrb[13].mxu0  ;;  %v3517_v1 = vpop.f32.mrb[13].mxu1 }
 0x18d   :  { %v1003_v2 = vsub.f32 %v3425_v38, %v907_v43  ;;  %v1005_v3 = vsub.f32 %v3433_v42, %v907_v43  ;;  %v1007_v4 = vsub.f32 %v3453_v51, %v907_v43  ;;  %v1009_v37 = vsub.f32 %v3465_v59, %v907_v43  ;;  %v3524_v5 = vpop.f32.mrb[14].mxu0  ;;  %v3526_v41 = vpop.f32.mrb[14].mxu1 }
 0x18e   :  { %v1035_v50 = vmul.f32 1.442695, %v971_v53  ;;  %v1039_v58 = vmul.f32 1.442695, %v973_v56  ;;  %v1043_v6 = vmul.f32 1.442695, %v975_v57  ;;  %v972_v7 = vsub.f32 %v3427_v39, %v844_v47 }
 0x18f   :  { %v1047_v8 = vmul.f32 1.442695, %v977_v60  ;;  %v1099_v9 = vmul.f32 1.442695, %v1003_v2  ;;  %v974_v38 = vsub.f32 %v3439_v45, %v844_v47  ;;  %v1103_v42 = vmul.f32 1.442695, %v1005_v3 }
 0x190   :  { %2796 = vpow2.f32 %v1035_v50  ;;  %v1107_v51 = vmul.f32 1.442695, %v1007_v4  ;;  %v976_v59 = vsub.f32 %v3457_v54, %v844_v47  ;;  %v3532_v10 = vpop.f32.mrb[15].mxu0  ;;  %v3534_v11 = vpop.f32.mrb[15].mxu1  ;;  %v1111_v14 = vmul.f32 1.442695, %v1009_v37 }
 0x191   :  { %2798 = vpow2.f32 %v1039_v58  ;;  %v978_v15 = vsub.f32 %v3469_v62, %v844_v47  ;;  %v1037_v18 = vmul.f32 1.442695, %v972_v7  ;;  %v1041_v39 = vmul.f32 1.442695, %v974_v38 }
 0x192   :  { %2800 = vpow2.f32 %v1043_v6  ;;  %v1004_v19 = vsub.f32 %v3429_v40, %v3503_v48  ;;  %v1006_v45 = vsub.f32 %v3441_v46, %v3503_v48  ;;  %v1045_v54 = vmul.f32 1.442695, %v976_v59 }
 0x193   :  { %2802 = vpow2.f32 %v1047_v8  ;;  %v1008_v23 = vsub.f32 %v3459_v55, %v3503_v48  ;;  %v1010_v28 = vsub.f32 %v3471_v63, %v3503_v48  ;;  %v3545_v29 = vpop.f32.mrb[16].mxu0  ;;  %v3547_v62 = vpop.f32.mrb[16].mxu1  ;;  %v1049_v40 = vmul.f32 1.442695, %v978_v15 }
 0x194   :  { %2804 = vpow2.f32 %v1099_v9  ;;  %v1101_v46 = vmul.f32 1.442695, %v1004_v19  ;;  %v846_v32 = vmax.f32 %v845_v24, %v3505_v49  ;;  %v3555_v55 = vpop.f32.mrb[17].mxu0  ;;  %v3557_v33 = vpop.f32.mrb[17].mxu1  ;;  %v1105_v63 = vmul.f32 1.442695, %v1006_v45 }
 0x195   :  { %5196 = vst [vmem:[#allocation12_spill] sm:$0xff] %v3555_v55  ;;  %5197 = vst [vmem:[#allocation13_spill] sm:$0xff] %v3557_v33  ;;  %2806 = vpow2.f32 %v1103_v42  ;;  %v1109_v34 = vmul.f32 1.442695, %v1008_v23  ;;  %v918_v35 = vmax.f32 %v917_v25, %v3507_v52  ;;  %v3563_v36 = vpop.f32.mrb[18].mxu0  ;;  %v3565_v43 = vpop.f32.mrb[18].mxu1  ;;  %v855_v24 = vmax.f32 %v854_v30, %v3515_v61 }
 0x196   :  { %2808 = vpow2.f32 %v1107_v51  ;;  %v927_v44 = vmax.f32 %v926_v31, %v3517_v1  ;;  %v847_v47 = vmax.f32 %v846_v32, %v3524_v5  ;;  %v3576_v48 = vpop.f32.mrb[19].mxu0  ;;  %v3578_v25 = vpop.f32.mrb[19].mxu1  ;;  %v863_v56 = vmax.f32 %v3545_v29, %v3563_v36 }
 0x197   :  { %5198 = vst [vmem:[#allocation14_spill] sm:$0xff] %v3576_v48  ;;  %5199 = vst [vmem:[#allocation15_spill] sm:$0xff] %v3578_v25  ;;  %2810 = vpow2.f32 %v1111_v14  ;;  %v919_v53 = vmax.f32 %v918_v35, %v3526_v41  ;;  %v935_v30 = vmax.f32 %v3547_v62, %v3565_v43  ;;  %v856_v60 = vmax.f32 %v855_v24, %v3532_v10 }
 0x198   :  { %2812 = vpow2.f32 %v1037_v18  ;;  %v848_v57 = vrot.slane %v847_v47, 4  ;;  %v928_v31 = vmax.f32 %v927_v44, %v3534_v11  ;;  %v872_v3 = vmax.f32 %v3555_v55, %v3576_v48 }
 0x199   :  { %2814 = vpow2.f32 %v1041_v39  ;;  %v920_v2 = vrot.slane %v919_v53, 4  ;;  %v944_v4 = vmax.f32 %v3557_v33, %v3578_v25  ;;  %v857_v58 = vrot.slane %v856_v60, 4 }
 0x19a   :  { %v3591_v37 = vpop.eup %2796  ;;  %2816 = vpow2.f32 %v1045_v54  ;;  %v849_v50 = vmax.f32 %v847_v47, %v848_v57  ;;  %v929_v6 = vrot.slane %v928_v31, 4  ;;  %v1113_v8 = vmul.f32 1.442695, %v1010_v28 }
 0x19b   :  { %5200 = vst [vmem:[#allocation16_spill] sm:$0xff] %v3591_v37  ;;  %v3593_v7 = vpop.eup %2798  ;;  %2818 = vpow2.f32 %v1049_v40  ;;  %v921_v9 = vmax.f32 %v919_v53, %v920_v2  ;;  %v3595_v38 = vpop.f32.mrb[20].mxu0  ;;  %v858_v15 = vmax.f32 %v856_v60, %v857_v58 }
 0x19c   :  { %5201 = vst [vmem:[#allocation17_spill] sm:$0xff] %v3593_v7  ;;  %v3597_v42 = vpop.f32.mrb[20].mxu1  ;;  %v3599_v51 = vpop.eup %2800  ;;  %v1163_v59 = vadd.f32 %v3593_v7, %v3591_v37  ;;  %2820 = vpow2.f32 %v1101_v46  ;;  %v850_v14 = vrot.slane %v849_v50, 2  ;;  %v930_v22 = vmax.f32 %v928_v31, %v929_v6 }
 0x19d   :  { %5202 = vst [vmem:[#allocation18_spill] sm:$0xff] %v3599_v51  ;;  %v3603_v18 = vpop.f32.mrb[21].mxu0  ;;  %v3605_v39 = vpop.f32.mrb[21].mxu1  ;;  %2822 = vpow2.f32 %v1105_v63  ;;  %v922_v45 = vrot.slane %v921_v9, 2  ;;  %v864_v54 = vmax.f32 %v863_v56, %v3595_v38  ;;  %v859_v35 = vrot.slane %v858_v15, 2 }
 0x19e   :  { %5203 = vst [vmem:[#allocation19_spill] sm:$0xff] %v3603_v18  ;;  %5204 = vst [vmem:[#allocation20_spill] sm:$0xff] %v3605_v39  ;;  %v3607_v19 = vpop.eup %2802  ;;  %v3610_v23 = vpop.f32.mrb[22].mxu0  ;;  %v1164_v46 = vadd.f32 %v3599_v51, %v1163_v59  ;;  %2824 = vpow2.f32 %v1109_v34  ;;  %v851_v32 = vmax.f32 %v849_v50, %v850_v14  ;;  %v931_v53 = vrot.slane %v930_v22, 2 }
 0x19f   :  { %5205 = vst [vmem:[#allocation21_spill] sm:$0xff] %v3607_v19  ;;  %v3612_v28 = vpop.f32.mrb[22].mxu1  ;;  %v3614_v40 = vpop.eup %2804  ;;  %2826 = vpow2.f32 %v1113_v8  ;;  %v923_v47 = vmax.f32 %v921_v9, %v922_v45  ;;  %v936_v56 = vmax.f32 %v935_v30, %v3597_v42  ;;  %v3629_v2 = vmax.f32 %v858_v15, %v859_v35 }
 0x1a0   :  { %5206 = vst [vmem:[#allocation22_spill] sm:$0xff] %v3614_v40  ;;  %v3617_v24 = vpop.f32.mrb[23].mxu0  ;;  %v3619_v44 = vpop.f32.mrb[23].mxu1  ;;  %v1165_v60 = vadd.f32 %v3607_v19, %v1164_v46  ;;  %v852_v31 = vrot.slane %v851_v32, 1  ;;  %v3633_v6 = vmax.f32 %v930_v22, %v931_v53  ;;  %v3636_v8 = vmax.f32 %v872_v3, %v3603_v18 }
 0x1a1   :  { %v3621_v63 = vpop.eup %2806  ;;  %v924_v58 = vrot.slane %v923_v47, 1  ;;  %v3639_v30 = vmax.f32 %v944_v4, %v3605_v39  ;;  %v861_v15 = vrot.slane %v3629_v2, 1  ;;  %v3649_v53 = vmax.f32 %v864_v54, %v3610_v23 }
 0x1a2   :  { %5207 = vst [vmem:[#allocation23_spill] sm:$0xff] %v3621_v63  ;;  %v3624_v57 = vpop.eup %2808  ;;  %v1235_v34 = vadd.f32 %v3621_v63, %v3614_v40  ;;  %v1166_v59 = vrot.slane %v1165_v60, 4  ;;  %v853_v45 = vmax.f32 %v851_v32, %v852_v31  ;;  %v933_v22 = vrot.slane %v3633_v6, 1 }
 0x1a3   :  { %5208 = vst [vmem:[#allocation24_spill] sm:$0xff] %v3624_v57  ;;  %v3631_v50 = vpop.eup %2810  ;;  %v925_v35 = vmax.f32 %v923_v47, %v924_v58  ;;  %v3652_v3 = vmax.f32 %v936_v56, %v3612_v28  ;;  %v3654_v4 = vpop.f32.mrb[24].mxu0 }
 0x1a4   :  { %5209 = vst [vmem:[#allocation25_spill] sm:$0xff] %v3631_v50  ;;  %v3641_v9 = vpop.eup %2812  ;;  %v1236_v14 = vadd.f32 %v3624_v57, %v1235_v34  ;;  %v3656_v0 = vpop.f32.mrb[24].mxu1  ;;  %v1167_v32 = vadd.f32 %v1166_v59, %v1165_v60  ;;  %v979_v31 = vsub.f32 %v3475_v12, %v853_v45  ;;  %v981_v57 = vsub.f32 %v3487_v20, %v853_v45 }
 0x1a5   :  { %5210 = vst [vmem:[#allocation26_spill] sm:$0xff] %v3641_v9  ;;  %v3645_v46 = vpop.eup %2814  ;;  %v3664_v58 = vpop.f32.mrb[25].mxu0  ;;  %v983_v40 = vsub.f32 %v3505_v49, %v853_v45  ;;  %v985_v19 = vsub.f32 %v3524_v5, %v853_v45  ;;  %v1011_v60 = vsub.f32 %v3477_v13, %v925_v35 }
 0x1a6   :  { %5211 = vst [vmem:[#allocation27_spill] sm:$0xff] %v3645_v46  ;;  %v3658_v63 = vpop.eup %2816  ;;  %v1237_v34 = vadd.f32 %v3631_v50, %v1236_v14  ;;  %v1172_v47 = vadd.f32 %v3645_v46, %v3641_v9  ;;  %v3666_v54 = vpop.f32.mrb[25].mxu1  ;;  %v1168_v12 = vrot.slane %v1167_v32, 2  ;;  %v1051_v37 = vmul.f32 1.442695, %v979_v31 }
 0x1a7   :  { %5212 = vst [vmem:[#allocation28_spill] sm:$0xff] %v3658_v63  ;;  %v3668_v56 = vpop.eup %2818  ;;  %v3674_v59 = vpop.f32.mrb[26].mxu0  ;;  %v1055_v5 = vmul.f32 1.442695, %v981_v57  ;;  %v1059_v45 = vmul.f32 1.442695, %v983_v40  ;;  %v1013_v9 = vsub.f32 %v3489_v21, %v925_v35  ;;  %v1017_v57 = vsub.f32 %v3526_v41, %v925_v35 }
 0x1a8   :  { %v3676_v14 = vpop.f32.mrb[26].mxu1  ;;  %v3678_v50 = vpop.eup %2820  ;;  %v1238_v51 = vrot.slane %v1237_v34, 4  ;;  %v1173_v7 = vadd.f32 %v3658_v63, %v1172_v47  ;;  %v1063_v13 = vmul.f32 1.442695, %v985_v19  ;;  %v1169_v25 = vadd.f32 %v1168_v12, %v1167_v32 }
 0x1a9   :  { %5213 = vst [vmem:[#allocation29_spill] sm:$0xff] %v3678_v50  ;;  %v3681_v46 = vpop.f32.mrb[27].mxu0  ;;  %v3683_v20 = vpop.f32.mrb[27].mxu1  ;;  %2828 = vpow2.f32 %v1051_v37  ;;  %v1015_v63 = vsub.f32 %v3507_v52, %v925_v35  ;;  %v1115_v40 = vmul.f32 1.442695, %v1011_v60  ;;  %v862_v41 = vmax.f32 %v3629_v2, %v861_v15 }
 0x1aa   :  { %v3685_v49 = vpop.eup %2822  ;;  %v1239_v33 = vadd.f32 %v1238_v51, %v1237_v34  ;;  %v1174_v18 = vadd.f32 %v3668_v56, %v1173_v7  ;;  %v1170_v19 = vrot.slane %v1169_v25, 1  ;;  %2830 = vpow2.f32 %v1055_v5 }
 0x1ab   :  { %5214 = vst [vmem:[#allocation30_spill] sm:$0xff] %v3685_v49  ;;  %v3688_v39 = vpop.eup %2824  ;;  %v1244_v47 = vadd.f32 %v3685_v49, %v3678_v50  ;;  %v1119_v51 = vmul.f32 1.442695, %v1013_v9  ;;  %v1123_v32 = vmul.f32 1.442695, %v1015_v63  ;;  %v3699_v37 = vpop.f32.mrb[28].mxu0  ;;  %2832 = vpow2.f32 %v1059_v45 }
 0x1ac   :  { %5215 = vst [vmem:[#allocation31_spill] sm:$0xff] %v3688_v39  ;;  %v3693_v31 = vpop.eup %2826  ;;  %v1240_v48 = vrot.slane %v1239_v33, 2  ;;  %v1175_v21 = vrot.slane %v1174_v18, 4  ;;  %v1127_v7 = vmul.f32 1.442695, %v1017_v57  ;;  %v1171_v34 = vadd.f32 %v1170_v19, %v1169_v25  ;;  %v3701_v52 = vpop.f32.mrb[28].mxu1 }
 0x1ad   :  { %5216 = vst [vmem:[#allocation32_spill] sm:$0xff] %v3693_v31  ;;  %v1245_v55 = vadd.f32 %v3688_v39, %v1244_v47  ;;  %v934_v35 = vmax.f32 %v3633_v6, %v933_v22  ;;  %v866_v60 = vrot.slane %v3649_v53, 4  ;;  %v3706_v5 = vpop.f32.mrb[29].mxu0  ;;  %v3708_v63 = vpop.f32.mrb[29].mxu1  ;;  %v980_v9 = vsub.f32 %v3481_v16, %v862_v41 }
 0x1ae   :  { %v1241_v12 = vadd.f32 %v1240_v48, %v1239_v33  ;;  %v1176_v49 = vadd.f32 %v1175_v21, %v1174_v18  ;;  %2834 = vrcp.f32 %v1171_v34  ;;  %v3712_v18 = vpop.f32.mrb[30].mxu1  ;;  %v982_v2 = vsub.f32 %v3495_v26, %v862_v41 }
 0x1af   :  { %v1246_v50 = vadd.f32 %v3693_v31, %v1245_v55  ;;  %v3710_v55 = vpop.f32.mrb[30].mxu0  ;;  %2836 = vpow2.f32 %v1063_v13  ;;  %v984_v6 = vsub.f32 %v3515_v61, %v862_v41  ;;  %v3719_v22 = vpop.f32.mrb[31].mxu1  ;;  %v986_v19 = vsub.f32 %v3532_v10, %v862_v41 }
 0x1b0   :  { %v1242_v33 = vrot.slane %v1241_v12, 1  ;;  %v1177_v48 = vrot.slane %v1176_v49, 2  ;;  %v3717_v15 = vpop.f32.mrb[31].mxu0  ;;  %2838 = vpow2.f32 %v1115_v40  ;;  %v1053_v21 = vmul.f32 1.442695, %v980_v9 }
 0x1b1   :  { %v1247_v25 = vrot.slane %v1246_v50, 4  ;;  %2840 = vpow2.f32 %v1119_v51  ;;  %v1057_v34 = vmul.f32 1.442695, %v982_v2  ;;  %v1061_v31 = vmul.f32 1.442695, %v984_v6 }
 0x1b2   :  { %v1243_v45 = vadd.f32 %v1242_v33, %v1241_v12  ;;  %v1178_v47 = vadd.f32 %v1177_v48, %v1176_v49  ;;  %v1065_v61 = vmul.f32 1.442695, %v986_v19  ;;  %v1012_v39 = vsub.f32 %v3483_v17, %v934_v35 }
 0x1b3   :  { %v1248_v57 = vadd.f32 %v1247_v25, %v1246_v50  ;;  %v3722_v26 = vpop.eup %2828  ;;  %v1014_v12 = vsub.f32 %v3497_v27, %v934_v35  ;;  %v3726_v49 = vpop.f32.mrb[32].mxu0  ;;  %v1016_v51 = vsub.f32 %v3517_v1, %v934_v35  ;;  %v1018_v17 = vsub.f32 %v3534_v11, %v934_v35 }
 0x1b4   :  { %2842 = vrcp.f32 %v1243_v45  ;;  %v1179_v13 = vrot.slane %v1178_v47, 1  ;;  %5217 = vst [vmem:[#allocation33_spill] sm:$0xff] %v3726_v49  ;;  %v3728_v50 = vpop.f32.mrb[32].mxu1  ;;  %v3731_v41 = vpop.f32.mrb[33].mxu0  ;;  %v938_v35 = vrot.slane %v3652_v3, 4 }
 0x1b5   :  { %v1249_v16 = vrot.slane %v1248_v57, 2  ;;  %2844 = vpow2.f32 %v1123_v32  ;;  %5218 = vst [vmem:[#allocation34_spill] sm:$0xff] %v3728_v50  ;;  %5219 = vst [vmem:[#allocation35_spill] sm:$0xff] %v3731_v41  ;;  %v3733_v33 = vpop.f32.mrb[33].mxu1  ;;  %v3735_v48 = vpop.eup %2830  ;;  %v1117_v32 = vmul.f32 1.442695, %v1012_v39  ;;  %v867_v39 = vmax.f32 %v3649_v53, %v866_v60 }
 0x1b6   :  { %v1180_v40 = vadd.f32 %v1179_v13, %v1178_v47  ;;  %2846 = vpow2.f32 %v1127_v7  ;;  %5220 = vst [vmem:[#allocation36_spill] sm:$0xff] %v3733_v33  ;;  %5221 = vst [vmem:[#allocation37_spill] sm:$0xff] %v3735_v48  ;;  %v1121_v27 = vmul.f32 1.442695, %v1014_v12  ;;  %v3738_v25 = vpop.f32.mrb[34].mxu0  ;;  %v3740_v9 = vpop.f32.mrb[34].mxu1  ;;  %v1181_v1 = vadd.f32 %v3735_v48, %v3722_v26 }
 0x1b7   :  { %v1250_v10 = vadd.f32 %v1249_v16, %v1248_v57  ;;  %2848 = vpow2.f32 %v1053_v21  ;;  %5222 = vst [vmem:[#allocation38_spill] sm:$0xff] %v3738_v25  ;;  %5223 = vst [vmem:[#allocation39_spill] sm:$0xff] %v3740_v9  ;;  %v1125_v7 = vmul.f32 1.442695, %v1016_v51  ;;  %v3744_v6 = vpop.f32.mrb[35].mxu0  ;;  %v3746_v45 = vpop.f32.mrb[35].mxu1  ;;  %v874_v13 = vmax.f32 %v3636_v8, %v3617_v24 }
 0x1b8   :  { %2850 = vrcp.f32 %v1180_v40  ;;  %5224 = vst [vmem:[#allocation40_spill] sm:$0xff] %v3744_v6  ;;  %5225 = vst [vmem:[#allocation41_spill] sm:$0xff] %v3746_v45  ;;  %v3748_v47 = vpop.eup %2832  ;;  %v1129_v11 = vmul.f32 1.442695, %v1018_v17  ;;  %v868_v12 = vrot.slane %v867_v39, 2  ;;  %v946_v53 = vmax.f32 %v3639_v30, %v3619_v44 }
 0x1b9   :  { %v1251_v2 = vrot.slane %v1250_v10, 1  ;;  %5226 = vst [vmem:[#allocation42_spill] sm:$0xff] %v3748_v47  ;;  %2852 = vpow2.f32 %v1057_v34  ;;  %v3752_v57 = vpop.eup %2834  ;;  %v1182_v21 = vadd.f32 %v3748_v47, %v1181_v1  ;;  %v939_v34 = vmax.f32 %v3652_v3, %v938_v35 }
 0x1ba   :  { %2854 = vpow2.f32 %v1061_v31  ;;  %v3757_v16 = vpop.eup %2836  ;;  %v869_v8 = vmax.f32 %v867_v39, %v868_v12  ;;  %v947_v17 = vrot.slane %v946_v53, 4 }
 0x1bb   :  { %v1252_v19 = vadd.f32 %v1251_v2, %v1250_v10  ;;  %5227 = vst [vmem:[#allocation43_spill] sm:$0xff] %v3757_v16  ;;  %2856 = vpow2.f32 %v1065_v61  ;;  %v3762_v60 = vpop.eup %2838  ;;  %v1183_v40 = vadd.f32 %v3757_v16, %v1182_v21  ;;  %v875_v10 = vrot.slane %v874_v13, 4  ;;  %v3769_v2 = vpop.f32.mrb[36].mxu0 }
 0x1bc   :  { %5228 = vst [vmem:[#allocation44_spill] sm:$0xff] %v3762_v60  ;;  %v3767_v51 = vpop.eup %2840  ;;  %v940_v61 = vrot.slane %v939_v34, 2  ;;  %5230 = vst [vmem:[#allocation46_spill] sm:$0xff] %v3769_v2  ;;  %v3771_v3 = vpop.f32.mrb[36].mxu1  ;;  %v870_v39 = vrot.slane %v869_v8, 1  ;;  %v948_v9 = vmax.f32 %v946_v53, %v947_v17 }
 0x1bd   :  { %2858 = vrcp.f32 %v1252_v19  ;;  %5229 = vst [vmem:[#allocation45_spill] sm:$0xff] %v3767_v51  ;;  %5231 = vst [vmem:[#allocation47_spill] sm:$0xff] %v3771_v3  ;;  %v1184_v1 = vrot.slane %v1183_v40, 4  ;;  %v1253_v35 = vadd.f32 %v3767_v51, %v3762_v60  ;;  %v876_v19 = vmax.f32 %v874_v13, %v875_v10  ;;  %v3777_v21 = vpop.f32.mrb[37].mxu0  ;;  %v3779_v31 = vpop.f32.mrb[37].mxu1 }
 0x1be   :  { %2860 = vpow2.f32 %v1117_v32  ;;  %v3773_v30 = vpop.eup %2842  ;;  %5233 = vst [vmem:[#allocation49_spill] sm:$0xff] %v3777_v21  ;;  %5234 = vst [vmem:[#allocation50_spill] sm:$0xff] %v3779_v31  ;;  %v941_v12 = vmax.f32 %v939_v34, %v940_v61  ;;  %v3783_v45 = vpop.f32.mrb[38].mxu0  ;;  %v949_v53 = vrot.slane %v948_v9, 2 }
 0x1bf   :  { %5232 = vst [vmem:[#allocation48_spill] sm:$0xff] %v3773_v30  ;;  %2862 = vpow2.f32 %v1121_v27  ;;  %v3781_v32 = vpop.eup %2844  ;;  %5236 = vst [vmem:[#allocation52_spill] sm:$0xff] %v3783_v45  ;;  %v3785_v3 = vpop.f32.mrb[38].mxu1  ;;  %v1185_v50 = vadd.f32 %v1184_v1, %v1183_v40  ;;  %v877_v13 = vrot.slane %v876_v19, 2 }
 0x1c0   :  { %5235 = vst [vmem:[#allocation51_spill] sm:$0xff] %v3781_v32  ;;  %2864 = vpow2.f32 %v1125_v7  ;;  %5237 = vst [vmem:[#allocation53_spill] sm:$0xff] %v3785_v3  ;;  %v3787_v30 = vpop.eup %2846  ;;  %v1254_v27 = vadd.f32 %v3781_v32, %v1253_v35  ;;  %v3790_v10 = vpop.f32.mrb[39].mxu0  ;;  %v871_v7 = vmax.f32 %v869_v8, %v870_v39  ;;  %v942_v34 = vrot.slane %v941_v12, 1 }
 0x1c1   :  { %5238 = vst [vmem:[#allocation54_spill] sm:$0xff] %v3787_v30  ;;  %2866 = vpow2.f32 %v1129_v11  ;;  %5239 = vst [vmem:[#allocation55_spill] sm:$0xff] %v3790_v10  ;;  %v3792_v51 = vpop.f32.mrb[39].mxu1  ;;  %v3794_v60 = vpop.eup %2848  ;;  %v1186_v3 = vrot.slane %v1185_v50, 2  ;;  %v3801_v1 = vmax.f32 %v876_v19, %v877_v13 }
 0x1c2   :  { %5240 = vst [vmem:[#allocation56_spill] sm:$0xff] %v3792_v51  ;;  %v3798_v17 = vpop.eup %2850  ;;  %v1255_v40 = vadd.f32 %v3787_v30, %v1254_v27  ;;  %v987_v32 = vsub.f32 %v3545_v29, %v871_v7  ;;  %v989_v8 = vsub.f32 %v3563_v36, %v871_v7  ;;  %v991_v39 = vsub.f32 %v3595_v38, %v871_v7 }
 0x1c3   :  { %v3805_v35 = vpop.eup %2852  ;;  %v993_v61 = vsub.f32 %v3610_v23, %v871_v7  ;;  %v1187_v31 = vadd.f32 %v1186_v3, %v1185_v50  ;;  %v943_v27 = vmax.f32 %v941_v12, %v942_v34  ;;  %v950_v29 = vmax.f32 %v948_v9, %v949_v53  ;;  %v3820_v48 = vpop.f32.mrb[40].mxu0 }
 0x1c4   :  { %v3811_v51 = vpop.eup %2854  ;;  %v1256_v33 = vrot.slane %v1255_v40, 4  ;;  %v1190_v19 = vadd.f32 %v3805_v35, %v3794_v60  ;;  %v1067_v11 = vmul.f32 1.442695, %v987_v32  ;;  %v1071_v30 = vmul.f32 1.442695, %v989_v8  ;;  %5243 = vst [vmem:[#allocation59_spill] sm:$0xff] %v3820_v48 }
 0x1c5   :  { %v3815_v13 = vpop.eup %2856  ;;  %v1075_v16 = vmul.f32 1.442695, %v991_v39  ;;  %v1188_v36 = vrot.slane %v1187_v31, 1  ;;  %v1079_v7 = vmul.f32 1.442695, %v993_v61  ;;  %v3822_v50 = vpop.f32.mrb[40].mxu1  ;;  %v1019_v12 = vsub.f32 %v3547_v62, %v943_v27 }
 0x1c6   :  { %5241 = vst [vmem:[#allocation57_spill] sm:$0xff] %v3815_v13  ;;  %v1257_v38 = vadd.f32 %v1256_v33, %v1255_v40  ;;  %v1191_v23 = vadd.f32 %v3811_v51, %v1190_v19  ;;  %5244 = vst [vmem:[#allocation60_spill] sm:$0xff] %v3822_v50  ;;  %2868 = vpow2.f32 %v1067_v11  ;;  %v1021_v32 = vsub.f32 %v3565_v43, %v943_v27  ;;  %v3829_v34 = vpop.f32.mrb[41].mxu0  ;;  %v3831_v53 = vpop.f32.mrb[41].mxu1 }
 0x1c7   :  { %v3817_v47 = vpop.eup %2858  ;;  %v1023_v9 = vsub.f32 %v3597_v42, %v943_v27  ;;  %5246 = vst [vmem:[#allocation62_spill] sm:$0xff] %v3829_v34  ;;  %5247 = vst [vmem:[#allocation63_spill] sm:$0xff] %v3831_v53  ;;  %v1189_v61 = vadd.f32 %v1188_v36, %v1187_v31  ;;  %2870 = vpow2.f32 %v1071_v30  ;;  %v3836_v39 = vpop.f32.mrb[42].mxu0  ;;  %v1025_v42 = vsub.f32 %v3612_v28, %v943_v27 }
 0x1c8   :  { %5242 = vst [vmem:[#allocation58_spill] sm:$0xff] %v3817_v47  ;;  %v3824_v3 = vpop.eup %2860  ;;  %v1258_v40 = vrot.slane %v1257_v38, 2  ;;  %v1192_v8 = vadd.f32 %v3815_v13, %v1191_v23  ;;  %5249 = vst [vmem:[#allocation65_spill] sm:$0xff] %v3836_v39  ;;  %v3838_v11 = vpop.f32.mrb[42].mxu1  ;;  %2872 = vpow2.f32 %v1075_v16  ;;  %v1131_v19 = vmul.f32 1.442695, %v1019_v12 }
 0x1c9   :  { %5245 = vst [vmem:[#allocation61_spill] sm:$0xff] %v3824_v3  ;;  %v3833_v33 = vpop.eup %2862  ;;  %5250 = vst [vmem:[#allocation66_spill] sm:$0xff] %v3838_v11  ;;  %v3845_v50 = vpop.f32.mrb[43].mxu0  ;;  %2874 = vrcp.f32 %v1189_v61  ;;  %v1135_v53 = vmul.f32 1.442695, %v1021_v32  ;;  %v879_v28 = vrot.slane %v3801_v1, 1 }
 0x1ca   :  { %5248 = vst [vmem:[#allocation64_spill] sm:$0xff] %v3833_v33  ;;  %v3840_v62 = vpop.eup %2864  ;;  %v1262_v43 = vadd.f32 %v3833_v33, %v3824_v3  ;;  %5252 = vst [vmem:[#allocation68_spill] sm:$0xff] %v3845_v50  ;;  %v3847_v31 = vpop.f32.mrb[43].mxu1  ;;  %v1259_v30 = vadd.f32 %v1258_v40, %v1257_v38  ;;  %v1193_v23 = vrot.slane %v1192_v8, 4  ;;  %2876 = vpow2.f32 %v1079_v7 }
 0x1cb   :  { %5251 = vst [vmem:[#allocation67_spill] sm:$0xff] %v3840_v62  ;;  %5253 = vst [vmem:[#allocation69_spill] sm:$0xff] %v3847_v31  ;;  %v3849_v36 = vpop.eup %2866  ;;  %v1139_v47 = vmul.f32 1.442695, %v1023_v9  ;;  %v1143_v13 = vmul.f32 1.442695, %v1025_v42  ;;  %2878 = vpow2.f32 %v1131_v19  ;;  %v880_v9 = vmax.f32 %v3801_v1, %v879_v28 }
 0x1cc   :  { %5254 = vst [vmem:[#allocation70_spill] sm:$0xff] %v3849_v36  ;;  %v1263_v11 = vadd.f32 %v3840_v62, %v1262_v43  ;;  %v1260_v33 = vrot.slane %v1259_v30, 1  ;;  %v1194_v16 = vadd.f32 %v1193_v23, %v1192_v8  ;;  %2880 = vpow2.f32 %v1135_v53  ;;  %v3856_v38 = vpop.f32.mrb[44].mxu0  ;;  %v3858_v32 = vpop.f32.mrb[44].mxu1  ;;  %v5268_v62 = vld [vmem:[#allocation13_spill] sm:$0xff] }
 0x1cd   :  { %v951_v12 = vrot.slane %v950_v29, 1  ;;  %5255 = vst [vmem:[#allocation71_spill] sm:$0xff] %v3856_v38  ;;  %5256 = vst [vmem:[#allocation72_spill] sm:$0xff] %v3858_v32  ;;  %2882 = vpow2.f32 %v1139_v47  ;;  %v3861_v8 = vpop.f32.mrb[45].mxu0  ;;  %v3863_v43 = vpop.f32.mrb[45].mxu1 }
 0x1ce   :  { %v1264_v27 = vadd.f32 %v3849_v36, %v1263_v11  ;;  %v1261_v40 = vadd.f32 %v1260_v33, %v1259_v30  ;;  %v1195_v7 = vrot.slane %v1194_v16, 2  ;;  %5257 = vst [vmem:[#allocation73_spill] sm:$0xff] %v3861_v8  ;;  %5258 = vst [vmem:[#allocation74_spill] sm:$0xff] %v3863_v43  ;;  %2884 = vpow2.f32 %v1143_v13  ;;  %v3869_v23 = vpop.f32.mrb[46].mxu0  ;;  %v3871_v61 = vpop.f32.mrb[46].mxu1  ;;  %v5262_v33 = vld [vmem:[#allocation12_spill] sm:$0xff] }
 0x1cf   :  { %v952_v53 = vmax.f32 %v950_v29, %v951_v12  ;;  %v5259_v11 = vmax.f32 %v3654_v4, %v3674_v59  ;;  %5260 = vst [vmem:[#allocation75_spill] sm:$0xff] %v3869_v23  ;;  %5261 = vst [vmem:[#allocation76_spill] sm:$0xff] %v3871_v61  ;;  %v988_v1 = vsub.f32 %v5262_v33, %v880_v9  ;;  %v5263_v30 = vld [vmem:[#allocation14_spill] sm:$0xff]  ;;  %v3875_v32 = vpop.f32.mrb[47].mxu0  ;;  %v3877_v43 = vpop.f32.mrb[47].mxu1  ;;  %v5267_v12 = vld [vmem:[#allocation19_spill] sm:$0xff] }
 0x1d0   :  { %v1265_v42 = vrot.slane %v1264_v27, 4  ;;  %2886 = vrcp.f32 %v1261_v40  ;;  %v1196_v47 = vadd.f32 %v1195_v7, %v1194_v16  ;;  %v990_v28 = vsub.f32 %v5263_v30, %v880_v9  ;;  %5264 = vst [vmem:[#allocation12_spill] sm:$0xff] %v3875_v32  ;;  %5265 = vst [vmem:[#allocation14_spill] sm:$0xff] %v3877_v43  ;;  %v3879_v13 = vpop.eup %2868  ;;  %v5270_v33 = vld [vmem:[#allocation15_spill] sm:$0xff] }
 0x1d1   :  { %v882_v19 = vmax.f32 %v5259_v11, %v3699_v37  ;;  %5266 = vst [vmem:[#allocation77_spill] sm:$0xff] %v3879_v13  ;;  %v992_v36 = vsub.f32 %v5267_v12, %v880_v9  ;;  %v994_v11 = vsub.f32 %v3617_v24, %v880_v9  ;;  %v1020_v31 = vsub.f32 %v5268_v62, %v952_v53  ;;  %v3884_v61 = vpop.eup %2870  ;;  %v5272_v62 = vld [vmem:[#allocation20_spill] sm:$0xff] }
 0x1d2   :  { %v1266_v29 = vadd.f32 %v1265_v42, %v1264_v27  ;;  %5269 = vst [vmem:[#allocation19_spill] sm:$0xff] %v3884_v61  ;;  %v1197_v16 = vrot.slane %v1196_v47, 1  ;;  %v1069_v40 = vmul.f32 1.442695, %v988_v1  ;;  %v1073_v7 = vmul.f32 1.442695, %v990_v28  ;;  %v3887_v3 = vpop.eup %2872 }
 0x1d3   :  { %v1022_v30 = vsub.f32 %v5270_v33, %v952_v53  ;;  %5271 = vst [vmem:[#allocation13_spill] sm:$0xff] %v3887_v3  ;;  %v1199_v43 = vadd.f32 %v3884_v61, %v3879_v13  ;;  %v1077_v27 = vmul.f32 1.442695, %v992_v36  ;;  %v1081_v42 = vmul.f32 1.442695, %v994_v11  ;;  %v3891_v12 = vpop.eup %2874  ;;  %v3898_v8 = vpop.f32.mrb[48].mxu0 }
 0x1d4   :  { %v1267_v23 = vrot.slane %v1266_v29, 2  ;;  %v1198_v24 = vadd.f32 %v1197_v16, %v1196_v47  ;;  %2888 = vpow2.f32 %v1069_v40  ;;  %v1024_v9 = vsub.f32 %v5272_v62, %v952_v53  ;;  %v3895_v1 = vpop.eup %2876  ;;  %5274 = vst [vmem:[#allocation20_spill] sm:$0xff] %v3898_v8  ;;  %v3900_v61 = vpop.f32.mrb[48].mxu1 }
 0x1d5   :  { %v1026_v32 = vsub.f32 %v3619_v44, %v952_v53  ;;  %5273 = vst [vmem:[#allocation15_spill] sm:$0xff] %v3895_v1  ;;  %v1200_v33 = vadd.f32 %v3887_v3, %v1199_v43  ;;  %2890 = vpow2.f32 %v1073_v7  ;;  %v1133_v38 = vmul.f32 1.442695, %v1020_v31  ;;  %5275 = vst [vmem:[#allocation78_spill] sm:$0xff] %v3900_v61  ;;  %v3902_v36 = vpop.eup %2878 }
 0x1d6   :  { %v1268_v28 = vadd.f32 %v1267_v23, %v1266_v29  ;;  %5276 = vst [vmem:[#allocation79_spill] sm:$0xff] %v3902_v36  ;;  %2892 = vrcp.f32 %v1198_v24  ;;  %v1137_v47 = vmul.f32 1.442695, %v1022_v30  ;;  %v1141_v11 = vmul.f32 1.442695, %v1024_v9  ;;  %v3904_v40 = vpop.eup %2880  ;;  %v3911_v23 = vpop.f32.mrb[49].mxu0 }
 0x1d7   :  { %v1145_v16 = vmul.f32 1.442695, %v1026_v32  ;;  %5277 = vst [vmem:[#allocation80_spill] sm:$0xff] %v3904_v40  ;;  %v1201_v53 = vadd.f32 %v3895_v1, %v1200_v33  ;;  %2894 = vpow2.f32 %v1077_v27  ;;  %v5278_v31 = vmax.f32 %v3656_v0, %v3676_v14  ;;  %5279 = vst [vmem:[#allocation81_spill] sm:$0xff] %v3911_v23  ;;  %v3913_v29 = vpop.f32.mrb[49].mxu1  ;;  %v3915_v7 = vpop.eup %2882 }
 0x1d8   :  { %v1269_v44 = vrot.slane %v1268_v28, 1  ;;  %5280 = vst [vmem:[#allocation82_spill] sm:$0xff] %v3913_v29  ;;  %5281 = vst [vmem:[#allocation83_spill] sm:$0xff] %v3915_v7  ;;  %v1271_v32 = vadd.f32 %v3904_v40, %v3902_v36  ;;  %2896 = vpow2.f32 %v1081_v42  ;;  %v5282_v30 = vmax.f32 %v3664_v58, %v3681_v46  ;;  %v3927_v9 = vpop.f32.mrb[50].mxu0  ;;  %v3929_v33 = vpop.f32.mrb[50].mxu1 }
 0x1d9   :  { %v954_v43 = vmax.f32 %v5278_v31, %v3701_v52  ;;  %v5283_v24 = vmax.f32 %v3666_v54, %v3683_v20  ;;  %5284 = vst [vmem:[#allocation84_spill] sm:$0xff] %v3927_v9  ;;  %5285 = vst [vmem:[#allocation85_spill] sm:$0xff] %v3929_v33  ;;  %v3931_v31 = vpop.eup %2884  ;;  %v1202_v29 = vrot.slane %v1201_v53, 4  ;;  %2898 = vpow2.f32 %v1133_v38  ;;  %v3934_v40 = vpop.f32.mrb[51].mxu0 }
 0x1da   :  { %v891_v27 = vmax.f32 %v5282_v30, %v3706_v5  ;;  %5286 = vst [vmem:[#allocation86_spill] sm:$0xff] %v3931_v31  ;;  %v1270_v61 = vadd.f32 %v1269_v44, %v1268_v28  ;;  %v883_v42 = vmax.f32 %v882_v19, %v3710_v55  ;;  %5287 = vst [vmem:[#allocation87_spill] sm:$0xff] %v3934_v40  ;;  %v3936_v36 = vpop.f32.mrb[51].mxu1  ;;  %v3938_v30 = vpop.eup %2886  ;;  %2900 = vpow2.f32 %v1137_v47 }
 0x1db   :  { %v963_v62 = vmax.f32 %v5283_v24, %v3708_v63  ;;  %5288 = vst [vmem:[#allocation88_spill] sm:$0xff] %v3936_v36  ;;  %5289 = vst [vmem:[#allocation89_spill] sm:$0xff] %v3938_v30  ;;  %v1272_v1 = vadd.f32 %v3915_v7, %v1271_v32  ;;  %v955_v24 = vmax.f32 %v954_v43, %v3712_v18  ;;  %v3945_v32 = vpop.f32.mrb[52].mxu0  ;;  %v3947_v47 = vpop.f32.mrb[52].mxu1 }
 0x1dc   :  { %v892_v33 = vmax.f32 %v891_v27, %v3717_v15  ;;  %2902 = vrcp.f32 %v1270_v61  ;;  %v1203_v3 = vadd.f32 %v1202_v29, %v1201_v53  ;;  %v884_v28 = vrot.slane %v883_v42, 4  ;;  %5290 = vst [vmem:[#allocation90_spill] sm:$0xff] %v3945_v32  ;;  %5291 = vst [vmem:[#allocation91_spill] sm:$0xff] %v3947_v47 }
 0x1dd   :  { %v964_v38 = vmax.f32 %v963_v62, %v3719_v22  ;;  %v1273_v19 = vadd.f32 %v3931_v31, %v1272_v1  ;;  %2904 = vpow2.f32 %v1141_v11  ;;  %v956_v44 = vrot.slane %v955_v24, 4  ;;  %v3953_v1 = vpop.f32.mrb[53].mxu0  ;;  %v3955_v11 = vpop.f32.mrb[53].mxu1 }
 0x1de   :  { %v893_v13 = vrot.slane %v892_v33, 4  ;;  %v1204_v36 = vrot.slane %v1203_v3, 2  ;;  %2906 = vpow2.f32 %v1145_v16  ;;  %v885_v30 = vmax.f32 %v883_v42, %v884_v28  ;;  %v3949_v43 = vpop.eup %2888  ;;  %5293 = vst [vmem:[#allocation93_spill] sm:$0xff] %v3953_v1  ;;  %5294 = vst [vmem:[#allocation94_spill] sm:$0xff] %v3955_v11  ;;  %v3961_v31 = vpop.f32.mrb[54].mxu0 }
 0x1df   :  { %v965_v9 = vrot.slane %v964_v38, 4  ;;  %5292 = vst [vmem:[#allocation92_spill] sm:$0xff] %v3949_v43  ;;  %v1274_v61 = vrot.slane %v1273_v19, 4  ;;  %v957_v53 = vmax.f32 %v955_v24, %v956_v44  ;;  %v1387_v27 = vmax.f32 %v3726_v49, %v3731_v41  ;;  %v3957_v62 = vpop.eup %2890  ;;  %5296 = vst [vmem:[#allocation96_spill] sm:$0xff] %v3961_v31  ;;  %v3963_v7 = vpop.f32.mrb[54].mxu1 }
 0x1e0   :  { %v894_v29 = vmax.f32 %v892_v33, %v893_v13  ;;  %5295 = vst [vmem:[#allocation95_spill] sm:$0xff] %v3957_v62  ;;  %v1205_v16 = vadd.f32 %v1204_v36, %v1203_v3  ;;  %v886_v42 = vrot.slane %v885_v30, 2  ;;  %v1390_v47 = vmax.f32 %v3738_v25, %v3744_v6  ;;  %5297 = vst [vmem:[#allocation97_spill] sm:$0xff] %v3963_v7  ;;  %v3965_v13 = vpop.eup %2892  ;;  %v3969_v49 = vpop.f32.mrb[55].mxu0  ;;  %v5300_v25 = vld [vmem:[#allocation26_spill] sm:$0xff] }
 0x1e1   :  { %v966_v28 = vmax.f32 %v964_v38, %v965_v9  ;;  %v1275_v33 = vadd.f32 %v1274_v61, %v1273_v19  ;;  %v1208_v24 = vadd.f32 %v3957_v62, %v3949_v43  ;;  %v958_v44 = vrot.slane %v957_v53, 2  ;;  %1388 = vmax.xlane.f32.xlu1 %v1387_v27  ;;  %5298 = vst [vmem:[#allocation98_spill] sm:$0xff] %v3969_v49  ;;  %v3971_v3 = vpop.f32.mrb[55].mxu1  ;;  %v3973_v36 = vpop.eup %2894 }
 0x1e2   :  { %v895_v41 = vrot.slane %v894_v29, 2  ;;  %5299 = vst [vmem:[#allocation99_spill] sm:$0xff] %v3971_v3  ;;  %v1206_v9 = vrot.slane %v1205_v16, 1  ;;  %v887_v38 = vmax.f32 %v885_v30, %v886_v42  ;;  %1391 = vmax.xlane.f32.xlu0 %v1390_v47  ;;  %v3977_v7 = vmul.f32 %v3798_v17, %v5300_v25  ;;  %v3979_v19 = vpop.eup %2896  ;;  %v5302_v30 = vld [vmem:[#allocation27_spill] sm:$0xff] }
 0x1e3   :  { %v967_v6 = vrot.slane %v966_v28, 2  ;;  %v1276_v61 = vrot.slane %v1275_v33, 2  ;;  %v1209_v11 = vadd.f32 %v3973_v36, %v1208_v24  ;;  %v959_v27 = vmax.f32 %v957_v53, %v958_v44  ;;  %v3982_v49 = vpop.eup %2898 }
 0x1e4   :  { %v896_v31 = vmax.f32 %v894_v29, %v895_v41  ;;  %5301 = vst [vmem:[#allocation26_spill] sm:$0xff] %v3982_v49  ;;  %v1207_v3 = vadd.f32 %v1206_v9, %v1205_v16  ;;  %v888_v32 = vrot.slane %v887_v38, 1  ;;  %v3988_v47 = vmul.f32 %v3798_v17, %v5302_v30  ;;  %v3990_v42 = vpop.eup %2900  ;;  %v3998_v29 = vpop.f32.mrb[56].mxu0 }
 0x1e5   :  { %v3984_v1 = vmax.f32 %v966_v28, %v967_v6  ;;  %5303 = vst [vmem:[#allocation27_spill] sm:$0xff] %v3990_v42  ;;  %v1277_v25 = vadd.f32 %v1276_v61, %v1275_v33  ;;  %v1210_v62 = vadd.f32 %v3979_v19, %v1209_v11  ;;  %v960_v43 = vrot.slane %v959_v27, 1  ;;  %5305 = vst [vmem:[#allocation101_spill] sm:$0xff] %v3998_v29  ;;  %v4000_v16 = vpop.f32.mrb[56].mxu1  ;;  %v4004_v61 = vpop.f32.mrb[57].mxu0 }
 0x1e6   :  { %v897_v40 = vrot.slane %v896_v31, 1  ;;  %v3993_v24 = vpop.eup %2902  ;;  %2908 = vrcp.f32 %v1207_v3  ;;  %v1280_v41 = vadd.f32 %v3990_v42, %v3982_v49  ;;  %v889_v53 = vmax.f32 %v887_v38, %v888_v32  ;;  %5306 = vst [vmem:[#allocation102_spill] sm:$0xff] %v4000_v16  ;;  %5308 = vst [vmem:[#allocation104_spill] sm:$0xff] %v4004_v61  ;;  %v4006_v30 = vpop.f32.mrb[57].mxu1 }
 0x1e7   :  { %5304 = vst [vmem:[#allocation100_spill] sm:$0xff] %v3993_v24  ;;  %v4002_v28 = vpop.eup %2904  ;;  %v1278_v33 = vrot.slane %v1277_v25, 1  ;;  %v1211_v44 = vrot.slane %v1210_v62, 4  ;;  %v961_v11 = vmax.f32 %v959_v27, %v960_v43  ;;  %5309 = vst [vmem:[#allocation105_spill] sm:$0xff] %v4006_v30  ;;  %v4014_v42 = vpop.f32.mrb[58].mxu0 }
 0x1e8   :  { %5307 = vst [vmem:[#allocation103_spill] sm:$0xff] %v4002_v28  ;;  %v898_v9 = vmax.f32 %v896_v31, %v897_v40  ;;  %v4008_v3 = vpop.eup %2906  ;;  %v1281_v32 = vadd.f32 %v4002_v28, %v1280_v41  ;;  %v995_v38 = vsub.f32 %v3654_v4, %v889_v53  ;;  %v997_v6 = vsub.f32 %v3674_v59, %v889_v53  ;;  %v4016_v49 = vpop.f32.mrb[58].mxu1 }
 0x1e9   :  { %v999_v16 = vsub.f32 %v3699_v37, %v889_v53  ;;  %5310 = vst [vmem:[#allocation106_spill] sm:$0xff] %v4014_v42  ;;  %5311 = vst [vmem:[#allocation107_spill] sm:$0xff] %v4016_v49  ;;  %v1279_v43 = vadd.f32 %v1278_v33, %v1277_v25  ;;  %v1212_v40 = vadd.f32 %v1211_v44, %v1210_v62  ;;  %v4020_v30 = vpop.f32.mrb[59].mxu0  ;;  %v4022_v24 = vpop.f32.mrb[59].mxu1 }
 0x1ea   :  { %v1001_v31 = vsub.f32 %v3710_v55, %v889_v53  ;;  %v1027_v27 = vsub.f32 %v3656_v0, %v961_v11  ;;  %v1282_v4 = vadd.f32 %v4008_v3, %v1281_v32  ;;  %v1083_v41 = vmul.f32 1.442695, %v995_v38 }
 0x1eb   :  { %v1087_v59 = vmul.f32 1.442695, %v997_v6  ;;  %v1091_v28 = vmul.f32 1.442695, %v999_v16  ;;  %2910 = vrcp.f32 %v1279_v43  ;;  %v1213_v37 = vrot.slane %v1212_v40, 2  ;;  %v4028_v16 = vpop.f32.mrb[60].mxu0 }
 0x1ec   :  { %v1095_v42 = vmul.f32 1.442695, %v1001_v31  ;;  %v1029_v49 = vsub.f32 %v3676_v14, %v961_v11  ;;  %v1283_v25 = vrot.slane %v1282_v4, 4  ;;  %2912 = vpow2.f32 %v1083_v41  ;;  %5312 = vst [vmem:[#allocation108_spill] sm:$0xff] %v4028_v16  ;;  %v4030_v38 = vpop.f32.mrb[60].mxu1  ;;  %v4034_v31 = vpop.f32.mrb[61].mxu0 }
 0x1ed   :  { %v1031_v55 = vsub.f32 %v3701_v52, %v961_v11  ;;  %v1033_v0 = vsub.f32 %v3712_v18, %v961_v11  ;;  %v1214_v62 = vadd.f32 %v1213_v37, %v1212_v40  ;;  %2914 = vpow2.f32 %v1087_v59  ;;  %5313 = vst [vmem:[#allocation109_spill] sm:$0xff] %v4034_v31  ;;  %v4036_v18 = vpop.f32.mrb[61].mxu1 }
 0x1ee   :  { %v1147_v53 = vmul.f32 1.442695, %v1027_v27  ;;  %v1151_v33 = vmul.f32 1.442695, %v1029_v49  ;;  %v1284_v44 = vadd.f32 %v1283_v25, %v1282_v4  ;;  %2916 = vpow2.f32 %v1091_v28  ;;  %v4042_v27 = vpop.f32.mrb[62].mxu0  ;;  %v4044_v4 = vpop.f32.mrb[62].mxu1 }
 0x1ef   :  { %v1155_v32 = vmul.f32 1.442695, %v1031_v55  ;;  %v1159_v6 = vmul.f32 1.442695, %v1033_v0  ;;  %v1215_v43 = vrot.slane %v1214_v62, 1  ;;  %2918 = vpow2.f32 %v1095_v42  ;;  %v4046_v41 = vpop.f32.mrb[63].mxu0 }
 0x1f0   :  { %v996_v14 = vsub.f32 %v3664_v58, %v898_v9  ;;  %v998_v52 = vsub.f32 %v3681_v46, %v898_v9  ;;  %v4038_v11 = vpop.eup %2908  ;;  %v1285_v49 = vrot.slane %v1284_v44, 2  ;;  %2920 = vpow2.f32 %v1147_v53  ;;  %v4048_v59 = vpop.f32.mrb[63].mxu1  ;;  %v5315_v0 = vld [vmem:[#allocation16_spill] sm:$0xff] }
 0x1f1   :  { %v1000_v28 = vsub.f32 %v3706_v5, %v898_v9  ;;  %v1002_v40 = vsub.f32 %v3717_v15, %v898_v9  ;;  %v1216_v42 = vadd.f32 %v1215_v43, %v1214_v62  ;;  %2922 = vpow2.f32 %v1151_v33  ;;  %v5316_v33 = vld [vmem:[#allocation17_spill] sm:$0xff] }
 0x1f2   :  { %v1085_v58 = vmul.f32 1.442695, %v996_v14  ;;  %v1089_v46 = vmul.f32 1.442695, %v998_v52  ;;  %v1286_v37 = vadd.f32 %v1285_v49, %v1284_v44  ;;  %2924 = vpow2.f32 %v1155_v32  ;;  %v5317_v44 = vld [vmem:[#allocation28_spill] sm:$0xff] }
 0x1f3   :  { %v1093_v25 = vmul.f32 1.442695, %v1000_v28  ;;  %v1097_v55 = vmul.f32 1.442695, %v1002_v40  ;;  %2926 = vrcp.f32 %v1216_v42  ;;  %v5314_v5 = vrot.slane %v3984_v1, 1 }
 0x1f4   :  { %v2221_v9 = vpack.c.bf16 %v3988_v47, %v3977_v7  ;;  %v1323_v62 = vmul.f32 %v3752_v57, %v5315_v0  ;;  %v1287_v53 = vrot.slane %v1286_v37, 1  ;;  %2928 = vpow2.f32 %v1159_v6 }
 0x1f5   :  { %v970_v15 = vmax.f32 %v3984_v1, %v5314_v5  ;;  %v1325_v43 = vmul.f32 %v3752_v57, %v5316_v33  ;;  %v1328_v32 = vmul.f32 %v3798_v17, %v5317_v44  ;;  %v4061_v14 = vpop.eup %2910  ;;  %2930 = vpow2.f32 %v1085_v58 }
 0x1f6   :  { %2316 = vmatprep.subr.bf16.mxu1 %v2221_v9  ;;  %v4066_v47 = vpop.eup %2912  ;;  %2932 = vpow2.f32 %v1089_v46  ;;  %v4071_v40 = vadd.f32 %v1287_v53, %v1286_v37  ;;  %v1330_v46 = vmul.f32 %v3798_v17, %v3668_v56  ;;  %v1393_v37 = vmax.f32 %v3769_v2, %v3777_v21  ;;  %v5319_v9 = vld [vmem:[#allocation21_spill] sm:$0xff] }
 0x1f7   :  { %v1028_v52 = vsub.f32 %v3666_v54, %v970_v15  ;;  %v1030_v1 = vsub.f32 %v3683_v20, %v970_v15  ;;  %v1032_v7 = vsub.f32 %v3708_v63, %v970_v15  ;;  %v1034_v6 = vsub.f32 %v3719_v22, %v970_v15  ;;  %v4069_v28 = vpop.eup %2914 }
 0x1f8   :  { %v2220_v49 = vpack.c.bf16 %v1325_v43, %v1323_v62  ;;  %2934 = vpow2.f32 %v1093_v25  ;;  %v4073_v5 = vpop.eup %2916  ;;  %v1217_v54 = vadd.f32 %v4069_v28, %v4066_v47  ;;  %v5318_v25 = vld [vmem:[#allocation18_spill] sm:$0xff]  ;;  %v1329_v0 = vmul.f32 %v3752_v57, %v5319_v9  ;;  %1394 = vmax.xlane.f32.xlu1 %v1393_v37  ;;  %v5321_v37 = vld [vmem:[#allocation57_spill] sm:$0xff]  ;;  %v5323_v9 = vld [vmem:[#allocation71_spill] sm:$0xff] }
 0x1f9   :  { %v1149_v42 = vmul.f32 1.442695, %v1028_v52  ;;  %v1153_v58 = vmul.f32 1.442695, %v1030_v1  ;;  %v1157_v20 = vmul.f32 1.442695, %v1032_v7  ;;  %v4079_v22 = vpop.eup %2918  ;;  %2936 = vpow2.f32 %v1097_v55 }
 0x1fa   :  { %v1161_v63 = vmul.f32 1.442695, %v1034_v6  ;;  %2317 = vmatpush1.bf16.msra.mxu1 %v2220_v49  ;;  %v1327_v15 = vmul.f32 %v3752_v57, %v5318_v25  ;;  %v4087_v62 = vpop.eup %2920  ;;  %v1218_v53 = vadd.f32 %v4073_v5, %v1217_v54  ;;  %v2223_v33 = vpack.c.bf16 %v1330_v46, %v1328_v32  ;;  %v5325_v57 = vld [vmem:[#allocation43_spill] sm:$0xff] }
 0x1fb   :  { %2938 = vpow2.f32 %v1149_v42  ;;  %v1396_v56 = vmax.f32 %v3783_v45, %v3790_v10  ;;  %v4092_v17 = vpop.eup %2922  ;;  %v1399_v43 = vmax.f32 %v3820_v48, %v3829_v34  ;;  %v1332_v1 = vmul.f32 %v3965_v13, %v3794_v60  ;;  %v5320_v42 = vld [vmem:[#allocation37_spill] sm:$0xff] }
 0x1fc   :  { %2940 = vpow2.f32 %v1153_v58  ;;  %v2222_v55 = vpack.c.bf16 %v1329_v0, %v1327_v15  ;;  %v4098_v44 = vpop.eup %2924  ;;  %v1219_v52 = vadd.f32 %v4079_v22, %v1218_v53  ;;  %v1289_v32 = vadd.f32 %v4092_v17, %v4087_v62  ;;  %2318 = vmatprep.subr.bf16.mxu1 %v2223_v33  ;;  %v5324_v53 = vld [vmem:[#allocation42_spill] sm:$0xff] }
 0x1fd   :  { %2942 = vpow2.f32 %v1157_v20  ;;  %v2927_v7 = vpop.eup %2926  ;;  %v1334_v6 = vmul.f32 %v3965_v13, %v3805_v35  ;;  %v1331_v49 = vmul.f32 %v3891_v12, %v3722_v26  ;;  %v1333_v58 = vmul.f32 %v3891_v12, %v5320_v42  ;;  %1397 = vmax.xlane.f32.xlu1 %v1396_v56  ;;  %v5322_v26 = vld [vmem:[#allocation73_spill] sm:$0xff] }
 0x1fe   :  { %2944 = vpow2.f32 %v1161_v63  ;;  %2319 = vmatpush1.bf16.msra.mxu1 %v2222_v55  ;;  %v4111_v54 = vpop.eup %2928  ;;  %v1220_v46 = vrot.slane %v1219_v52, 4  ;;  %v1290_v20 = vadd.f32 %v4098_v44, %v1289_v32  ;;  %v1336_v60 = vmul.f32 %v3965_v13, %v3811_v51 }
 0x1ff   :  { %v1338_v63 = vmul.f32 %v3965_v13, %v5321_v37  ;;  %v4118_v25 = vpop.eup %2930  ;;  %v2225_v35 = vpack.c.bf16 %v1334_v6, %v1332_v1  ;;  %v2224_v15 = vpack.c.bf16 %v1333_v58, %v1331_v49  ;;  %v1405_v0 = vmax.f32 %v5323_v9, %v5322_v26  ;;  %v5326_v1 = vld [vmem:[#allocation12_spill] sm:$0xff]  ;;  %v5327_v6 = vld [vmem:[#allocation75_spill] sm:$0xff]  ;;  %v5332_v58 = vld [vmem:[#allocation77_spill] sm:$0xff] }
 0x200   :  { %v1335_v33 = vmul.f32 %v3891_v12, %v5324_v53  ;;  %v4124_v55 = vpop.eup %2932  ;;  %v1221_v32 = vadd.f32 %v1220_v46, %v1219_v52  ;;  %v1291_v42 = vadd.f32 %v4111_v54, %v1290_v20  ;;  %v1337_v13 = vmul.f32 %v3891_v12, %v5325_v57  ;;  %v5328_v53 = vld [vmem:[#allocation87_spill] sm:$0xff]  ;;  %v5329_v52 = vld [vmem:[#allocation84_spill] sm:$0xff] }
 0x201   :  { %v2227_v51 = vpack.c.bf16 %v1338_v63, %v1336_v60  ;;  %v1226_v56 = vadd.f32 %v4124_v55, %v4118_v25  ;;  %2320 = vmatprep.subr.bf16.mxu1 %v2225_v35  ;;  %v5330_v12 = vld [vmem:[#allocation92_spill] sm:$0xff]  ;;  %2946 = vrcp.f32 %v4071_v40  ;;  %1400 = vmax.xlane.f32.xlu1 %v1399_v43  ;;  %v5331_v49 = vld [vmem:[#allocation95_spill] sm:$0xff]  ;;  %v1339_v34 = vmul.f32 %v4038_v11, %v5332_v58 }
 0x202   :  { %v4129_v37 = vpop.eup %2934  ;;  %v1222_v20 = vrot.slane %v1221_v32, 2  ;;  %v1292_v60 = vrot.slane %v1291_v42, 4  ;;  %2321 = vmatpush1.bf16.msra.mxu1 %v2224_v15  ;;  %v2226_v63 = vpack.c.bf16 %v1337_v13, %v1335_v33  ;;  %v1340_v57 = vmul.f32 %v2927_v7, %v5330_v12  ;;  %v5333_v33 = vld [vmem:[#allocation19_spill] sm:$0xff] }
 0x203   :  { %v4140_v26 = vpop.eup %2936  ;;  %v1227_v35 = vadd.f32 %v4129_v37, %v1226_v56  ;;  %2322 = vmatprep.subr.bf16.mxu1 %v2227_v51  ;;  %v1342_v9 = vmul.f32 %v2927_v7, %v5331_v49  ;;  %v1341_v13 = vmul.f32 %v4038_v11, %v5333_v33  ;;  %v1344_v12 = vmul.f32 %v2927_v7, %v3973_v36  ;;  %v5335_v56 = vld [vmem:[#allocation93_spill] sm:$0xff]  ;;  %v5336_v49 = vld [vmem:[#allocation90_spill] sm:$0xff] }
 0x204   :  { %v1223_v48 = vadd.f32 %v1222_v20, %v1221_v32  ;;  %v1293_v15 = vadd.f32 %v1292_v60, %v1291_v42  ;;  %v1346_v51 = vmul.f32 %v2927_v7, %v3979_v19  ;;  %v1417_v45 = vmax.f32 %v5336_v49, %v5335_v56  ;;  %v5338_v7 = vld [vmem:[#allocation98_spill] sm:$0xff]  ;;  %v5340_v33 = vld [vmem:[#allocation13_spill] sm:$0xff] }
 0x205   :  { %v4147_v46 = vpop.eup %2938  ;;  %v1228_v40 = vadd.f32 %v4140_v26, %v1227_v35  ;;  %v2229_v43 = vpack.c.bf16 %v1342_v9, %v1340_v57  ;;  %v2228_v20 = vpack.c.bf16 %v1341_v13, %v1339_v34  ;;  %v5337_v9 = vmax.f32 %v3836_v39, %v3845_v50  ;;  %v5339_v57 = vld [vmem:[#allocation96_spill] sm:$0xff]  ;;  %v5341_v34 = vld [vmem:[#allocation15_spill] sm:$0xff] }
 0x206   :  { %v4152_v10 = vpop.eup %2940  ;;  %v1224_v21 = vrot.slane %v1223_v48, 1  ;;  %v1294_v32 = vrot.slane %v1293_v15, 2  ;;  %2323 = vmatpush1.bf16.msra.mxu1 %v2226_v63  ;;  %v2231_v19 = vpack.c.bf16 %v1346_v51, %v1344_v12  ;;  %v1343_v56 = vmul.f32 %v4038_v11, %v5340_v33  ;;  %1418 = vmax.xlane.f32.xlu0 %v1417_v45  ;;  %v5342_v12 = vld [vmem:[#allocation106_spill] sm:$0xff]  ;;  %v5371_v50 = vld [vmem:[#allocation60_spill] sm:$0xff] }
 0x207   :  { %5334 = vst [vmem:[#allocation16_spill] sm:$0xff] %v4152_v10  ;;  %v4158_v58 = vpop.eup %2942  ;;  %v1298_v42 = vadd.f32 %v4152_v10, %v4147_v46  ;;  %v1229_v60 = vrot.slane %v1228_v40, 4  ;;  %1403 = vmax.xlane.f32.xlu1 %v5337_v9  ;;  %2324 = vmatprep.subr.bf16.mxu1 %v2229_v43  ;;  %v1345_v13 = vmul.f32 %v4038_v11, %v5341_v34  ;;  %v5358_v11 = vld [vmem:[#allocation50_spill] sm:$0xff] }
 0x208   :  { %v4162_v36 = vpop.eup %2944  ;;  %v1225_v49 = vadd.f32 %v1224_v21, %v1223_v48  ;;  %v1295_v2 = vadd.f32 %v1294_v32, %v1293_v15  ;;  %v1423_v9 = vmax.f32 %v3998_v29, %v4004_v61  ;;  %v1429_v51 = vmax.f32 %v4028_v16, %v4034_v31  ;;  %v5343_v15 = vld [vmem:[#allocation29_spill] sm:$0xff]  ;;  %v5351_v31 = vld [vmem:[#allocation48_spill] sm:$0xff] }
 0x209   :  { %v1299_v63 = vadd.f32 %v4158_v58, %v1298_v42  ;;  %v1230_v10 = vadd.f32 %v1229_v60, %v1228_v40  ;;  %v2230_v21 = vpack.c.bf16 %v1345_v13, %v1343_v56  ;;  %v5344_v40 = vld [vmem:[#allocation58_spill] sm:$0xff]  ;;  %v5348_v13 = vld [vmem:[#allocation41_spill] sm:$0xff]  ;;  %v5366_v29 = vld [vmem:[#allocation100_spill] sm:$0xff] }
 0x20a   :  { %2948 = vrcp.f32 %v1225_v49  ;;  %v1296_v33 = vrot.slane %v1295_v2, 1  ;;  %2325 = vmatpush1.bf16.msra.mxu1 %v2228_v20  ;;  %v4185_v32 = vmul.f32 %v5344_v40, %v5343_v15  ;;  %v5345_v42 = vld [vmem:[#allocation30_spill] sm:$0xff]  ;;  %1424 = vmax.xlane.f32.xlu0 %v1423_v9 }
 0x20b   :  { %v1300_v48 = vadd.f32 %v4162_v36, %v1299_v63  ;;  %v1231_v45 = vrot.slane %v1230_v10, 2  ;;  %1406 = vmax.xlane.f32.xlu1 %v1405_v0  ;;  %2326 = vmatprep.subr.bf16.mxu1 %v2231_v19  ;;  %v4189_v60 = vmul.f32 %v5344_v40, %v5345_v42  ;;  %v5346_v63 = vld [vmem:[#allocation36_spill] sm:$0xff]  ;;  %v5347_v20 = vld [vmem:[#allocation34_spill] sm:$0xff]  ;;  %v5349_v0 = vld [vmem:[#allocation39_spill] sm:$0xff]  ;;  %v2947_v43 = vpop.eup %2946 }
 0x20c   :  { %v1297_v49 = vadd.f32 %v1296_v33, %v1295_v2  ;;  %v1435_v56 = vmax.f32 %v5347_v20, %v5346_v63  ;;  %v5350_v15 = vld [vmem:[#allocation22_spill] sm:$0xff]  ;;  %v5352_v42 = vld [vmem:[#allocation23_spill] sm:$0xff]  ;;  %v5355_v19 = vld [vmem:[#allocation32_spill] sm:$0xff] }
 0x20d   :  { %v1301_v34 = vrot.slane %v1300_v48, 4  ;;  %v1232_v35 = vadd.f32 %v1231_v45, %v1230_v10  ;;  %v4199_v16 = vmul.f32 %v5351_v31, %v5350_v15  ;;  %v4203_v2 = vmul.f32 %v5351_v31, %v5352_v42  ;;  %v5353_v33 = vld [vmem:[#allocation31_spill] sm:$0xff] }
 0x20e   :  { %2950 = vrcp.f32 %v1297_v49  ;;  %2327 = vmatpush1.bf16.msra.mxu1 %v2230_v21  ;;  %v4207_v63 = vmul.f32 %v5344_v40, %v5353_v33  ;;  %v4211_v10 = vmul.f32 %v5344_v40, %v5355_v19  ;;  %v5357_v15 = vmax.f32 %v5327_v6, %v5326_v1  ;;  %v5359_v49 = vld [vmem:[#allocation47_spill] sm:$0xff]  ;;  %v5360_v21 = vld [vmem:[#allocation56_spill] sm:$0xff]  ;;  %1430 = vmax.xlane.f32.xlu0 %v1429_v51  ;;  %v5364_v1 = vld [vmem:[#allocation25_spill] sm:$0xff] }
 0x20f   :  { %v1302_v9 = vadd.f32 %v1301_v34, %v1300_v48  ;;  %v1233_v45 = vrot.slane %v1232_v35, 1  ;;  %v1441_v48 = vmax.f32 %v5359_v49, %v5358_v11  ;;  %v5361_v34 = vld [vmem:[#allocation53_spill] sm:$0xff]  ;;  %v5362_v19 = vld [vmem:[#allocation24_spill] sm:$0xff]  ;;  %v5370_v51 = vld [vmem:[#allocation63_spill] sm:$0xff] }
 0x210   :  { %5354 = vst [vmem:[#allocation17_spill] sm:$0xff] %v4207_v63  ;;  %5356 = vst [vmem:[#allocation28_spill] sm:$0xff] %v4211_v10  ;;  %1409 = vmax.xlane.f32.xlu1 %v5357_v15  ;;  %v4226_v61 = vmul.f32 %v5351_v31, %v5362_v19  ;;  %v4230_v15 = vmul.f32 %v5351_v31, %v5364_v1  ;;  %v5365_v6 = vld [vmem:[#allocation61_spill] sm:$0xff]  ;;  %v5368_v49 = vld [vmem:[#allocation64_spill] sm:$0xff]  ;;  %v1447_v40 = vmax.f32 %v5371_v50, %v5370_v51 }
 0x211   :  { %v1303_v33 = vrot.slane %v1302_v9, 2  ;;  %v1234_v42 = vadd.f32 %v1233_v45, %v1232_v35  ;;  %v4234_v11 = vmul.f32 %v5366_v29, %v5365_v6  ;;  %v4238_v20 = vmul.f32 %v5366_v29, %v5368_v49  ;;  %v5374_v1 = vld [vmem:[#allocation44_spill] sm:$0xff]  ;;  %v5375_v35 = vld [vmem:[#allocation89_spill] sm:$0xff]  ;;  %v5382_v63 = vld [vmem:[#allocation14_spill] sm:$0xff] }
 0x212   :  { %5363 = vst [vmem:[#allocation18_spill] sm:$0xff] %v4226_v61  ;;  %v4248_v45 = vmul.f32 %v5375_v35, %v5374_v1  ;;  %v5376_v6 = vmax.f32 %v3898_v8, %v3911_v23  ;;  %v5377_v51 = vld [vmem:[#allocation45_spill] sm:$0xff]  ;;  %1436 = vmax.xlane.f32.xlu0 %v1435_v56  ;;  %v5379_v1 = vld [vmem:[#allocation70_spill] sm:$0xff]  ;;  %v5383_v49 = vld [vmem:[#allocation76_spill] sm:$0xff] }
 0x213   :  { %5367 = vst [vmem:[#allocation21_spill] sm:$0xff] %v4234_v11  ;;  %5369 = vst [vmem:[#allocation37_spill] sm:$0xff] %v4238_v20  ;;  %v1304_v39 = vadd.f32 %v1303_v33, %v1302_v9  ;;  %2952 = vrcp.f32 %v1234_v42  ;;  %v4257_v9 = vmul.f32 %v5375_v35, %v5377_v51  ;;  %v5378_v33 = vld [vmem:[#allocation67_spill] sm:$0xff]  ;;  %v4265_v42 = vmul.f32 %v5366_v29, %v5379_v1  ;;  %v5380_v23 = vld [vmem:[#allocation74_spill] sm:$0xff] }
 0x214   :  { %1412 = vmax.xlane.f32.xlu1 %v5376_v6  ;;  %v4261_v19 = vmul.f32 %v5366_v29, %v5378_v33  ;;  %v2949_v31 = vpop.eup %2948  ;;  %v5381_v6 = vld [vmem:[#allocation72_spill] sm:$0xff]  ;;  %v5384_v1 = vld [vmem:[#allocation51_spill] sm:$0xff] }
 0x215   :  { %v1305_v50 = vrot.slane %v1304_v39, 1  ;;  %v1453_v8 = vmax.f32 %v5381_v6, %v5380_v23  ;;  %v1347_v51 = vmul.f32 %v2949_v31, %v4066_v47  ;;  %v1349_v20 = vmul.f32 %v2949_v31, %v4069_v28  ;;  %v5388_v29 = vld [vmem:[#allocation27_spill] sm:$0xff] }
 0x216   :  { %v1351_v33 = vmul.f32 %v2949_v31, %v4073_v5  ;;  %v1353_v10 = vmul.f32 %v2949_v31, %v4079_v22  ;;  %v4281_v23 = vmul.f32 %v5375_v35, %v5384_v1  ;;  %v5385_v47 = vmax.f32 %v5329_v52, %v5328_v53  ;;  %v5386_v5 = vld [vmem:[#allocation54_spill] sm:$0xff]  ;;  %1442 = vmax.xlane.f32.xlu0 %v1441_v48  ;;  %v5389_v1 = vld [vmem:[#allocation79_spill] sm:$0xff] }
 0x217   :  { %v1306_v61 = vadd.f32 %v1305_v50, %v1304_v39  ;;  %v2232_v28 = vpack.c.bf16 %v1349_v20, %v1347_v51  ;;  %v4288_v22 = vmul.f32 %v5375_v35, %v5386_v5  ;;  %v5387_v50 = vld [vmem:[#allocation26_spill] sm:$0xff]  ;;  %v4294_v56 = vmul.f32 %v2947_v43, %v5388_v29  ;;  %v5391_v35 = vld [vmem:[#allocation103_spill] sm:$0xff] }
 0x218   :  { %1415 = vmax.xlane.f32.xlu1 %v5385_v47  ;;  %v2234_v11 = vpack.c.bf16 %v1353_v10, %v1351_v33  ;;  %v4291_v39 = vmul.f32 %v2947_v43, %v5387_v50  ;;  %v2951_v31 = vpop.eup %2950  ;;  %v4298_v6 = vmul.f32 %v4061_v14, %v5389_v1  ;;  %v5390_v47 = vld [vmem:[#allocation80_spill] sm:$0xff]  ;;  %v4307_v51 = vmul.f32 %v2947_v43, %v5391_v35  ;;  %v5392_v48 = vld [vmem:[#allocation83_spill] sm:$0xff]  ;;  %v5394_v50 = vld [vmem:[#allocation86_spill] sm:$0xff] }
 0x219   :  { %2954 = vrcp.f32 %v1306_v61  ;;  %v4302_v20 = vmul.f32 %v4061_v14, %v5390_v47  ;;  %v4310_v61 = vmul.f32 %v2947_v43, %v4008_v3  ;;  %v4314_v33 = vmul.f32 %v4061_v14, %v5392_v48  ;;  %v5400_v10 = vld [vmem:[#allocation85_spill] sm:$0xff] }
 0x21a   :  { %v4322_v1 = vmul.f32 %v4061_v14, %v5394_v50  ;;  %v4325_v47 = vmul.f32 %v2951_v31, %v4087_v62  ;;  %v5396_v3 = vmax.f32 %v5339_v57, %v5338_v7  ;;  %v4333_v35 = vmul.f32 %v2951_v31, %v4092_v17  ;;  %1448 = vmax.xlane.f32.xlu0 %v1447_v40  ;;  %v5397_v62 = vld [vmem:[#allocation82_spill] sm:$0xff]  ;;  %v5402_v57 = vld [vmem:[#allocation91_spill] sm:$0xff] }
 0x21b   :  { %5393 = vst [vmem:[#allocation57_spill] sm:$0xff] %v4314_v33  ;;  %v4336_v48 = vmul.f32 %v2951_v31, %v4098_v44  ;;  %v4339_v5 = vmul.f32 %v2951_v31, %v4111_v54  ;;  %v5398_v50 = vld [vmem:[#allocation78_spill] sm:$0xff]  ;;  %v5403_v40 = vld [vmem:[#allocation99_spill] sm:$0xff]  ;;  %v5404_v31 = vld [vmem:[#allocation97_spill] sm:$0xff]  ;;  %v5407_v44 = vmax.f32 %v5342_v12, %v4020_v30 }
 0x21c   :  { %5395 = vst [vmem:[#allocation42_spill] sm:$0xff] %v4322_v1  ;;  %1421 = vmax.xlane.f32.xlu1 %v5396_v3  ;;  %v5406_v33 = vld [vmem:[#allocation102_spill] sm:$0xff]  ;;  %v5408_v54 = vld [vmem:[#allocation107_spill] sm:$0xff] }
 0x21d   :  { %v2953_v53 = vpop.eup %2952 }
 0x21e   :  { %v1348_v29 = vmul.f32 %v2953_v53, %v4118_v25  ;;  %v1350_v7 = vmul.f32 %v2953_v53, %v4124_v55  ;;  %v1352_v3 = vmul.f32 %v2953_v53, %v4129_v37  ;;  %v1354_v17 = vmul.f32 %v2953_v53, %v4140_v26  ;;  %1454 = vmax.xlane.f32.xlu0 %v1453_v8  ;;  %v5410_v53 = vld [vmem:[#allocation16_spill] sm:$0xff] }
 0x21f   :  { %v5409_v26 = vmax.f32 %v4042_v27, %v4046_v41  ;;  %v5411_v8 = vmax.f32 %v5349_v0, %v5348_v13 }
 0x220   :  { %1427 = vmax.xlane.f32.xlu1 %v5407_v44  ;;  %v2233_v25 = vpack.c.bf16 %v1350_v7, %v1348_v29  ;;  %v2235_v14 = vpack.c.bf16 %v1354_v17, %v1352_v3  ;;  %v5416_v29 = vld [vmem:[#allocation17_spill] sm:$0xff]  ;;  %v5420_v3 = vld [vmem:[#allocation66_spill] sm:$0xff] }
 0x222   :  { %2328 = vmatprep.subr.bf16.mxu1 %v2233_v25 }
 0x223   :  { %v2955_v55 = vpop.eup %2954  ;;  %2329 = vmatpush1.bf16.msra.mxu1 %v2232_v28  ;;  %v5412_v28 = vpack.c.bf16 %v4189_v60, %v4185_v32  ;;  %v5421_v32 = vld [vmem:[#allocation69_spill] sm:$0xff] }
 0x224   :  { %1433 = vmax.xlane.f32.xlu1 %v5409_v26  ;;  %v1380_v37 = vmul.f32 %v2955_v55, %v4147_v46  ;;  %v1382_v44 = vmul.f32 %v2955_v55, %v5410_v53  ;;  %v1384_v43 = vmul.f32 %v2955_v55, %v4158_v58  ;;  %2330 = vmatprep.subr.bf16.mxu1 %v2235_v14 }
 0x225   :  { %v1386_v52 = vmul.f32 %v2955_v55, %v4162_v36  ;;  %v5413_v46 = vpack.c.bf16 %v4203_v2, %v4199_v16  ;;  %v5414_v58 = vmax.f32 %v5361_v34, %v5360_v21  ;;  %v5415_v36 = vld [vmem:[#allocation28_spill] sm:$0xff]  ;;  %v5422_v60 = vmax.f32 %v5420_v3, %v5421_v32  ;;  %v5423_v16 = vld [vmem:[#allocation37_spill] sm:$0xff] }
 0x226   :  { %v2249_v1 = vpack.c.bf16 %v1382_v44, %v1380_v37  ;;  %v5424_v2 = vld [vmem:[#allocation21_spill] sm:$0xff]  ;;  %v5426_v44 = vpack.c.bf16 %v4257_v9, %v4248_v45  ;;  %v5430_v9 = vpack.c.bf16 %v4294_v56, %v4291_v39 }
 0x227   :  { %v2251_v7 = vpack.c.bf16 %v1386_v52, %v1384_v43  ;;  %2331 = vmatpush1.bf16.msra.mxu1 %v2234_v11  ;;  %v5417_v52 = vpack.c.bf16 %v5415_v36, %v5416_v29  ;;  %v464_v11 = vpop.f32.mrb[64].mxu0  ;;  %v5418_v43 = vld [vmem:[#allocation18_spill] sm:$0xff]  ;;  %v5425_v25 = vpack.c.bf16 %v5423_v16, %v5424_v2  ;;  %v5429_v29 = vpack.c.bf16 %v4288_v22, %v4281_v23  ;;  %v5434_v56 = vld [vmem:[#allocation57_spill] sm:$0xff] }
 0x228   :  { %1439 = vmax.xlane.f32.xlu1 %v5411_v8  ;;  %2332 = vmatprep.subr.bf16.mxu1 %v5412_v28  ;;  %v5419_v14 = vpack.c.bf16 %v4230_v15, %v5418_v43  ;;  %v466_v17 = vpop.f32.mrb[65].mxu0  ;;  %v5427_v15 = vmax.f32 %v5383_v49, %v5382_v63  ;;  %v5428_v28 = vpack.c.bf16 %v4265_v42, %v4261_v19  ;;  %v5439_v63 = vld [vmem:[#allocation35_spill] sm:$0xff] }
 0x229   :  { %v468_v55 = vpop.f32.mrb[66].mxu0  ;;  %v5431_v19 = vpack.c.bf16 %v4302_v20, %v4298_v6  ;;  %v5432_v43 = vpack.c.bf16 %v4310_v61, %v4307_v51  ;;  %v5436_v6 = vpack.c.bf16 %v4333_v35, %v4325_v47  ;;  %v5437_v16 = vpack.c.bf16 %v4339_v5, %v4336_v48  ;;  %v5438_v5 = vld [vmem:[#allocation33_spill] sm:$0xff] }
 0x22a   :  { %v1899_v26 = vpack.c.bf16 %v468_v55, %v464_v11  ;;  %v470_v37 = vpop.f32.mrb[67].mxu0 }
 0x22b   :  { %2333 = vmatpush1.bf16.msra.mxu1 %v5413_v46  ;;  %v1900_v53 = vpack.c.bf16 %v470_v37, %v466_v17  ;;  %v474_v8 = vpop.f32.mrb[68].mxu0  ;;  %v5433_v17 = vld [vmem:[#allocation42_spill] sm:$0xff] }
 0x22c   :  { %1445 = vmax.xlane.f32.xlu1 %v5414_v58  ;;  %2334 = vmatprep.subr.bf16.mxu1 %v5417_v52  ;;  %v476_v46 = vpop.f32.mrb[69].mxu0  ;;  %v5435_v39 = vpack.c.bf16 %v5433_v17, %v5434_v56 }
 0x22d   :  { %1931 = vmatprep.subr.bf16.mxu0 %v1900_v53  ;;  %v478_v58 = vpop.f32.mrb[70].mxu0 }
 0x22e   :  { %1932 = vmatpush1.bf16.xpose.msra.mxu0 %v1899_v26  ;;  %v1901_v36 = vpack.c.bf16 %v478_v58, %v474_v8  ;;  %v480_v45 = vpop.f32.mrb[71].mxu0 }
 0x22f   :  { %2335 = vmatpush1.bf16.msra.mxu1 %v5419_v14  ;;  %v1902_v52 = vpack.c.bf16 %v480_v45, %v476_v46  ;;  %v484_v11 = vpop.f32.mrb[72].mxu0 }
 0x230   :  { %1451 = vmax.xlane.f32.xlu1 %v5422_v60  ;;  %2336 = vmatprep.subr.bf16.mxu1 %v5425_v25  ;;  %v486_v42 = vpop.f32.mrb[73].mxu0 }
 0x231   :  { %1933 = vmatprep.subr.bf16.mxu0 %v1902_v52  ;;  %v488_v14 = vpop.f32.mrb[74].mxu0 }
 0x232   :  { %v1903_v23 = vpack.c.bf16 %v488_v14, %v484_v11  ;;  %v490_v22 = vpop.f32.mrb[75].mxu0 }
 0x233   :  { %2337 = vmatpush1.bf16.msra.mxu1 %v5426_v44  ;;  %v1904_v60 = vpack.c.bf16 %v490_v22, %v486_v42  ;;  %v494_v20 = vpop.f32.mrb[76].mxu0 }
 0x234   :  { %1457 = vmax.xlane.f32.xlu1 %v5427_v15  ;;  %2338 = vmatprep.subr.bf16.mxu1 %v5428_v28  ;;  %v496_v51 = vpop.f32.mrb[77].mxu0 }
 0x235   :  { %v498_v61 = vpop.f32.mrb[78].mxu0 }
 0x236   :  { %1934 = vmatpush1.bf16.xpose.msra.mxu0 %v1901_v36  ;;  %v1905_v2 = vpack.c.bf16 %v498_v61, %v494_v20  ;;  %v500_v25 = vpop.f32.mrb[79].mxu0 }
 0x237   :  { %2339 = vmatpush1.bf16.msra.mxu1 %v5429_v29  ;;  %1935 = vmatprep.subr.bf16.mxu0 %v1904_v60  ;;  %v1906_v55 = vpack.c.bf16 %v500_v25, %v496_v51 }
 0x238   :  { %2340 = vmatprep.subr.bf16.mxu1 %v5430_v9 }
 0x23b   :  { %2341 = vmatpush1.bf16.msra.mxu1 %v5431_v19 }
 0x23c   :  { %2342 = vmatprep.subr.bf16.mxu1 %v5432_v43 }
 0x23e   :  { %1936 = vmatpush1.bf16.xpose.msra.mxu0 %v1903_v23 }
 0x23f   :  { %2343 = vmatpush1.bf16.msra.mxu1 %v5435_v39  ;;  %1937 = vmatprep.subr.bf16.mxu0 %v1906_v55 }
 0x240   :  { %2344 = vmatprep.subr.bf16.mxu1 %v2249_v1  ;;  %v504_v1 = vpop.f32.mrb[80].mxu0 }
 0x241   :  { %v506_v26 = vpop.f32.mrb[81].mxu0 }
 0x242   :  { %v508_v37 = vpop.f32.mrb[82].mxu0 }
 0x243   :  { %2345 = vmatpush1.bf16.msra.mxu1 %v5436_v6  ;;  %v1907_v53 = vpack.c.bf16 %v508_v37, %v504_v1  ;;  %v510_v47 = vpop.f32.mrb[83].mxu0 }
 0x244   :  { %2346 = vmatprep.subr.bf16.mxu1 %v2251_v7  ;;  %v1908_v35 = vpack.c.bf16 %v510_v47, %v506_v26  ;;  %v4431_v7 = vpop.f32.mrb[64].mxu1  ;;  %v514_v58 = vpop.f32.mrb[84].mxu0 }
 0x245   :  { %v4433_v44 = vpop.f32.mrb[65].mxu1  ;;  %v516_v29 = vpop.f32.mrb[85].mxu0 }
 0x246   :  { %1938 = vmatpush1.bf16.xpose.msra.mxu0 %v1905_v2  ;;  %v4435_v15 = vpop.f32.mrb[66].mxu1  ;;  %v518_v52 = vpop.f32.mrb[86].mxu0 }
 0x247   :  { %2347 = vmatpush1.bf16.msra.mxu1 %v5437_v16  ;;  %1939 = vmatprep.subr.bf16.mxu0 %v1908_v35  ;;  %v4439_v48 = vpop.f32.mrb[67].mxu1  ;;  %v1909_v42 = vpack.c.bf16 %v518_v52, %v514_v58  ;;  %v520_v43 = vpop.f32.mrb[87].mxu0 }
 0x248   :  { %v4443_v28 = vpop.f32.mrb[68].mxu1  ;;  %v1910_v23 = vpack.c.bf16 %v520_v43, %v516_v29  ;;  %v5442_v11 = vpack.c.bf16 %v4439_v48, %v4433_v44  ;;  %v5448_v48 = vld [vmem:[#allocation88_spill] sm:$0xff] }
 0x249   :  { %v4445_v46 = vpop.f32.mrb[69].mxu1 }
 0x24a   :  { %v4447_v36 = vpop.f32.mrb[70].mxu1 }
 0x24b   :  { %v4451_v9 = vpop.f32.mrb[71].mxu1 }
 0x24c   :  { %v4455_v19 = vpop.f32.mrb[72].mxu1 }
 0x24d   :  { %v4457_v14 = vpop.f32.mrb[73].mxu1 }
 0x24e   :  { %1940 = vmatpush1.bf16.xpose.msra.mxu0 %v1907_v53  ;;  %v4459_v22 = vpop.f32.mrb[74].mxu1 }
 0x24f   :  { %v4463_v17 = vpop.f32.mrb[75].mxu1  ;;  %1941 = vmatprep.subr.bf16.mxu0 %v1910_v23 }
 0x250   :  { %v4467_v39 = vpop.f32.mrb[76].mxu1 }
 0x251   :  { %v4469_v6 = vpop.f32.mrb[77].mxu1 }
 0x252   :  { %v4471_v51 = vpop.f32.mrb[78].mxu1 }
 0x253   :  { %v524_v20 = vpop.f32.mrb[88].mxu0  ;;  %v4475_v2 = vpop.f32.mrb[79].mxu1 }
 0x254   :  { %v526_v61 = vpop.f32.mrb[89].mxu0  ;;  %v4479_v1 = vpop.f32.mrb[80].mxu1 }
 0x255   :  { %v528_v25 = vpop.f32.mrb[90].mxu0  ;;  %v4481_v53 = vpop.f32.mrb[81].mxu1 }
 0x256   :  { %1942 = vmatpush1.bf16.xpose.msra.mxu0 %v1909_v42  ;;  %v1911_v26 = vpack.c.bf16 %v528_v25, %v524_v20  ;;  %v530_v37 = vpop.f32.mrb[91].mxu0  ;;  %v4483_v35 = vpop.f32.mrb[82].mxu1 }
 0x257   :  { %v1912_v47 = vpack.c.bf16 %v530_v37, %v526_v61  ;;  %v4487_v29 = vpop.f32.mrb[83].mxu1 }
 0x258   :  { %v4491_v42 = vpop.f32.mrb[84].mxu1 }
 0x259   :  { %1943 = vmatprep.subr.bf16.mxu0 %v1912_v47  ;;  %v4493_v43 = vpop.f32.mrb[85].mxu1 }
 0x25a   :  { %v4495_v20 = vpop.f32.mrb[86].mxu1 }
 0x25b   :  { %v4499_v37 = vpop.f32.mrb[87].mxu1 }
 0x25c   :  { %v4503_v16 = vpop.f32.mrb[88].mxu1 }
 0x25e   :  { %1944 = vmatpush1.bf16.xpose.msra.mxu0 %v1911_v26  ;;  %v534_v23 = vpop.f32.mrb[92].mxu0  ;;  %v4505_v26 = vpop.f32.mrb[89].mxu1 }
 0x25f   :  { %v536_v61 = vpop.f32.mrb[93].mxu0  ;;  %v4507_v56 = vpop.f32.mrb[90].mxu1 }
 0x260   :  { %v538_v58 = vpop.f32.mrb[94].mxu0  ;;  %v4511_v25 = vpop.f32.mrb[91].mxu1 }
 0x261   :  { %v1913_v52 = vpack.c.bf16 %v538_v58, %v534_v23  ;;  %v540_v55 = vpop.f32.mrb[95].mxu0  ;;  %v1928_v58 = vpack.c.bf16 %v4511_v25, %v4505_v26  ;;  %v5440_v23 = vld [vmem:[#allocation38_spill] sm:$0xff] }
 0x262   :  { %v1914_v60 = vpack.c.bf16 %v540_v55, %v536_v61  ;;  %v5441_v55 = vld [vmem:[#allocation40_spill] sm:$0xff]  ;;  %v5480_v25 = vld [vmem:[#allocation34_spill] sm:$0xff] }
 0x264   :  { %1945 = vmatprep.subr.bf16.mxu0 %v1914_v60  ;;  %v5452_v60 = vld [vmem:[#allocation49_spill] sm:$0xff] }
 0x266   :  { %1946 = vmatpush1.bf16.xpose.msra.mxu0 %v1913_v52 }
 0x267   :  { %1947 = vmatprep.subr.bf16.mxu0 %v5442_v11 }
 0x26e   :  { %v1389_v45 = vpop.xlane.xlu1 %1388 }
 0x26f   :  { %v1483_v8 = vsub.f32 %v5438_v5, %v1389_v45  ;;  %v1484_v49 = vsub.f32 %v5439_v63, %v1389_v45  ;;  %v1392_v47 = vpop.xlane.xlu0 %1391  ;;  %v5443_v63 = vpack.c.bf16 %v4435_v15, %v4431_v7  ;;  %v5444_v45 = vpack.c.bf16 %v4451_v9, %v4445_v46 }
 0x270   :  { %v1485_v32 = vsub.f32 %v5440_v23, %v1392_v47  ;;  %v1486_v61 = vsub.f32 %v5441_v55, %v1392_v47  ;;  %v5446_v7 = vpack.c.bf16 %v4463_v17, %v4457_v14  ;;  %v5447_v15 = vmax.f32 %v5398_v50, %v5397_v62  ;;  %v5454_v55 = vld [vmem:[#allocation52_spill] sm:$0xff] }
 0x271   :  { %v1547_v3 = vmul.f32 1.442695, %v1483_v8  ;;  %v1549_v21 = vmul.f32 1.442695, %v1484_v49  ;;  %1948 = vmatpush1.bf16.xpose.msra.mxu0 %v5443_v63  ;;  %v5449_v46 = vmax.f32 %v5400_v10, %v5448_v48  ;;  %v5453_v14 = vpack.c.bf16 %v4475_v2, %v4469_v6  ;;  %v5458_v2 = vld [vmem:[#allocation62_spill] sm:$0xff] }
 0x272   :  { %v1551_v34 = vmul.f32 1.442695, %v1485_v32  ;;  %v1553_v5 = vmul.f32 1.442695, %v1486_v61  ;;  %1949 = vmatprep.subr.bf16.mxu0 %v5444_v45 }
 0x273   :  { %2956 = vpow2.f32 %v1547_v3 }
 0x274   :  { %2958 = vpow2.f32 %v1549_v21 }
 0x275   :  { %2960 = vpow2.f32 %v1551_v34  ;;  %v5445_v34 = vpack.c.bf16 %v4447_v36, %v4443_v28  ;;  %v5450_v28 = vpack.c.bf16 %v4459_v22, %v4455_v19  ;;  %v5451_v36 = vld [vmem:[#allocation46_spill] sm:$0xff] }
 0x276   :  { %2962 = vpow2.f32 %v1553_v5  ;;  %v5455_v5 = vld [vmem:[#allocation55_spill] sm:$0xff] }
 0x279   :  { %1950 = vmatpush1.bf16.xpose.msra.mxu0 %v5445_v34  ;;  %v5457_v34 = vld [vmem:[#allocation59_spill] sm:$0xff] }
 0x27a   :  { %1951 = vmatprep.subr.bf16.mxu0 %v5446_v7  ;;  %v5459_v7 = vpack.c.bf16 %v4487_v29, %v4481_v53  ;;  %v5463_v29 = vld [vmem:[#allocation93_spill] sm:$0xff] }
 0x27d   :  { %v4528_v8 = vpop.eup %2956 }
 0x27e   :  { %v4530_v49 = vpop.eup %2958 }
 0x27f   :  { %v4532_v44 = vpop.eup %2960  ;;  %v1675_v3 = vadd.f32 %v4530_v49, %v4528_v8 }
 0x280   :  { %v4536_v21 = vpop.eup %2962 }
 0x281   :  { %1676 = vadd.xlane.f32.xlu0 %v1675_v3  ;;  %v1678_v32 = vadd.f32 %v4536_v21, %v4532_v44  ;;  %1952 = vmatpush1.bf16.xpose.msra.mxu0 %v5450_v28  ;;  %v5456_v3 = vpack.c.bf16 %v4471_v51, %v4467_v39  ;;  %v5460_v28 = vld [vmem:[#allocation65_spill] sm:$0xff] }
 0x282   :  { %1953 = vmatprep.subr.bf16.mxu0 %v5453_v14 }
 0x283   :  { %1679 = vadd.xlane.f32.xlu1 %v1678_v32 }
 0x285   :  { %1460 = vmax.xlane.f32.xlu0 %v5447_v15  ;;  %v1395_v9 = vpop.xlane.xlu1 %1394 }
 0x286   :  { %v1487_v11 = vsub.f32 %v5451_v36, %v1395_v9  ;;  %v1488_v52 = vsub.f32 %v5452_v60, %v1395_v9 }
 0x287   :  { %1463 = vmax.xlane.f32.xlu1 %v5449_v46 }
 0x288   :  { %v1555_v17 = vmul.f32 1.442695, %v1487_v11  ;;  %v1557_v47 = vmul.f32 1.442695, %v1488_v52  ;;  %v5461_v11 = vld [vmem:[#allocation68_spill] sm:$0xff] }
 0x289   :  { %1954 = vmatpush1.bf16.xpose.msra.mxu0 %v5456_v3 }
 0x28a   :  { %v1398_v23 = vpop.xlane.xlu1 %1397  ;;  %2964 = vpow2.f32 %v1555_v17  ;;  %1955 = vmatprep.subr.bf16.mxu0 %v5459_v7  ;;  %v5462_v17 = vld [vmem:[#allocation90_spill] sm:$0xff] }
 0x28b   :  { %v1489_v61 = vsub.f32 %v5454_v55, %v1398_v23  ;;  %v1490_v63 = vsub.f32 %v5455_v5, %v1398_v23  ;;  %2966 = vpow2.f32 %v1557_v47  ;;  %v5465_v5 = vld [vmem:[#allocation71_spill] sm:$0xff] }
 0x28d   :  { %v1559_v45 = vmul.f32 1.442695, %v1489_v61  ;;  %v1561_v19 = vmul.f32 1.442695, %v1490_v63  ;;  %v5464_v61 = vpack.c.bf16 %v4483_v35, %v4479_v1 }
 0x28e   :  { %v1401_v22 = vpop.xlane.xlu1 %1400 }
 0x28f   :  { %2968 = vpow2.f32 %v1559_v45  ;;  %v1491_v6 = vsub.f32 %v5457_v34, %v1401_v22  ;;  %v1492_v32 = vsub.f32 %v5458_v2, %v1401_v22  ;;  %v5466_v45 = vld [vmem:[#allocation73_spill] sm:$0xff]  ;;  %v5467_v34 = vpack.c.bf16 %v4499_v37, %v4493_v43  ;;  %v5470_v43 = vld [vmem:[#allocation75_spill] sm:$0xff] }
 0x290   :  { %2970 = vpow2.f32 %v1561_v19 }
 0x291   :  { %v1563_v15 = vmul.f32 1.442695, %v1491_v6  ;;  %v1565_v46 = vmul.f32 1.442695, %v1492_v32  ;;  %1956 = vmatpush1.bf16.xpose.msra.mxu0 %v5464_v61  ;;  %v5468_v6 = vld [vmem:[#allocation101_spill] sm:$0xff] }
 0x292   :  { %1957 = vmatprep.subr.bf16.mxu0 %v5467_v34 }
 0x293   :  { %2972 = vpow2.f32 %v1563_v15  ;;  %v1419_v39 = vpop.xlane.xlu0 %1418 }
 0x294   :  { %v1404_v9 = vpop.xlane.xlu1 %1403  ;;  %2974 = vpow2.f32 %v1565_v46  ;;  %v4572_v51 = vpop.eup %2964  ;;  %v1503_v47 = vsub.f32 %v5462_v17, %v1419_v39  ;;  %v1504_v55 = vsub.f32 %v5463_v29, %v1419_v39 }
 0x295   :  { %v1493_v36 = vsub.f32 %v5460_v28, %v1404_v9  ;;  %v1494_v60 = vsub.f32 %v5461_v11, %v1404_v9  ;;  %v4575_v23 = vpop.eup %2966  ;;  %v5469_v28 = vld [vmem:[#allocation104_spill] sm:$0xff]  ;;  %v4594_v11 = vpop.f32.mrb[92].mxu1 }
 0x296   :  { %v1681_v22 = vadd.f32 %v4575_v23, %v4572_v51  ;;  %v1587_v7 = vmul.f32 1.442695, %v1503_v47  ;;  %v1589_v9 = vmul.f32 1.442695, %v1504_v55  ;;  %v820_v17 = vpop.f32.mrb[93].mxu1 }
 0x297   :  { %v1567_v52 = vmul.f32 1.442695, %v1493_v36  ;;  %v1569_v14 = vmul.f32 1.442695, %v1494_v60  ;;  %v1425_v3 = vpop.xlane.xlu0 %1424  ;;  %v5471_v60 = vld [vmem:[#allocation12_spill] sm:$0xff] }
 0x298   :  { %v1407_v53 = vpop.xlane.xlu1 %1406  ;;  %v1507_v2 = vsub.f32 %v5468_v6, %v1425_v3  ;;  %1682 = vadd.xlane.f32.xlu0 %v1681_v22  ;;  %v1508_v36 = vsub.f32 %v5469_v28, %v1425_v3  ;;  %v5474_v6 = vld [vmem:[#allocation108_spill] sm:$0xff] }
 0x299   :  { %2976 = vpow2.f32 %v1567_v52  ;;  %v1495_v63 = vsub.f32 %v5465_v5, %v1407_v53  ;;  %v1496_v19 = vsub.f32 %v5466_v45, %v1407_v53  ;;  %v4589_v32 = vpop.eup %2968  ;;  %v4600_v53 = vpop.f32.mrb[94].mxu1  ;;  %v5472_v5 = vld [vmem:[#allocation94_spill] sm:$0xff] }
 0x29a   :  { %2978 = vpow2.f32 %v1569_v14  ;;  %v4591_v15 = vpop.eup %2970  ;;  %v1595_v47 = vmul.f32 1.442695, %v1507_v2  ;;  %v1929_v45 = vpack.c.bf16 %v4600_v53, %v4594_v11  ;;  %v1597_v34 = vmul.f32 1.442695, %v1508_v36 }
 0x29b   :  { %v1571_v1 = vmul.f32 1.442695, %v1495_v63  ;;  %v1573_v35 = vmul.f32 1.442695, %v1496_v19  ;;  %v1684_v52 = vadd.f32 %v4591_v15, %v4589_v32  ;;  %v1431_v14 = vpop.xlane.xlu0 %1430  ;;  %v5473_v63 = vmax.f32 %v5402_v57, %v5472_v5  ;;  %v824_v19 = vpop.f32.mrb[95].mxu1 }
 0x29c   :  { %v1511_v2 = vsub.f32 %v5474_v6, %v1431_v14  ;;  %v5497_v11 = vmax.f32 %v4044_v4, %v4048_v59 }
 0x29d   :  { %v1410_v46 = vpop.xlane.xlu1 %1409  ;;  %2980 = vpow2.f32 %v1571_v1  ;;  %v4602_v29 = vpop.eup %2972  ;;  %1466 = vmax.xlane.f32.xlu0 %v5473_v63  ;;  %1685 = vadd.xlane.f32.xlu1 %v1684_v52  ;;  %v5475_v1 = vpack.c.bf16 %v4495_v20, %v4491_v42  ;;  %v5478_v20 = vmax.f32 %v5404_v31, %v5403_v40 }
 0x29e   :  { %v1497_v37 = vsub.f32 %v5470_v43, %v1410_v46  ;;  %v1498_v39 = vsub.f32 %v5471_v60, %v1410_v46  ;;  %2982 = vpow2.f32 %v1573_v35  ;;  %v4609_v22 = vpop.eup %2974  ;;  %v1930_v35 = vpack.c.bf16 %v824_v19, %v820_v17  ;;  %v5476_v46 = vld [vmem:[#allocation20_spill] sm:$0xff]  ;;  %v5482_v19 = vld [vmem:[#allocation87_spill] sm:$0xff] }
 0x29f   :  { %2984 = vpow2.f32 %v1587_v7  ;;  %1958 = vmatpush1.bf16.xpose.msra.mxu0 %v5475_v1  ;;  %v5477_v7 = vld [vmem:[#allocation81_spill] sm:$0xff]  ;;  %v1437_v60 = vpop.xlane.xlu0 %1436  ;;  %v1603_v63 = vmul.f32 1.442695, %v1511_v2 }
 0x2a0   :  { %v1575_v55 = vmul.f32 1.442695, %v1497_v37  ;;  %v1577_v61 = vmul.f32 1.442695, %v1498_v39  ;;  %2986 = vpow2.f32 %v1589_v9  ;;  %v1687_v37 = vadd.f32 %v4609_v22, %v4602_v29  ;;  %1959 = vmatprep.subr.bf16.mxu0 %v1928_v58  ;;  %v5479_v39 = vld [vmem:[#allocation109_spill] sm:$0xff]  ;;  %v5481_v58 = vld [vmem:[#allocation84_spill] sm:$0xff] }
 0x2a1   :  { %v1413_v3 = vpop.xlane.xlu1 %1412  ;;  %1469 = vmax.xlane.f32.xlu1 %v5478_v20  ;;  %v1512_v52 = vsub.f32 %v5479_v39, %v1431_v14  ;;  %v1515_v26 = vsub.f32 %v5480_v25, %v1437_v60  ;;  %v5486_v39 = vld [vmem:[#allocation47_spill] sm:$0xff] }
 0x2a2   :  { %2988 = vpow2.f32 %v1575_v55  ;;  %v1499_v28 = vsub.f32 %v5476_v46, %v1413_v3  ;;  %v1500_v43 = vsub.f32 %v5477_v7, %v1413_v3  ;;  %1688 = vadd.xlane.f32.xlu0 %v1687_v37  ;;  %v5485_v7 = vld [vmem:[#allocation36_spill] sm:$0xff] }
 0x2a3   :  { %2990 = vpow2.f32 %v1577_v61  ;;  %v4622_v9 = vpop.eup %2976  ;;  %v1443_v1 = vpop.xlane.xlu0 %1442  ;;  %v1605_v2 = vmul.f32 1.442695, %v1512_v52  ;;  %v1611_v20 = vmul.f32 1.442695, %v1515_v26 }
 0x2a4   :  { %v1579_v36 = vmul.f32 1.442695, %v1499_v28  ;;  %v1581_v42 = vmul.f32 1.442695, %v1500_v43  ;;  %2992 = vpow2.f32 %v1595_v47  ;;  %v4628_v17 = vpop.eup %2978  ;;  %v5483_v28 = vld [vmem:[#allocation105_spill] sm:$0xff]  ;;  %v1516_v43 = vsub.f32 %v5485_v7, %v1437_v60 }
 0x2a5   :  { %v1416_v55 = vpop.xlane.xlu1 %1415  ;;  %2994 = vpow2.f32 %v1597_v34  ;;  %v1690_v6 = vadd.f32 %v4628_v17, %v4622_v9  ;;  %v5484_v34 = vmax.f32 %v5406_v33, %v5483_v28 }
 0x2a6   :  { %2996 = vpow2.f32 %v1579_v36  ;;  %v1501_v61 = vsub.f32 %v5481_v58, %v1416_v55  ;;  %v1502_v3 = vsub.f32 %v5482_v19, %v1416_v55  ;;  %v1519_v55 = vsub.f32 %v5486_v39, %v1443_v1  ;;  %v5488_v58 = vld [vmem:[#allocation96_spill] sm:$0xff]  ;;  %v5489_v19 = vld [vmem:[#allocation98_spill] sm:$0xff] }
 0x2a7   :  { %2998 = vpow2.f32 %v1581_v42  ;;  %v4635_v47 = vpop.eup %2980  ;;  %1472 = vmax.xlane.f32.xlu0 %v5484_v34  ;;  %1691 = vadd.xlane.f32.xlu1 %v1690_v6  ;;  %v5487_v42 = vpack.c.bf16 %v4507_v56, %v4503_v16  ;;  %v5490_v16 = vmax.f32 %v5408_v54, %v4022_v24 }
 0x2a8   :  { %v1583_v14 = vmul.f32 1.442695, %v1501_v61  ;;  %v1585_v46 = vmul.f32 1.442695, %v1502_v3  ;;  %v4641_v37 = vpop.eup %2982  ;;  %3000 = vpow2.f32 %v1603_v63  ;;  %v1449_v63 = vpop.xlane.xlu0 %1448  ;;  %v1619_v39 = vmul.f32 1.442695, %v1519_v55 }
 0x2a9   :  { %v1422_v36 = vpop.xlane.xlu1 %1421  ;;  %1960 = vmatpush1.bf16.xpose.msra.mxu0 %v5487_v42  ;;  %v4647_v25 = vpop.eup %2984  ;;  %v1693_v60 = vadd.f32 %v4641_v37, %v4635_v47  ;;  %v5494_v55 = vld [vmem:[#allocation60_spill] sm:$0xff] }
 0x2aa   :  { %3002 = vpow2.f32 %v1583_v14  ;;  %v1505_v61 = vsub.f32 %v5488_v58, %v1422_v36  ;;  %v1506_v52 = vsub.f32 %v5489_v19, %v1422_v36  ;;  %1961 = vmatprep.subr.bf16.mxu0 %v1930_v35  ;;  %v4653_v3 = vpop.eup %2986  ;;  %v1613_v14 = vmul.f32 1.442695, %v1516_v43  ;;  %v5491_v35 = vld [vmem:[#allocation50_spill] sm:$0xff] }
 0x2ab   :  { %3004 = vpow2.f32 %v1585_v46  ;;  %1694 = vadd.xlane.f32.xlu0 %v1693_v60  ;;  %1475 = vmax.xlane.f32.xlu1 %v5490_v16  ;;  %v1520_v36 = vsub.f32 %v5491_v35, %v1443_v1  ;;  %v5493_v43 = vmax.f32 %v4030_v38, %v4036_v18 }
 0x2ac   :  { %v4655_v26 = vpop.eup %2988  ;;  %v1591_v6 = vmul.f32 1.442695, %v1505_v61  ;;  %v1593_v56 = vmul.f32 1.442695, %v1506_v52  ;;  %3006 = vpow2.f32 %v1605_v2  ;;  %v1523_v52 = vsub.f32 %v5494_v55, %v1449_v63 }
 0x2ad   :  { %v4660_v34 = vpop.eup %2990  ;;  %v1428_v7 = vpop.xlane.xlu1 %1427  ;;  %3008 = vpow2.f32 %v1611_v20 }
 0x2ae   :  { %v4663_v46 = vpop.eup %2992  ;;  %3010 = vpow2.f32 %v1591_v6  ;;  %v1696_v42 = vadd.f32 %v4660_v34, %v4655_v26  ;;  %v1509_v58 = vsub.f32 %v5342_v12, %v1428_v7  ;;  %v1510_v61 = vsub.f32 %v4020_v30, %v1428_v7  ;;  %v5495_v6 = vld [vmem:[#allocation63_spill] sm:$0xff] }
 0x2af   :  { %5492 = vst [vmem:[#allocation43_spill] sm:$0xff] %v4663_v46  ;;  %v4669_v19 = vpop.eup %2994  ;;  %3012 = vpow2.f32 %v1593_v56  ;;  %1478 = vmax.xlane.f32.xlu0 %v5493_v43  ;;  %v1621_v30 = vmul.f32 1.442695, %v1520_v36  ;;  %v1524_v16 = vsub.f32 %v5495_v6, %v1449_v63  ;;  %v1455_v56 = vpop.xlane.xlu0 %1454  ;;  %v1705_v36 = vadd.f32 %v4653_v3, %v4647_v25 }
 0x2b0   :  { %v4671_v2 = vpop.eup %2996  ;;  %1697 = vadd.xlane.f32.xlu1 %v1696_v42  ;;  %v1599_v1 = vmul.f32 1.442695, %v1509_v58  ;;  %v1601_v20 = vmul.f32 1.442695, %v1510_v61  ;;  %3014 = vpow2.f32 %v1613_v14  ;;  %v5498_v58 = vld [vmem:[#allocation72_spill] sm:$0xff] }
 0x2b1   :  { %v4677_v60 = vpop.eup %2998  ;;  %v1434_v12 = vpop.xlane.xlu1 %1433  ;;  %3016 = vpow2.f32 %v1619_v39  ;;  %1962 = vmatpush1.bf16.xpose.msra.mxu0 %v1929_v45  ;;  %v1627_v39 = vmul.f32 1.442695, %v1523_v52  ;;  %v1629_v43 = vmul.f32 1.442695, %v1524_v16 }
 0x2b2   :  { %3018 = vpow2.f32 %v1599_v1  ;;  %v1699_v7 = vadd.f32 %v4677_v60, %v4671_v2  ;;  %v1513_v14 = vsub.f32 %v4042_v27, %v1434_v12  ;;  %v1514_v35 = vsub.f32 %v4046_v41, %v1434_v12  ;;  %v4687_v42 = vpop.eup %3000  ;;  %v5499_v1 = vld [vmem:[#allocation74_spill] sm:$0xff] }
 0x2b3   :  { %5496 = vst [vmem:[#allocation92_spill] sm:$0xff] %v4687_v42  ;;  %3020 = vpow2.f32 %v1601_v20  ;;  %v1527_v27 = vsub.f32 %v5498_v58, %v1455_v56  ;;  %v1528_v20 = vsub.f32 %v5499_v1, %v1455_v56  ;;  %v5501_v58 = vld [vmem:[#allocation53_spill] sm:$0xff]  ;;  %v5502_v1 = vld [vmem:[#allocation56_spill] sm:$0xff] }
 0x2b4   :  { %v4691_v63 = vpop.eup %3002  ;;  %1700 = vadd.xlane.f32.xlu0 %v1699_v7  ;;  %1481 = vmax.xlane.f32.xlu1 %v5497_v11  ;;  %v1607_v53 = vmul.f32 1.442695, %v1513_v14  ;;  %v1609_v45 = vmul.f32 1.442695, %v1514_v35  ;;  %3022 = vpow2.f32 %v1621_v30  ;;  %v1711_v14 = vadd.f32 %v4669_v19, %v4663_v46 }
 0x2b5   :  { %v4697_v61 = vpop.eup %3004  ;;  %v1440_v41 = vpop.xlane.xlu1 %1439  ;;  %v1635_v35 = vmul.f32 1.442695, %v1527_v27 }
 0x2b6   :  { %v4700_v55 = vpop.eup %3006  ;;  %v1702_v12 = vadd.f32 %v4697_v61, %v4691_v63  ;;  %3024 = vpow2.f32 %v1607_v53  ;;  %v1517_v6 = vsub.f32 %v5349_v0, %v1440_v41  ;;  %v1518_v7 = vsub.f32 %v5348_v13, %v1440_v41 }
 0x2b7   :  { %v4706_v52 = vpop.eup %3008  ;;  %3026 = vpow2.f32 %v1609_v45  ;;  %v1637_v0 = vmul.f32 1.442695, %v1528_v20 }
 0x2b8   :  { %5500 = vst [vmem:[#allocation95_spill] sm:$0xff] %v4706_v52  ;;  %v4710_v30 = vpop.eup %3010  ;;  %1703 = vadd.xlane.f32.xlu1 %v1702_v12  ;;  %1706 = vadd.xlane.f32.xlu0 %v1705_v36  ;;  %v1615_v16 = vmul.f32 1.442695, %v1517_v6  ;;  %v1617_v56 = vmul.f32 1.442695, %v1518_v7  ;;  %3028 = vpow2.f32 %v1627_v39 }
 0x2b9   :  { %v4712_v11 = vpop.eup %3012  ;;  %v1446_v53 = vpop.xlane.xlu1 %1445  ;;  %3030 = vpow2.f32 %v1629_v43  ;;  %v1717_v43 = vadd.f32 %v4700_v55, %v4687_v42 }
 0x2ba   :  { %v4714_v13 = vpop.eup %3014  ;;  %v1708_v45 = vadd.f32 %v4712_v11, %v4710_v30  ;;  %3032 = vpow2.f32 %v1615_v16  ;;  %v1521_v41 = vsub.f32 %v5501_v58, %v1446_v53  ;;  %v1522_v12 = vsub.f32 %v5502_v1, %v1446_v53  ;;  %v5504_v53 = vld [vmem:[#allocation66_spill] sm:$0xff]  ;;  %v5505_v58 = vld [vmem:[#allocation69_spill] sm:$0xff] }
 0x2bb   :  { %v4720_v36 = vpop.eup %3016  ;;  %3034 = vpow2.f32 %v1617_v56 }
 0x2bc   :  { %5503 = vst [vmem:[#allocation77_spill] sm:$0xff] %v4720_v36  ;;  %v4722_v39 = vpop.eup %3018  ;;  %1709 = vadd.xlane.f32.xlu1 %v1708_v45  ;;  %v1623_v27 = vmul.f32 1.442695, %v1521_v41  ;;  %v1625_v6 = vmul.f32 1.442695, %v1522_v12  ;;  %1712 = vadd.xlane.f32.xlu0 %v1711_v14  ;;  %3036 = vpow2.f32 %v1635_v35 }
 0x2bd   :  { %v4726_v20 = vpop.eup %3020  ;;  %v1452_v7 = vpop.xlane.xlu1 %1451  ;;  %3038 = vpow2.f32 %v1637_v0  ;;  %v1723_v0 = vadd.f32 %v4714_v13, %v4706_v52 }
 0x2be   :  { %3040 = vpow2.f32 %v1623_v27  ;;  %v1714_v16 = vadd.f32 %v4726_v20, %v4722_v39  ;;  %v1525_v56 = vsub.f32 %v5504_v53, %v1452_v7  ;;  %v1526_v1 = vsub.f32 %v5505_v58, %v1452_v7  ;;  %v4732_v45 = vpop.eup %3022  ;;  %v5508_v53 = vld [vmem:[#allocation76_spill] sm:$0xff]  ;;  %v5509_v58 = vld [vmem:[#allocation14_spill] sm:$0xff] }
 0x2bf   :  { %5506 = vst [vmem:[#allocation19_spill] sm:$0xff] %v4732_v45  ;;  %3042 = vpow2.f32 %v1625_v6  ;;  %v1729_v52 = vadd.f32 %v4732_v45, %v4720_v36 }
 0x2c0   :  { %v4734_v14 = vpop.eup %3024  ;;  %1715 = vadd.xlane.f32.xlu1 %v1714_v16  ;;  %v1631_v35 = vmul.f32 1.442695, %v1525_v56  ;;  %v1633_v41 = vmul.f32 1.442695, %v1526_v1  ;;  %1718 = vadd.xlane.f32.xlu0 %v1717_v43 }
 0x2c1   :  { %v4738_v12 = vpop.eup %3026  ;;  %v1458_v27 = vpop.xlane.xlu1 %1457 }
 0x2c2   :  { %v4740_v42 = vpop.eup %3028  ;;  %3044 = vpow2.f32 %v1631_v35  ;;  %v1529_v7 = vsub.f32 %v5508_v53, %v1458_v27  ;;  %v1530_v46 = vsub.f32 %v5509_v58, %v1458_v27  ;;  %v1720_v6 = vadd.f32 %v4738_v12, %v4734_v14 }
 0x2c3   :  { %5507 = vst [vmem:[#allocation13_spill] sm:$0xff] %v4740_v42  ;;  %v4746_v16 = vpop.eup %3030  ;;  %3046 = vpow2.f32 %v1633_v41 }
 0x2c4   :  { %5510 = vst [vmem:[#allocation15_spill] sm:$0xff] %v4746_v16  ;;  %v4748_v43 = vpop.eup %3032  ;;  %v1639_v56 = vmul.f32 1.442695, %v1529_v7  ;;  %v1641_v1 = vmul.f32 1.442695, %v1530_v46  ;;  %1721 = vadd.xlane.f32.xlu1 %v1720_v6  ;;  %1724 = vadd.xlane.f32.xlu0 %v1723_v0  ;;  %v1735_v46 = vadd.f32 %v4746_v16, %v4740_v42 }
 0x2c5   :  { %v4752_v35 = vpop.eup %3034 }
 0x2c6   :  { %v4754_v53 = vpop.eup %3036  ;;  %3048 = vpow2.f32 %v1639_v56  ;;  %v1726_v27 = vadd.f32 %v4752_v35, %v4748_v43 }
 0x2c7   :  { %5511 = vst [vmem:[#allocation106_spill] sm:$0xff] %v4754_v53  ;;  %v4758_v58 = vpop.eup %3038  ;;  %3050 = vpow2.f32 %v1641_v1 }
 0x2c8   :  { %5512 = vst [vmem:[#allocation29_spill] sm:$0xff] %v4758_v58  ;;  %v4760_v41 = vpop.eup %3040  ;;  %1727 = vadd.xlane.f32.xlu1 %v1726_v27  ;;  %1730 = vadd.xlane.f32.xlu0 %v1729_v52  ;;  %v1741_v56 = vadd.f32 %v4758_v58, %v4754_v53 }
 0x2c9   :  { %5513 = vst [vmem:[#allocation58_spill] sm:$0xff] %v4760_v41  ;;  %v4764_v0 = vpop.eup %3042 }
 0x2ca   :  { %v1732_v7 = vadd.f32 %v4764_v0, %v4760_v41 }
 0x2cc   :  { %v4768_v6 = vpop.eup %3044  ;;  %1733 = vadd.xlane.f32.xlu1 %v1732_v7  ;;  %1736 = vadd.xlane.f32.xlu0 %v1735_v46 }
 0x2cd   :  { %5514 = vst [vmem:[#allocation30_spill] sm:$0xff] %v4768_v6  ;;  %v4772_v1 = vpop.eup %3046 }
 0x2ce   :  { %5515 = vst [vmem:[#allocation41_spill] sm:$0xff] %v4772_v1  ;;  %v1738_v52 = vadd.f32 %v4772_v1, %v4768_v6 }
 0x2d0   :  { %v4776_v27 = vpop.eup %3048  ;;  %1739 = vadd.xlane.f32.xlu1 %v1738_v52  ;;  %1742 = vadd.xlane.f32.xlu0 %v1741_v56 }
 0x2d1   :  { %5516 = vst [vmem:[#allocation39_spill] sm:$0xff] %v4776_v27  ;;  %v4778_v42 = vpop.eup %3050 }
 0x2d2   :  { %v1744_v16 = vadd.f32 %v4778_v42, %v4776_v27 }
 0x2d4   :  { %1745 = vadd.xlane.f32.xlu1 %v1744_v16 }
 0x30e   :  { %v1677_v7 = vpop.xlane.xlu0 %1676 }
 0x30f   :  { %3052 = vrcp.f32 %v1677_v7 }
 0x310   :  { %v1680_v46 = vpop.xlane.xlu1 %1679 }
 0x311   :  { %3054 = vrcp.f32 %v1680_v46 }
 0x312   :  { %v1461_v53 = vpop.xlane.xlu0 %1460 }
 0x313   :  { %v1531_v58 = vsub.f32 %v5398_v50, %v1461_v53  ;;  %v1532_v36 = vsub.f32 %v5397_v62, %v1461_v53 }
 0x314   :  { %v1464_v6 = vpop.xlane.xlu1 %1463 }
 0x315   :  { %v1643_v1 = vmul.f32 1.442695, %v1531_v58  ;;  %v1645_v41 = vmul.f32 1.442695, %v1532_v36  ;;  %v1533_v56 = vsub.f32 %v5400_v10, %v1464_v6  ;;  %v1534_v52 = vsub.f32 %v5448_v48, %v1464_v6 }
 0x317   :  { %3056 = vpow2.f32 %v1643_v1  ;;  %v1647_v45 = vmul.f32 1.442695, %v1533_v56  ;;  %v1649_v27 = vmul.f32 1.442695, %v1534_v52 }
 0x318   :  { %3058 = vpow2.f32 %v1645_v41 }
 0x319   :  { %v3053_v16 = vpop.eup %3052  ;;  %3060 = vpow2.f32 %v1647_v45 }
 0x31a   :  { %3062 = vpow2.f32 %v1649_v27  ;;  %v1803_v46 = vmul.f32 %v3053_v16, %v4528_v8  ;;  %v1804_v62 = vmul.f32 %v3053_v16, %v4530_v49 }
 0x31b   :  { %v3055_v7 = vpop.eup %3054 }
 0x31c   :  { %v1805_v50 = vmul.f32 %v3055_v7, %v4532_v44  ;;  %v1806_v36 = vmul.f32 %v3055_v7, %v4536_v21 }
 0x31e   :  { %v1868_v53 = vpack.c.bf16 %v1806_v36, %v1804_v62  ;;  %v1867_v10 = vpack.c.bf16 %v1805_v50, %v1803_v46 }
 0x320   :  { %1963 = vmatprep.mubr.bf16.mxu0 %v1868_v53 }
 0x321   :  { %v4790_v48 = vpop.eup %3056  ;;  %1964 = vmatmul.mubr.bf16.vlgmr.msra.gmra.mrb[96].mxu0 %v1867_v10 }
 0x322   :  { %v4792_v58 = vpop.eup %3058 }
 0x323   :  { %v4794_v41 = vpop.eup %3060  ;;  %v1747_v45 = vadd.f32 %v4792_v58, %v4790_v48 }
 0x324   :  { %v4798_v8 = vpop.eup %3062 }
 0x325   :  { %1748 = vadd.xlane.f32.xlu0 %v1747_v45  ;;  %v1750_v49 = vadd.f32 %v4798_v8, %v4794_v41  ;;  %v1683_v44 = vpop.xlane.xlu0 %1682 }
 0x326   :  { %3064 = vrcp.f32 %v1683_v44 }
 0x327   :  { %1751 = vadd.xlane.f32.xlu1 %v1750_v49 }
 0x32a   :  { %v1686_v21 = vpop.xlane.xlu1 %1685  ;;  %v1467_v6 = vpop.xlane.xlu0 %1466 }
 0x32b   :  { %3066 = vrcp.f32 %v1686_v21  ;;  %v1535_v1 = vsub.f32 %v5402_v57, %v1467_v6  ;;  %v1536_v27 = vsub.f32 %v5472_v5, %v1467_v6 }
 0x32d   :  { %v1651_v56 = vmul.f32 1.442695, %v1535_v1  ;;  %v1653_v52 = vmul.f32 1.442695, %v1536_v27 }
 0x32e   :  { %v1470_v16 = vpop.xlane.xlu1 %1469 }
 0x32f   :  { %v1689_v7 = vpop.xlane.xlu0 %1688  ;;  %3068 = vpow2.f32 %v1651_v56  ;;  %v1537_v46 = vsub.f32 %v5404_v31, %v1470_v16  ;;  %v1538_v50 = vsub.f32 %v5403_v40, %v1470_v16 }
 0x330   :  { %3070 = vpow2.f32 %v1653_v52  ;;  %v3065_v45 = vpop.eup %3064 }
 0x331   :  { %v1655_v62 = vmul.f32 1.442695, %v1537_v46  ;;  %v1657_v36 = vmul.f32 1.442695, %v1538_v50  ;;  %3072 = vrcp.f32 %v1689_v7  ;;  %v1808_v40 = vmul.f32 %v3065_v45, %v4575_v23 }
 0x332   :  { %v1807_v27 = vmul.f32 %v3065_v45, %v4572_v51 }
 0x333   :  { %3074 = vpow2.f32 %v1655_v62 }
 0x334   :  { %v1692_v53 = vpop.xlane.xlu1 %1691  ;;  %v1473_v10 = vpop.xlane.xlu0 %1472  ;;  %3076 = vpow2.f32 %v1657_v36 }
 0x335   :  { %v1539_v57 = vsub.f32 %v5406_v33, %v1473_v10  ;;  %v1540_v5 = vsub.f32 %v5483_v28, %v1473_v10  ;;  %v3067_v49 = vpop.eup %3066  ;;  %3078 = vrcp.f32 %v1692_v53 }
 0x336   :  { %v1810_v1 = vmul.f32 %v3067_v49, %v4591_v15  ;;  %v1809_v56 = vmul.f32 %v3067_v49, %v4589_v32 }
 0x337   :  { %v1659_v44 = vmul.f32 1.442695, %v1539_v57  ;;  %v1661_v21 = vmul.f32 1.442695, %v1540_v5 }
 0x338   :  { %v1476_v31 = vpop.xlane.xlu1 %1475  ;;  %v1695_v6 = vpop.xlane.xlu0 %1694  ;;  %v1870_v52 = vpack.c.bf16 %v1810_v1, %v1808_v40  ;;  %v1869_v16 = vpack.c.bf16 %v1809_v56, %v1807_v27 }
 0x339   :  { %3080 = vpow2.f32 %v1659_v44  ;;  %v1541_v33 = vsub.f32 %v5408_v54, %v1476_v31  ;;  %v1542_v28 = vsub.f32 %v4022_v24, %v1476_v31  ;;  %v4814_v7 = vpop.eup %3068 }
 0x33a   :  { %3082 = vpow2.f32 %v1661_v21  ;;  %v4816_v62 = vpop.eup %3070  ;;  %1973 = vmatprep.mubr.bf16.mxu0 %v1870_v52 }
 0x33b   :  { %v1663_v46 = vmul.f32 1.442695, %v1541_v33  ;;  %v1665_v50 = vmul.f32 1.442695, %v1542_v28  ;;  %3084 = vrcp.f32 %v1695_v6  ;;  %v3073_v15 = vpop.eup %3072  ;;  %1974 = vmatmul.mubr.bf16.gmra.mrb[100].mxu0 %v1869_v16  ;;  %v1753_v24 = vadd.f32 %v4816_v62, %v4814_v7 }
 0x33c   :  { %v1479_v51 = vpop.xlane.xlu0 %1478  ;;  %v1812_v5 = vmul.f32 %v3073_v15, %v4609_v22  ;;  %v1811_v6 = vmul.f32 %v3073_v15, %v4602_v29 }
 0x33d   :  { %v1698_v23 = vpop.xlane.xlu1 %1697  ;;  %3086 = vpow2.f32 %v1663_v46  ;;  %v1543_v32 = vsub.f32 %v4030_v38, %v1479_v51  ;;  %v1544_v54 = vsub.f32 %v4036_v18, %v1479_v51  ;;  %v4822_v36 = vpop.eup %3074  ;;  %1754 = vadd.xlane.f32.xlu0 %v1753_v24 }
 0x33e   :  { %3088 = vpow2.f32 %v1665_v50  ;;  %v4824_v45 = vpop.eup %3076 }
 0x33f   :  { %3090 = vrcp.f32 %v1698_v23  ;;  %v1667_v53 = vmul.f32 1.442695, %v1543_v32  ;;  %v1669_v10 = vmul.f32 1.442695, %v1544_v54  ;;  %v3079_v49 = vpop.eup %3078  ;;  %v1756_v21 = vadd.f32 %v4824_v45, %v4822_v36 }
 0x340   :  { %v1814_v31 = vmul.f32 %v3079_v49, %v4628_v17  ;;  %v1813_v40 = vmul.f32 %v3079_v49, %v4622_v9 }
 0x341   :  { %v1482_v57 = vpop.xlane.xlu1 %1481  ;;  %3092 = vpow2.f32 %v1667_v53  ;;  %v1701_v44 = vpop.xlane.xlu0 %1700  ;;  %1757 = vadd.xlane.f32.xlu1 %v1756_v21 }
 0x342   :  { %v1545_v38 = vsub.f32 %v4044_v4, %v1482_v57  ;;  %v1546_v18 = vsub.f32 %v4048_v59, %v1482_v57  ;;  %3094 = vpow2.f32 %v1669_v10  ;;  %v1872_v59 = vpack.c.bf16 %v1814_v31, %v1812_v5 }
 0x343   :  { %v4834_v1 = vpop.eup %3080  ;;  %3096 = vrcp.f32 %v1701_v44  ;;  %v1871_v33 = vpack.c.bf16 %v1813_v40, %v1811_v6 }
 0x344   :  { %v1671_v22 = vmul.f32 1.442695, %v1545_v38  ;;  %v1673_v27 = vmul.f32 1.442695, %v1546_v18  ;;  %v4836_v56 = vpop.eup %3082  ;;  %1983 = vmatprep.mubr.bf16.mxu0 %v1872_v59 }
 0x345   :  { %v1704_v4 = vpop.xlane.xlu1 %1703  ;;  %v1759_v28 = vadd.f32 %v4836_v56, %v4834_v1  ;;  %v1707_v17 = vpop.xlane.xlu0 %1706  ;;  %1984 = vmatmul.mubr.bf16.gmra.mrb[104].mxu0 %v1871_v33 }
 0x346   :  { %3098 = vpow2.f32 %v1671_v22  ;;  %v3085_v52 = vpop.eup %3084 }
 0x347   :  { %3100 = vpow2.f32 %v1673_v27  ;;  %v4840_v29 = vpop.eup %3086  ;;  %1760 = vadd.xlane.f32.xlu0 %v1759_v28  ;;  %v1816_v51 = vmul.f32 %v3085_v52, %v4641_v37  ;;  %v1815_v32 = vmul.f32 %v3085_v52, %v4635_v47 }
 0x348   :  { %3102 = vrcp.f32 %v1704_v4  ;;  %v4842_v9 = vpop.eup %3088 }
 0x349   :  { %3104 = vrcp.f32 %v1707_v17  ;;  %v1710_v16 = vpop.xlane.xlu1 %1709  ;;  %v3091_v46 = vpop.eup %3090  ;;  %v1762_v50 = vadd.f32 %v4842_v9, %v4840_v29 }
 0x34a   :  { %3106 = vrcp.f32 %v1710_v16  ;;  %v1713_v23 = vpop.xlane.xlu0 %1712  ;;  %v1818_v15 = vmul.f32 %v3091_v46, %v4660_v34  ;;  %v1817_v54 = vmul.f32 %v3091_v46, %v4655_v26 }
 0x34b   :  { %v4850_v24 = vpop.eup %3092  ;;  %1763 = vadd.xlane.f32.xlu1 %v1762_v50  ;;  %3108 = vrcp.f32 %v1713_v23 }
 0x34c   :  { %v4852_v53 = vpop.eup %3094  ;;  %v1874_v10 = vpack.c.bf16 %v1818_v15, %v1816_v51  ;;  %v1873_v57 = vpack.c.bf16 %v1817_v54, %v1815_v32  ;;  %v5517_v54 = vld [vmem:[#allocation43_spill] sm:$0xff] }
 0x34d   :  { %v1716_v5 = vpop.xlane.xlu1 %1715  ;;  %v1765_v49 = vadd.f32 %v4852_v53, %v4850_v24  ;;  %v3097_v37 = vpop.eup %3096 }
 0x34e   :  { %3110 = vrcp.f32 %v1716_v5  ;;  %1993 = vmatprep.mubr.bf16.mxu0 %v1874_v10  ;;  %v1820_v21 = vmul.f32 %v3097_v37, %v4677_v60  ;;  %v1819_v6 = vmul.f32 %v3097_v37, %v4671_v2  ;;  %v1719_v22 = vpop.xlane.xlu0 %1718 }
 0x34f   :  { %1994 = vmatmul.mubr.bf16.gmra.mrb[108].mxu0 %v1873_v57  ;;  %1766 = vadd.xlane.f32.xlu0 %v1765_v49 }
 0x350   :  { %v4856_v34 = vpop.eup %3098 }
 0x351   :  { %v4858_v47 = vpop.eup %3100  ;;  %v1722_v26 = vpop.xlane.xlu1 %1721 }
 0x352   :  { %v3103_v38 = vpop.eup %3102  ;;  %v1768_v18 = vadd.f32 %v4858_v47, %v4856_v34  ;;  %3112 = vrcp.f32 %v1722_v26  ;;  %v1725_v16 = vpop.xlane.xlu0 %1724 }
 0x353   :  { %v3105_v44 = vpop.eup %3104  ;;  %v1822_v31 = vmul.f32 %v3103_v38, %v4697_v61  ;;  %v1821_v40 = vmul.f32 %v3103_v38, %v4691_v63  ;;  %3114 = vrcp.f32 %v1719_v22  ;;  %v5518_v38 = vld [vmem:[#allocation92_spill] sm:$0xff] }
 0x354   :  { %v3107_v27 = vpop.eup %3106  ;;  %1769 = vadd.xlane.f32.xlu1 %v1768_v18  ;;  %v1824_v33 = vmul.f32 %v3105_v44, %v4653_v3  ;;  %v1823_v50 = vmul.f32 %v3105_v44, %v4647_v25 }
 0x355   :  { %v1876_v4 = vpack.c.bf16 %v1822_v31, %v1820_v21  ;;  %v1875_v59 = vpack.c.bf16 %v1821_v40, %v1819_v6  ;;  %v1826_v28 = vmul.f32 %v3107_v27, %v4712_v11  ;;  %v3109_v17 = vpop.eup %3108  ;;  %v1728_v2 = vpop.xlane.xlu1 %1727  ;;  %v1825_v61 = vmul.f32 %v3107_v27, %v4710_v30 }
 0x356   :  { %v1828_v46 = vmul.f32 %v3109_v17, %v4669_v19  ;;  %3116 = vrcp.f32 %v1728_v2  ;;  %v1827_v10 = vmul.f32 %v3109_v17, %v5517_v54  ;;  %v1731_v19 = vpop.xlane.xlu0 %1730  ;;  %v5527_v54 = vld [vmem:[#allocation29_spill] sm:$0xff] }
 0x357   :  { %2003 = vmatprep.mubr.bf16.mxu0 %v1876_v4  ;;  %v1878_v60 = vpack.c.bf16 %v1826_v28, %v1824_v33  ;;  %3118 = vrcp.f32 %v1725_v16  ;;  %v1877_v23 = vpack.c.bf16 %v1825_v61, %v1823_v50  ;;  %v5523_v61 = vld [vmem:[#allocation77_spill] sm:$0xff] }
 0x358   :  { %v3111_v52 = vpop.eup %3110  ;;  %2004 = vmatmul.mubr.bf16.gmra.mrb[112].mxu0 %v1875_v59 }
 0x359   :  { %2013 = vmatprep.mubr.bf16.mxu0 %v1878_v60  ;;  %v1830_v63 = vmul.f32 %v3111_v52, %v4726_v20  ;;  %v1829_v32 = vmul.f32 %v3111_v52, %v4722_v39  ;;  %v1734_v20 = vpop.xlane.xlu1 %1733  ;;  %v5521_v52 = vld [vmem:[#allocation58_spill] sm:$0xff] }
 0x35a   :  { %3120 = vrcp.f32 %v1734_v20  ;;  %v1737_v18 = vpop.xlane.xlu0 %1736  ;;  %v5526_v20 = vld [vmem:[#allocation13_spill] sm:$0xff] }
 0x35b   :  { %v1880_v3 = vpack.c.bf16 %v1830_v63, %v1828_v46  ;;  %v1879_v5 = vpack.c.bf16 %v1829_v32, %v1827_v10  ;;  %3122 = vrcp.f32 %v1731_v19  ;;  %v5522_v63 = vld [vmem:[#allocation41_spill] sm:$0xff] }
 0x35c   :  { %v3113_v11 = vpop.eup %3112 }
 0x35d   :  { %v3115_v51 = vpop.eup %3114  ;;  %v1834_v15 = vmul.f32 %v3113_v11, %v4738_v12  ;;  %v1833_v12 = vmul.f32 %v3113_v11, %v4734_v14  ;;  %v1740_v26 = vpop.xlane.xlu1 %1739  ;;  %v5519_v14 = vld [vmem:[#allocation95_spill] sm:$0xff] }
 0x35e   :  { %v1832_v30 = vmul.f32 %v3115_v51, %v4700_v55  ;;  %v1831_v55 = vmul.f32 %v3115_v51, %v5518_v38  ;;  %3124 = vrcp.f32 %v1740_v26  ;;  %v1743_v4 = vpop.xlane.xlu0 %1742  ;;  %v5525_v51 = vld [vmem:[#allocation30_spill] sm:$0xff] }
 0x35f   :  { %3126 = vrcp.f32 %v1737_v18 }
 0x360   :  { %2014 = vmatmul.mubr.bf16.gmra.mrb[116].mxu0 %v1877_v23  ;;  %v1882_v57 = vpack.c.bf16 %v1834_v15, %v1832_v30  ;;  %v3117_v25 = vpop.eup %3116  ;;  %v1881_v21 = vpack.c.bf16 %v1833_v12, %v1831_v55 }
 0x361   :  { %2023 = vmatprep.mubr.bf16.mxu0 %v1880_v3  ;;  %v3119_v49 = vpop.eup %3118  ;;  %v1838_v37 = vmul.f32 %v3117_v25, %v4752_v35  ;;  %v1837_v40 = vmul.f32 %v3117_v25, %v4748_v43  ;;  %v1746_v22 = vpop.xlane.xlu1 %1745  ;;  %v5528_v25 = vld [vmem:[#allocation39_spill] sm:$0xff] }
 0x362   :  { %v1836_v39 = vmul.f32 %v3119_v49, %v4714_v13  ;;  %v1835_v27 = vmul.f32 %v3119_v49, %v5519_v14  ;;  %v5520_v13 = vld [vmem:[#allocation19_spill] sm:$0xff]  ;;  %3128 = vrcp.f32 %v1746_v22  ;;  %v5529_v49 = vld [vmem:[#allocation106_spill] sm:$0xff] }
 0x363   :  { %3130 = vrcp.f32 %v1743_v4 }
 0x364   :  { %v1884_v44 = vpack.c.bf16 %v1838_v37, %v1836_v39  ;;  %v3121_v31 = vpop.eup %3120  ;;  %v1883_v33 = vpack.c.bf16 %v1837_v40, %v1835_v27 }
 0x365   :  { %v3123_v6 = vpop.eup %3122  ;;  %v1842_v35 = vmul.f32 %v3121_v31, %v4764_v0  ;;  %v1841_v2 = vmul.f32 %v3121_v31, %v5521_v52  ;;  %v5524_v0 = vld [vmem:[#allocation15_spill] sm:$0xff] }
 0x366   :  { %v1840_v59 = vmul.f32 %v3123_v6, %v5520_v13  ;;  %v1839_v16 = vmul.f32 %v3123_v6, %v5523_v61 }
 0x368   :  { %2024 = vmatmul.mubr.bf16.gmra.mrb[120].mxu0 %v1879_v5  ;;  %v1886_v28 = vpack.c.bf16 %v1842_v35, %v1840_v59  ;;  %v3125_v17 = vpop.eup %3124  ;;  %v1885_v50 = vpack.c.bf16 %v1841_v2, %v1839_v16 }
 0x369   :  { %2033 = vmatprep.mubr.bf16.mxu0 %v1882_v57  ;;  %v3127_v60 = vpop.eup %3126  ;;  %v1846_v43 = vmul.f32 %v3125_v17, %v5522_v63  ;;  %v1845_v15 = vmul.f32 %v3125_v17, %v5525_v51  ;;  %v77_v51 = vld [vmem:[#allocation7 + $0x18] sm:$0xff] }
 0x36a   :  { %v1844_v46 = vmul.f32 %v3127_v60, %v5524_v0  ;;  %v1843_v30 = vmul.f32 %v3127_v60, %v5526_v20 }
 0x36c   :  { %v1888_v3 = vpack.c.bf16 %v1846_v43, %v1844_v46  ;;  %v3129_v11 = vpop.eup %3128  ;;  %v1887_v19 = vpack.c.bf16 %v1845_v15, %v1843_v30 }
 0x36d   :  { %v3131_v23 = vpop.eup %3130  ;;  %v1850_v32 = vmul.f32 %v3129_v11, %v4778_v42  ;;  %v1849_v5 = vmul.f32 %v3129_v11, %v5528_v25  ;;  %v75_v11 = vld [vmem:[#allocation7 + $0x8] sm:$0xff] }
 0x36e   :  { %v1848_v10 = vmul.f32 %v3131_v23, %v5527_v54  ;;  %v1847_v37 = vmul.f32 %v3131_v23, %v5529_v49  ;;  %v78_v54 = vld [vmem:[#allocation7 + $0x20] sm:$0xff] }
 0x370   :  { %2034 = vmatmul.mubr.bf16.gmra.mrb[124].mxu0 %v1881_v21  ;;  %v1890_v57 = vpack.c.bf16 %v1850_v32, %v1848_v10  ;;  %v1889_v12 = vpack.c.bf16 %v1849_v5, %v1847_v37  ;;  %v81_v5 = vld [vmem:[#allocation7 + $0x38] sm:$0xff] }
 0x371   :  { %2043 = vmatprep.mubr.bf16.mxu0 %v1884_v44 }
 0x378   :  { %2044 = vmatmul.mubr.bf16.gmra.mrb[128].mxu0 %v1883_v33 }
 0x379   :  { %2053 = vmatprep.mubr.bf16.mxu0 %v1886_v28 }
 0x380   :  { %2054 = vmatmul.mubr.bf16.gmra.mrb[132].mxu0 %v1885_v50 }
 0x381   :  { %2063 = vmatprep.mubr.bf16.mxu0 %v1888_v3  ;;  %v76_v3 = vld [vmem:[#allocation7 + $0x10] sm:$0xff] }
 0x388   :  { %2064 = vmatmul.mubr.bf16.gmra.mrb[136].mxu0 %v1887_v19  ;;  %v80_v19 = vld [vmem:[#allocation7 + $0x30] sm:$0xff] }
 0x389   :  { %2073 = vmatprep.mubr.bf16.mxu0 %v1890_v57  ;;  %v79_v57 = vld [vmem:[#allocation7 + $0x28] sm:$0xff] }
 0x390   :  { %2074 = vmatmul.mubr.bf16.gmra.mrb[140].mxu0 %v1889_v12 }
 0x3b2   :  { %v1749_v26 = vpop.xlane.xlu0 %1748 }
 0x3b3   :  { %3132 = vrcp.f32 %v1749_v26 }
 0x3b4   :  { %v1752_v39 = vpop.xlane.xlu1 %1751 }
 0x3b5   :  { %3134 = vrcp.f32 %v1752_v39 }
 0x3bd   :  { %v3133_v38 = vpop.eup %3132 }
 0x3be   :  { %v1852_v55 = vmul.f32 %v3133_v38, %v4792_v58  ;;  %v1851_v44 = vmul.f32 %v3133_v38, %v4790_v48 }
 0x3bf   :  { %v3135_v42 = vpop.eup %3134 }
 0x3c0   :  { %v1854_v18 = vmul.f32 %v3135_v42, %v4798_v8  ;;  %v1853_v21 = vmul.f32 %v3135_v42, %v4794_v41 }
 0x3c2   :  { %v1892_v31 = vpack.c.bf16 %v1854_v18, %v1852_v55  ;;  %v1891_v6 = vpack.c.bf16 %v1853_v21, %v1851_v44  ;;  %v82_v18 = vld [vmem:[#allocation7 + $0x40] sm:$0xff]  ;;  %v84_v21 = vld [vmem:[#allocation7 + $0x50] sm:$0xff] }
 0x3c4   :  { %2083 = vmatprep.mubr.bf16.mxu0 %v1892_v31  ;;  %v83_v31 = vld [vmem:[#allocation7 + $0x48] sm:$0xff] }
 0x3c5   :  { %2084 = vmatmul.mubr.bf16.gmra.mrb[144].mxu0 %v1891_v6 }
 0x3ca   :  { %v1755_v40 = vpop.xlane.xlu0 %1754 }
 0x3cb   :  { %3136 = vrcp.f32 %v1755_v40  ;;  %v85_v40 = vld [vmem:[#allocation7 + $0x58] sm:$0xff] }
 0x3ce   :  { %v1758_v22 = vpop.xlane.xlu1 %1757 }
 0x3cf   :  { %3138 = vrcp.f32 %v1758_v22 }
 0x3d4   :  { %v1761_v35 = vpop.xlane.xlu0 %1760 }
 0x3d5   :  { %3140 = vrcp.f32 %v1761_v35  ;;  %v3137_v27 = vpop.eup %3136 }
 0x3d6   :  { %v1856_v8 = vmul.f32 %v3137_v27, %v4816_v62  ;;  %v1855_v41 = vmul.f32 %v3137_v27, %v4814_v7 }
 0x3d8   :  { %v1764_v14 = vpop.xlane.xlu1 %1763 }
 0x3d9   :  { %3142 = vrcp.f32 %v1764_v14  ;;  %v3139_v58 = vpop.eup %3138 }
 0x3da   :  { %v1858_v48 = vmul.f32 %v3139_v58, %v4824_v45  ;;  %v1857_v13 = vmul.f32 %v3139_v58, %v4822_v36 }
 0x3dc   :  { %v1767_v4 = vpop.xlane.xlu0 %1766  ;;  %v1894_v59 = vpack.c.bf16 %v1858_v48, %v1856_v8  ;;  %v1893_v33 = vpack.c.bf16 %v1857_v13, %v1855_v41  ;;  %v86_v41 = vld [vmem:[#allocation7 + $0x60] sm:$0xff] }
 0x3dd   :  { %3144 = vrcp.f32 %v1767_v4 }
 0x3de   :  { %2093 = vmatprep.mubr.bf16.mxu0 %v1894_v59  ;;  %v88_v59 = vld [vmem:[#allocation7 + $0x70] sm:$0xff] }
 0x3df   :  { %v3141_v17 = vpop.eup %3140  ;;  %2094 = vmatmul.mubr.bf16.gmra.mrb[148].mxu0 %v1893_v33  ;;  %v87_v33 = vld [vmem:[#allocation7 + $0x68] sm:$0xff] }
 0x3e0   :  { %v1860_v52 = vmul.f32 %v3141_v17, %v4836_v56  ;;  %v1859_v62 = vmul.f32 %v3141_v17, %v4834_v1  ;;  %v5530_v1 = vmov 0   ;;  %v89_v17 = vld [vmem:[#allocation7 + $0x78] sm:$0xff] }
 0x3e1   :  { %v1770_v28 = vpop.xlane.xlu1 %1769 }
 0x3e2   :  { %3146 = vrcp.f32 %v1770_v28 }
 0x3e3   :  { %v3143_v60 = vpop.eup %3142 }
 0x3e4   :  { %v1862_v2 = vmul.f32 %v3143_v60, %v4842_v9  ;;  %v1861_v45 = vmul.f32 %v3143_v60, %v4840_v29  ;;  %v74_v29 = vld [vmem:[#allocation7] sm:$0xff] }
 0x3e6   :  { %v1896_v7 = vpack.c.bf16 %v1862_v2, %v1860_v52  ;;  %v1895_v63 = vpack.c.bf16 %v1861_v45, %v1859_v62 }
 0x3e7   :  { %v3145_v36 = vpop.eup %3144 }
 0x3e8   :  { %2103 = vmatprep.mubr.bf16.mxu0 %v1896_v7  ;;  %v1864_v61 = vmul.f32 %v3145_v36, %v4852_v53  ;;  %v1863_v0 = vmul.f32 %v3145_v36, %v4850_v24 }
 0x3e9   :  { %2104 = vmatmul.mubr.bf16.gmra.mrb[152].mxu0 %v1895_v63 }
 0x3ec   :  { %v3147_v43 = vpop.eup %3146 }
 0x3ed   :  { %v1866_v16 = vmul.f32 %v3147_v43, %v4858_v47  ;;  %v1865_v56 = vmul.f32 %v3147_v43, %v4856_v34  ;;  %v90_v43 = vld [vmem:[#allocation7 + $0x80] sm:$0xff] }
 0x3ef   :  { %v1898_v46 = vpack.c.bf16 %v1866_v16, %v1864_v61  ;;  %v1897_v9 = vpack.c.bf16 %v1865_v56, %v1863_v0  ;;  %v92_v16 = vld [vmem:[#allocation7 + $0x90] sm:$0xff]  ;;  %v91_v0 = vld [vmem:[#allocation7 + $0x88] sm:$0xff] }
 0x3f1   :  { %2113 = vmatprep.mubr.bf16.mxu0 %v1898_v46  ;;  %v93_v46 = vld [vmem:[#allocation7 + $0x98] sm:$0xff] }
 0x3f2   :  { %2114 = vmatmul.mubr.bf16.gmra.mrb[156].mxu0 %v1897_v9 }
 0x3f3   :  { %2562 = vmatprep.mubr.bf16.mxu0 %v5530_v1 }
 0x3f4   :  { %v1965_v50 = vpop.f32.mrb[96].mxu0 }
 0x3f5   :  { %v1967_v23 = vpop.f32.mrb[97].mxu0  ;;  %v2124_v53 = vmul.f32 %v1965_v50, %v74_v29 }
 0x3f6   :  { %v1969_v15 = vpop.f32.mrb[98].mxu0  ;;  %v4911_v20 = vmul.f32 %v1967_v23, %v75_v11 }
 0x3f7   :  { %v2126_v32 = vmul.f32 %v1969_v15, %v76_v3  ;;  %v1971_v47 = vpop.f32.mrb[99].mxu0 }
 0x3f8   :  { %v4913_v24 = vmul.f32 %v1971_v47, %v77_v51  ;;  %v96_v47 = vld [vmem:[#allocation7 + $0xb0] sm:$0xff] }
 0x3f9   :  { %v2188_v34 = vpack.c.bf16 %v2126_v32, %v2124_v53  ;;  %v94_v53 = vld [vmem:[#allocation7 + $0xa0] sm:$0xff] }
 0x3fa   :  { %v2189_v30 = vpack.c.bf16 %v4913_v24, %v4911_v20  ;;  %v113_v24 = vld [vmem:[#allocation7 + $0x138] sm:$0xff] }
 0x3fb   :  { %2252 = vxpose.xlu1.c.b16.start [1/8] %v2188_v34, 128  ;;  %v95_v34 = vld [vmem:[#allocation7 + $0xa8] sm:$0xff] }
 0x40e   :  { %v1975_v10 = vpop.f32.mrb[100].mxu0 }
 0x40f   :  { %v1977_v25 = vpop.f32.mrb[101].mxu0  ;;  %v2128_v37 = vmul.f32 %v1975_v10, %v78_v54  ;;  %v97_v10 = vld [vmem:[#allocation7 + $0xb8] sm:$0xff] }
 0x410   :  { %v1979_v49 = vpop.f32.mrb[102].mxu0  ;;  %v4917_v39 = vmul.f32 %v1977_v25, %v79_v57 }
 0x411   :  { %v2130_v12 = vmul.f32 %v1979_v49, %v80_v19  ;;  %v1981_v26 = vpop.f32.mrb[103].mxu0 }
 0x412   :  { %v4919_v38 = vmul.f32 %v1981_v26, %v81_v5 }
 0x413   :  { %v2190_v42 = vpack.c.bf16 %v2130_v12, %v2128_v37 }
 0x414   :  { %v2191_v55 = vpack.c.bf16 %v4919_v38, %v4917_v39 }
 0x415   :  { %2253 = vxpose.xlu1.c.b16.cont [2/8] %v2190_v42, 128  ;;  %v98_v42 = vld [vmem:[#allocation7 + $0xc0] sm:$0xff] }
 0x418   :  { %v1985_v44 = vpop.f32.mrb[104].mxu0 }
 0x419   :  { %v1987_v6 = vpop.f32.mrb[105].mxu0  ;;  %v2132_v35 = vmul.f32 %v1985_v44, %v82_v18  ;;  %v100_v44 = vld [vmem:[#allocation7 + $0xd0] sm:$0xff] }
 0x41a   :  { %v1989_v22 = vpop.f32.mrb[106].mxu0  ;;  %v4923_v58 = vmul.f32 %v1987_v6, %v83_v31  ;;  %v101_v6 = vld [vmem:[#allocation7 + $0xd8] sm:$0xff] }
 0x41b   :  { %v2134_v14 = vmul.f32 %v1989_v22, %v84_v21  ;;  %v1991_v27 = vpop.f32.mrb[107].mxu0  ;;  %v99_v21 = vld [vmem:[#allocation7 + $0xc8] sm:$0xff] }
 0x41c   :  { %v4925_v4 = vmul.f32 %v1991_v27, %v85_v40 }
 0x41d   :  { %v2192_v8 = vpack.c.bf16 %v2134_v14, %v2132_v35 }
 0x41e   :  { %v2193_v48 = vpack.c.bf16 %v4925_v4, %v4923_v58  ;;  %v117_v4 = vld [vmem:[#allocation7 + $0x158] sm:$0xff] }
 0x41f   :  { %2254 = vxpose.xlu1.c.b16.cont [3/8] %v2192_v8, 128 }
 0x422   :  { %v1995_v13 = vpop.f32.mrb[108].mxu0 }
 0x423   :  { %v1997_v28 = vpop.f32.mrb[109].mxu0  ;;  %v2136_v52 = vmul.f32 %v1995_v13, %v86_v41 }
 0x424   :  { %v1999_v60 = vpop.f32.mrb[110].mxu0  ;;  %v4929_v45 = vmul.f32 %v1997_v28, %v87_v33  ;;  %v104_v28 = vld [vmem:[#allocation7 + $0xf0] sm:$0xff] }
 0x425   :  { %v2138_v2 = vmul.f32 %v1999_v60, %v88_v59  ;;  %v2001_v62 = vpop.f32.mrb[111].mxu0  ;;  %v102_v59 = vld [vmem:[#allocation7 + $0xe0] sm:$0xff] }
 0x426   :  { %v4931_v7 = vmul.f32 %v2001_v62, %v89_v17  ;;  %v103_v17 = vld [vmem:[#allocation7 + $0xe8] sm:$0xff] }
 0x427   :  { %v2194_v63 = vpack.c.bf16 %v2138_v2, %v2136_v52  ;;  %v105_v52 = vld [vmem:[#allocation7 + $0xf8] sm:$0xff] }
 0x428   :  { %v2195_v36 = vpack.c.bf16 %v4931_v7, %v4929_v45 }
 0x429   :  { %2255 = vxpose.xlu1.c.b16.cont [4/8] %v2194_v63, 128 }
 0x42b   :  { %v2005_v61 = vpop.f32.mrb[112].mxu0 }
 0x42c   :  { %v2007_v56 = vpop.f32.mrb[113].mxu0  ;;  %v2140_v29 = vmul.f32 %v2005_v61, %v90_v43 }
 0x42d   :  { %v2009_v9 = vpop.f32.mrb[114].mxu0  ;;  %v4935_v11 = vmul.f32 %v2007_v56, %v91_v0 }
 0x42e   :  { %v2142_v50 = vmul.f32 %v2009_v9, %v92_v16  ;;  %v2011_v3 = vpop.f32.mrb[115].mxu0 }
 0x42f   :  { %v4937_v23 = vmul.f32 %v2011_v3, %v93_v46  ;;  %v106_v46 = vld [vmem:[#allocation7 + $0x100] sm:$0xff] }
 0x430   :  { %v2196_v51 = vpack.c.bf16 %v2142_v50, %v2140_v29  ;;  %v108_v29 = vld [vmem:[#allocation7 + $0x110] sm:$0xff]  ;;  %v107_v50 = vld [vmem:[#allocation7 + $0x108] sm:$0xff] }
 0x431   :  { %v2197_v15 = vpack.c.bf16 %v4937_v23, %v4935_v11  ;;  %v121_v23 = vld [vmem:[#allocation7 + $0x178] sm:$0xff] }
 0x432   :  { %2256 = vxpose.xlu1.c.b16.cont [5/8] %v2196_v51, 128  ;;  %v109_v51 = vld [vmem:[#allocation7 + $0x118] sm:$0xff] }
 0x433   :  { %v2015_v32 = vpop.f32.mrb[116].mxu0 }
 0x434   :  { %v2017_v54 = vpop.f32.mrb[117].mxu0  ;;  %v2144_v57 = vmul.f32 %v2015_v32, %v94_v53 }
 0x435   :  { %v2019_v19 = vpop.f32.mrb[118].mxu0  ;;  %v4941_v49 = vmul.f32 %v2017_v54, %v95_v34 }
 0x436   :  { %v2146_v25 = vmul.f32 %v2019_v19, %v96_v47  ;;  %v2021_v5 = vpop.f32.mrb[119].mxu0 }
 0x437   :  { %v4943_v37 = vmul.f32 %v2021_v5, %v97_v10 }
 0x438   :  { %v2198_v12 = vpack.c.bf16 %v2146_v25, %v2144_v57  ;;  %v110_v25 = vld [vmem:[#allocation7 + $0x120] sm:$0xff] }
 0x439   :  { %v2199_v26 = vpack.c.bf16 %v4943_v37, %v4941_v49 }
 0x43a   :  { %2257 = vxpose.xlu1.c.b16.cont [6/8] %v2198_v12, 128  ;;  %v112_v12 = vld [vmem:[#allocation7 + $0x130] sm:$0xff] }
 0x43b   :  { %v2025_v18 = vpop.f32.mrb[120].mxu0 }
 0x43c   :  { %v2027_v31 = vpop.f32.mrb[121].mxu0  ;;  %v2148_v22 = vmul.f32 %v2025_v18, %v98_v42  ;;  %v111_v42 = vld [vmem:[#allocation7 + $0x128] sm:$0xff] }
 0x43d   :  { %v2029_v40 = vpop.f32.mrb[122].mxu0  ;;  %v4947_v27 = vmul.f32 %v2027_v31, %v99_v21 }
 0x43e   :  { %v2150_v35 = vmul.f32 %v2029_v40, %v100_v44  ;;  %v2031_v14 = vpop.f32.mrb[123].mxu0 }
 0x43f   :  { %v4949_v8 = vmul.f32 %v2031_v14, %v101_v6 }
 0x440   :  { %v2200_v41 = vpack.c.bf16 %v2150_v35, %v2148_v22  ;;  %v116_v22 = vld [vmem:[#allocation7 + $0x150] sm:$0xff]  ;;  %v115_v35 = vld [vmem:[#allocation7 + $0x148] sm:$0xff] }
 0x441   :  { %v2201_v13 = vpack.c.bf16 %v4949_v8, %v4947_v27  ;;  %v124_v27 = vld [vmem:[#allocation7 + $0x190] sm:$0xff]  ;;  %v123_v8 = vld [vmem:[#allocation7 + $0x188] sm:$0xff] }
 0x442   :  { %2258 = vxpose.xlu1.c.b16.cont [7/8] %v2200_v41, 128 }
 0x443   :  { %v2035_v33 = vpop.f32.mrb[124].mxu0 }
 0x444   :  { %v2037_v60 = vpop.f32.mrb[125].mxu0  ;;  %v2152_v62 = vmul.f32 %v2035_v33, %v102_v59 }
 0x445   :  { %v2039_v2 = vpop.f32.mrb[126].mxu0  ;;  %v4953_v61 = vmul.f32 %v2037_v60, %v103_v17  ;;  %v120_v60 = vld [vmem:[#allocation7 + $0x170] sm:$0xff] }
 0x446   :  { %v2154_v63 = vmul.f32 %v2039_v2, %v104_v28  ;;  %v2041_v43 = vpop.f32.mrb[127].mxu0 }
 0x447   :  { %v4955_v16 = vmul.f32 %v2041_v43, %v105_v52  ;;  %v119_v52 = vld [vmem:[#allocation7 + $0x168] sm:$0xff] }
 0x448   :  { %v2202_v0 = vpack.c.bf16 %v2154_v63, %v2152_v62 }
 0x449   :  { %v2203_v56 = vpack.c.bf16 %v4955_v16, %v4953_v61  ;;  %v126_v61 = vld [vmem:[#allocation7 + $0x1a0] sm:$0xff] }
 0x44a   :  { %2259 = vxpose.xlu1.c.b16.end [8/8] %v2202_v0, 128 }
 0x44b   :  { %v2045_v9 = vpop.f32.mrb[128].mxu0 }
 0x44c   :  { %v2047_v3 = vpop.f32.mrb[129].mxu0  ;;  %v2156_v32 = vmul.f32 %v2045_v9, %v106_v46  ;;  %v125_v9 = vld [vmem:[#allocation7 + $0x198] sm:$0xff] }
 0x44d   :  { %v2049_v53 = vpop.f32.mrb[130].mxu0  ;;  %v4962_v54 = vmul.f32 %v2047_v3, %v107_v50 }
 0x44e   :  { %v2158_v47 = vmul.f32 %v2049_v53, %v108_v29  ;;  %2268 = vxpose.xlu1.c.b16.start [1/8] %v2189_v30, 128  ;;  %v2051_v34 = vpop.f32.mrb[131].mxu0 }
 0x44f   :  { %v4964_v10 = vmul.f32 %v2051_v34, %v109_v51 }
 0x450   :  { %v2204_v19 = vpack.c.bf16 %v2158_v47, %v2156_v32 }
 0x451   :  { %v2205_v57 = vpack.c.bf16 %v4964_v10, %v4962_v54 }
 0x452   :  { %2269 = vxpose.xlu1.c.b16.cont [2/8] %v2191_v55, 128  ;;  %2284 = vxpose.xlu0.c.b16.start [1/8] %v2204_v19, 128  ;;  %v114_v55 = vld [vmem:[#allocation7 + $0x140] sm:$0xff]  ;;  %v127_v19 = vld [vmem:[#allocation7 + $0x1a8] sm:$0xff] }
 0x453   :  { %v2055_v5 = vpop.f32.mrb[132].mxu0 }
 0x454   :  { %v2057_v20 = vpop.f32.mrb[133].mxu0  ;;  %v2160_v18 = vmul.f32 %v2055_v5, %v110_v25  ;;  %v129_v5 = vld [vmem:[#allocation7 + $0x1b8] sm:$0xff] }
 0x455   :  { %v2059_v30 = vpop.f32.mrb[134].mxu0  ;;  %v4974_v31 = vmul.f32 %v2057_v20, %v111_v42 }
 0x456   :  { %v2162_v44 = vmul.f32 %v2059_v30, %v112_v12  ;;  %2270 = vxpose.xlu1.c.b16.cont [3/8] %v2193_v48, 128  ;;  %v2061_v21 = vpop.f32.mrb[135].mxu0 }
 0x457   :  { %v4976_v6 = vmul.f32 %v2061_v21, %v113_v24 }
 0x458   :  { %v2206_v39 = vpack.c.bf16 %v2162_v44, %v2160_v18 }
 0x459   :  { %v2207_v38 = vpack.c.bf16 %v4976_v6, %v4974_v31 }
 0x45a   :  { %2271 = vxpose.xlu1.c.b16.cont [4/8] %v2195_v36, 128  ;;  %2285 = vxpose.xlu0.c.b16.cont [2/8] %v2206_v39, 128  ;;  %v118_v36 = vld [vmem:[#allocation7 + $0x160] sm:$0xff] }
 0x45b   :  { %v2065_v40 = vpop.f32.mrb[136].mxu0  ;;  %v130_v39 = vld [vmem:[#allocation7 + $0x1c0] sm:$0xff] }
 0x45c   :  { %v2067_v58 = vpop.f32.mrb[137].mxu0  ;;  %v2164_v14 = vmul.f32 %v2065_v40, %v114_v55  ;;  %v132_v40 = vld [vmem:[#allocation7 + $0x1d0] sm:$0xff] }
 0x45d   :  { %v2069_v48 = vpop.f32.mrb[138].mxu0  ;;  %v4986_v33 = vmul.f32 %v2067_v58, %v115_v35  ;;  %v133_v58 = vld [vmem:[#allocation7 + $0x1d8] sm:$0xff] }
 0x45e   :  { %v2166_v41 = vmul.f32 %v2069_v48, %v116_v22  ;;  %2272 = vxpose.xlu1.c.b16.cont [5/8] %v2197_v15, 128  ;;  %v2071_v59 = vpop.f32.mrb[139].mxu0  ;;  %v131_v22 = vld [vmem:[#allocation7 + $0x1c8] sm:$0xff] }
 0x45f   :  { %v4988_v28 = vmul.f32 %v2071_v59, %v117_v4 }
 0x460   :  { %v2208_v45 = vpack.c.bf16 %v2166_v41, %v2164_v14 }
 0x461   :  { %v2209_v7 = vpack.c.bf16 %v4988_v28, %v4986_v33 }
 0x462   :  { %2273 = vxpose.xlu1.c.b16.cont [6/8] %v2199_v26, 128  ;;  %2286 = vxpose.xlu0.c.b16.cont [3/8] %v2208_v45, 128  ;;  %v122_v26 = vld [vmem:[#allocation7 + $0x180] sm:$0xff] }
 0x463   :  { %v2075_v17 = vpop.f32.mrb[140].mxu0 }
 0x464   :  { %v2077_v11 = vpop.f32.mrb[141].mxu0  ;;  %v2168_v2 = vmul.f32 %v2075_v17, %v118_v36 }
 0x465   :  { %v2079_v15 = vpop.f32.mrb[142].mxu0  ;;  %v4998_v43 = vmul.f32 %v2077_v11, %v119_v52  ;;  %v136_v11 = vld [vmem:[#allocation7 + $0x1f0] sm:$0xff] }
 0x466   :  { %v2170_v62 = vmul.f32 %v2079_v15, %v120_v60  ;;  %2274 = vxpose.xlu1.c.b16.cont [7/8] %v2201_v13, 128  ;;  %v2081_v63 = vpop.f32.mrb[143].mxu0  ;;  %v134_v60 = vld [vmem:[#allocation7 + $0x1e0] sm:$0xff] }
 0x467   :  { %v5000_v0 = vmul.f32 %v2081_v63, %v121_v23  ;;  %v135_v23 = vld [vmem:[#allocation7 + $0x1e8] sm:$0xff] }
 0x468   :  { %v2210_v49 = vpack.c.bf16 %v2170_v62, %v2168_v2  ;;  %v137_v2 = vld [vmem:[#allocation7 + $0x1f8] sm:$0xff] }
 0x469   :  { %v2211_v37 = vpack.c.bf16 %v5000_v0, %v4998_v43 }
 0x46a   :  { %2275 = vxpose.xlu1.c.b16.end [8/8] %v2203_v56, 128  ;;  %2287 = vxpose.xlu0.c.b16.cont [4/8] %v2210_v49, 128  ;;  %v128_v56 = vld [vmem:[#allocation7 + $0x1b0] sm:$0xff] }
 0x46e   :  { %2795 = vset.pattern.permute.xlu1 %v5530_v1 }
 0x494   :  { %v2260_v54 = vpop.trf.xlu1 }
 0x498   :  { %v2085_v46 = vpop.f32.mrb[144].mxu0  ;;  %v2261_v31 = vpop.trf.xlu1 }
 0x499   :  { %v2087_v13 = vpop.f32.mrb[145].mxu0  ;;  %v2172_v50 = vmul.f32 %v2085_v46, %v122_v26 }
 0x49a   :  { %v2089_v29 = vpop.f32.mrb[146].mxu0  ;;  %v2173_v53 = vmul.f32 %v2087_v13, %v123_v8 }
 0x49b   :  { %v2174_v3 = vmul.f32 %v2089_v29, %v124_v27  ;;  %v2091_v51 = vpop.f32.mrb[147].mxu0 }
 0x49c   :  { %v2175_v32 = vmul.f32 %v2091_v51, %v125_v9 }
 0x49d   :  { %v2212_v47 = vpack.c.bf16 %v2174_v3, %v2172_v50 }
 0x49e   :  { %v2213_v34 = vpack.c.bf16 %v2175_v32, %v2173_v53 }
 0x49f   :  { %2288 = vxpose.xlu0.c.b16.cont [5/8] %v2212_v47, 128 }
 0x4b2   :  { %v2095_v16 = vpop.f32.mrb[148].mxu0 }
 0x4b3   :  { %v2097_v25 = vpop.f32.mrb[149].mxu0  ;;  %v2176_v42 = vmul.f32 %v2095_v16, %v126_v61 }
 0x4b4   :  { %v2099_v12 = vpop.f32.mrb[150].mxu0  ;;  %v2177_v30 = vmul.f32 %v2097_v25, %v127_v19 }
 0x4b5   :  { %v2178_v20 = vmul.f32 %v2099_v12, %v128_v56  ;;  %v2101_v24 = vpop.f32.mrb[151].mxu0 }
 0x4b6   :  { %v2179_v18 = vmul.f32 %v2101_v24, %v129_v5 }
 0x4b7   :  { %v2214_v44 = vpack.c.bf16 %v2178_v20, %v2176_v42 }
 0x4b8   :  { %v2215_v21 = vpack.c.bf16 %v2179_v18, %v2177_v30 }
 0x4b9   :  { %2289 = vxpose.xlu0.c.b16.cont [6/8] %v2214_v44, 128 }
 0x4bc   :  { %v2105_v55 = vpop.f32.mrb[152].mxu0 }
 0x4bd   :  { %v2107_v35 = vpop.f32.mrb[153].mxu0  ;;  %v2180_v48 = vmul.f32 %v2105_v55, %v130_v39  ;;  %v72_v39 = vld [vmem:[%s5053_s3] sm:$0xff] }
 0x4be   :  { %v2109_v4 = vpop.f32.mrb[154].mxu0  ;;  %v2181_v59 = vmul.f32 %v2107_v35, %v131_v22  ;;  %v73_v55 = vld [vmem:[%s5054_s4] sm:$0xff] }
 0x4bf   :  { %v2182_v14 = vmul.f32 %v2109_v4, %v132_v40  ;;  %v2111_v41 = vpop.f32.mrb[155].mxu0  ;;  %2612 = vperm.xlu1 %2795, %v73_v55  }
 0x4c0   :  { %v2183_v45 = vmul.f32 %v2111_v41, %v133_v58 }
 0x4c1   :  { %v2216_v36 = vpack.c.bf16 %v2182_v14, %v2180_v48 }
 0x4c2   :  { %v2217_v17 = vpack.c.bf16 %v2183_v45, %v2181_v59 }
 0x4c3   :  { %2290 = vxpose.xlu0.c.b16.cont [7/8] %v2216_v36, 128 }
 0x4c5   :  { %v2115_v52 = vpop.f32.mrb[156].mxu0 }
 0x4c6   :  { %v2117_v15 = vpop.f32.mrb[157].mxu0  ;;  %v2184_v63 = vmul.f32 %v2115_v52, %v134_v60 }
 0x4c7   :  { %v2119_v62 = vpop.f32.mrb[158].mxu0  ;;  %v2185_v46 = vmul.f32 %v2117_v15, %v135_v23 }
 0x4c8   :  { %v2186_v49 = vmul.f32 %v2119_v62, %v136_v11  ;;  %v2121_v26 = vpop.f32.mrb[159].mxu0 }
 0x4c9   :  { %v2187_v27 = vmul.f32 %v2121_v26, %v137_v2 }
 0x4ca   :  { %v2218_v8 = vpack.c.bf16 %v2186_v49, %v2184_v63 }
 0x4cb   :  { %v2219_v13 = vpack.c.bf16 %v2187_v27, %v2185_v46 }
 0x4cc   :  { %2291 = vxpose.xlu0.c.b16.end [8/8] %v2218_v8, 128 }
 0x4d0   :  { %2300 = vxpose.xlu0.c.b16.start [1/8] %v2205_v57, 128 }
 0x4d4   :  { %2301 = vxpose.xlu0.c.b16.cont [2/8] %v2207_v38, 128  ;;  %v2262_v38 = vpop.trf.xlu1 }
 0x4d8   :  { %2302 = vxpose.xlu0.c.b16.cont [3/8] %v2209_v7, 128  ;;  %v2263_v28 = vpop.trf.xlu1 }
 0x4dc   :  { %2303 = vxpose.xlu0.c.b16.cont [4/8] %v2211_v37, 128  ;;  %v2264_v43 = vpop.trf.xlu1 }
 0x4e0   :  { %2304 = vxpose.xlu0.c.b16.cont [5/8] %v2213_v34, 128  ;;  %v2265_v37 = vpop.trf.xlu1 }
 0x4e4   :  { %2305 = vxpose.xlu0.c.b16.cont [6/8] %v2215_v21, 128  ;;  %v2266_v29 = vpop.trf.xlu1 }
 0x4e8   :  { %2306 = vxpose.xlu0.c.b16.cont [7/8] %v2217_v17, 128  ;;  %v2267_v3 = vpop.trf.xlu1 }
 0x4ec   :  { %2307 = vxpose.xlu0.c.b16.end [8/8] %v2219_v13, 128  ;;  %v2276_v53 = vpop.trf.xlu1 }
 0x4f0   :  { %v2277_v47 = vpop.trf.xlu1 }
 0x4f4   :  { %v2278_v61 = vpop.trf.xlu1 }
 0x4f5   :  { %2794 = vset.pattern.permute.xlu0 %v5530_v1 }
 0x4f6   :  { %2527 = vperm.xlu0 %2794, %v72_v39  }
 0x4f8   :  { %v2279_v56 = vpop.trf.xlu1 }
 0x4fc   :  { %v2280_v25 = vpop.trf.xlu1 }
 0x500   :  { %v2281_v12 = vpop.trf.xlu1 }
 0x504   :  { %v2282_v20 = vpop.trf.xlu1 }
 0x508   :  { %v2283_v30 = vpop.trf.xlu1 }
 0x516   :  { %v2292_v10 = vpop.trf.xlu0 }
 0x517   :  { %2348 = vmatprep.mubr.bf16.mxu1 %v2292_v10 }
 0x518   :  { %2349 = vmatmul.mubr.bf16.vlgmr.msra.gmra.mrb[96].mxu1 %v2260_v54 }
 0x51a   :  { %v2293_v57 = vpop.trf.xlu0 }
 0x51b   :  { %2358 = vmatprep.mubr.bf16.mxu1 %v2293_v57 }
 0x51e   :  { %v2294_v6 = vpop.trf.xlu0 }
 0x520   :  { %2359 = vmatmul.mubr.bf16.gmra.mrb[100].mxu1 %v2261_v31 }
 0x521   :  { %2368 = vmatprep.mubr.bf16.mxu1 %v2294_v6 }
 0x522   :  { %v2295_v33 = vpop.trf.xlu0 }
 0x526   :  { %v2296_v7 = vpop.trf.xlu0 }
 0x528   :  { %2369 = vmatmul.mubr.bf16.gmra.mrb[104].mxu1 %v2262_v38 }
 0x529   :  { %2378 = vmatprep.mubr.bf16.mxu1 %v2295_v33 }
 0x52a   :  { %v2297_v0 = vpop.trf.xlu0 }
 0x52e   :  { %v2298_v9 = vpop.trf.xlu0 }
 0x530   :  { %2379 = vmatmul.mubr.bf16.gmra.mrb[108].mxu1 %v2263_v28 }
 0x531   :  { %2388 = vmatprep.mubr.bf16.mxu1 %v2296_v7 }
 0x532   :  { %v2299_v50 = vpop.trf.xlu0 }
 0x536   :  { %v2308_v51 = vpop.trf.xlu0 }
 0x538   :  { %2389 = vmatmul.mubr.bf16.gmra.mrb[112].mxu1 %v2264_v43 }
 0x539   :  { %2398 = vmatprep.mubr.bf16.mxu1 %v2297_v0 }
 0x53a   :  { %v2309_v32 = vpop.trf.xlu0 }
 0x53e   :  { %v2310_v34 = vpop.trf.xlu0 }
 0x540   :  { %2399 = vmatmul.mubr.bf16.gmra.mrb[116].mxu1 %v2265_v37 }
 0x541   :  { %2408 = vmatprep.mubr.bf16.mxu1 %v2298_v9 }
 0x542   :  { %v2311_v16 = vpop.trf.xlu0 }
 0x546   :  { %v2312_v19 = vpop.trf.xlu0 }
 0x548   :  { %2409 = vmatmul.mubr.bf16.gmra.mrb[120].mxu1 %v2266_v29 }
 0x549   :  { %2418 = vmatprep.mubr.bf16.mxu1 %v2299_v50 }
 0x54a   :  { %v2313_v5 = vpop.trf.xlu0 }
 0x54e   :  { %v2314_v42 = vpop.trf.xlu0 }
 0x550   :  { %2419 = vmatmul.mubr.bf16.gmra.mrb[124].mxu1 %v2267_v3 }
 0x551   :  { %2428 = vmatprep.mubr.bf16.mxu1 %v2308_v51 }
 0x552   :  { %v2315_v24 = vpop.trf.xlu0 }
 0x558   :  { %2429 = vmatmul.mubr.bf16.gmra.mrb[128].mxu1 %v2276_v53  ;;  %v70_v53 = vld [vmem:[%s5052_s2] sm:$0xff]  ;;  %s3256_s2 = smov [#allocation8]  }
 0x559   :  { %2438 = vmatprep.mubr.bf16.mxu1 %v2309_v32  ;;  %s2724_s12 = sshll.u32 %s3256_s2, 4  ;;  %s2725_s12 = int_to_ptr.vmem [resolvable:$true] %s2724_s12 }
 0x55a   :  { %s3222_s13 = scalar_lea.vmem %s2725_s12, 512  ;;  %p3227_p11 = scmp.lt.s32.totalorder %s2725_s12, %s2725_s12 }
 0x55b   :  { %p3223_p10 = scmp.ne.s32.totalorder %s2725_s12, %s3222_s13  ;;  %p3228_p12 = scmp.lt.s32.totalorder %s3222_s13, %s3222_s13 }
 0x55d   :  { %p3229_p13 = por %p3228_p12, %p3227_p11 }
 0x55f   :  { %p3230_p0 = pnand %p3229_p13, %p3223_p10 }
 0x560   :  { %2439 = vmatmul.mubr.bf16.gmra.mrb[132].mxu1 %v2277_v47  ;;  %v5031_v47 = vpack.c.bf16 %v70_v53, %v70_v53 }
 0x561   :  { %2448 = vmatprep.mubr.bf16.mxu1 %v2310_v34 }
 0x568   :  { %2449 = vmatmul.mubr.bf16.gmra.mrb[136].mxu1 %v2278_v61 }
 0x569   :  { %2458 = vmatprep.mubr.bf16.mxu1 %v2311_v16 }
 0x570   :  { %2459 = vmatmul.mubr.bf16.gmra.mrb[140].mxu1 %v2279_v56 }
 0x571   :  { %2468 = vmatprep.mubr.bf16.mxu1 %v2312_v19 }
 0x578   :  { %2469 = vmatmul.mubr.bf16.gmra.mrb[144].mxu1 %v2280_v25 }
 0x579   :  { %2478 = vmatprep.mubr.bf16.mxu1 %v2313_v5 }
 0x580   :  { %2479 = vmatmul.mubr.bf16.gmra.mrb[148].mxu1 %v2281_v12 }
 0x581   :  { %2488 = vmatprep.mubr.bf16.mxu1 %v2314_v42 }
 0x588   :  { %2489 = vmatmul.mubr.bf16.gmra.mrb[152].mxu1 %v2282_v20 }
 0x589   :  { %2498 = vmatprep.mubr.bf16.mxu1 %v2315_v24 }
 0x590   :  { %2499 = vmatmul.mubr.bf16.gmra.mrb[156].mxu1 %v2283_v30 }
 0x591   :  { %2667 = vmatprep.mubr.bf16.mxu1 %v5530_v1 }
 0x5eb   :  { %v2350_v18 = vpop.f32.mrb[96].mxu1 }
 0x5ec   :  { %v2352_v44 = vpop.f32.mrb[97].mxu1 }
 0x5ed   :  { %v2354_v21 = vpop.f32.mrb[98].mxu1 }
 0x5ee   :  { %v2509_v40 = vpack.c.bf16 %v2354_v21, %v2350_v18  ;;  %v2356_v22 = vpop.f32.mrb[99].mxu1 }
 0x5ef   :  { %v2510_v35 = vpack.c.bf16 %v2356_v22, %v2352_v44 }
 0x5f1   :  { %2530 = vmatprep.subr.bf16.mxu0 %v2510_v35 }
 0x5f2   :  { %2531 = vmatpush1.bf16.msra.mxu0 %v2509_v40 }
 0x5f3   :  { %v2360_v58 = vpop.f32.mrb[100].mxu1 }
 0x5f4   :  { %v2362_v1 = vpop.f32.mrb[101].mxu1 }
 0x5f5   :  { %v2364_v4 = vpop.f32.mrb[102].mxu1 }
 0x5f6   :  { %v2511_v48 = vpack.c.bf16 %v2364_v4, %v2360_v58  ;;  %v2366_v14 = vpop.f32.mrb[103].mxu1 }
 0x5f7   :  { %v2512_v41 = vpack.c.bf16 %v2366_v14, %v2362_v1 }
 0x5f9   :  { %2532 = vmatprep.subr.bf16.mxu0 %v2512_v41 }
 0x5fa   :  { %2533 = vmatpush1.bf16.msra.mxu0 %v2511_v48 }
 0x5fb   :  { %v2370_v59 = vpop.f32.mrb[104].mxu1 }
 0x5fc   :  { %v2372_v45 = vpop.f32.mrb[105].mxu1 }
 0x5fd   :  { %v2374_v36 = vpop.f32.mrb[106].mxu1 }
 0x5fe   :  { %v2513_v17 = vpack.c.bf16 %v2374_v36, %v2370_v59  ;;  %v2376_v60 = vpop.f32.mrb[107].mxu1 }
 0x5ff   :  { %v2514_v52 = vpack.c.bf16 %v2376_v60, %v2372_v45 }
 0x601   :  { %2534 = vmatprep.subr.bf16.mxu0 %v2514_v52 }
 0x602   :  { %2535 = vmatpush1.bf16.msra.mxu0 %v2513_v17 }
 0x603   :  { %v2380_v11 = vpop.f32.mrb[108].mxu1 }
 0x604   :  { %v2382_v23 = vpop.f32.mrb[109].mxu1 }
 0x605   :  { %v2384_v15 = vpop.f32.mrb[110].mxu1 }
 0x606   :  { %v2515_v2 = vpack.c.bf16 %v2384_v15, %v2380_v11  ;;  %v2386_v62 = vpop.f32.mrb[111].mxu1 }
 0x607   :  { %v2516_v63 = vpack.c.bf16 %v2386_v62, %v2382_v23 }
 0x609   :  { %2536 = vmatprep.subr.bf16.mxu0 %v2516_v63 }
 0x60a   :  { %2537 = vmatpush1.bf16.msra.mxu0 %v2515_v2 }
 0x60b   :  { %v2390_v49 = vpop.f32.mrb[112].mxu1 }
 0x60c   :  { %v2392_v26 = vpop.f32.mrb[113].mxu1 }
 0x60d   :  { %v2394_v46 = vpop.f32.mrb[114].mxu1 }
 0x60e   :  { %v2517_v27 = vpack.c.bf16 %v2394_v46, %v2390_v49  ;;  %v2396_v8 = vpop.f32.mrb[115].mxu1 }
 0x60f   :  { %v2518_v13 = vpack.c.bf16 %v2396_v8, %v2392_v26 }
 0x611   :  { %2538 = vmatprep.subr.bf16.mxu0 %v2518_v13 }
 0x612   :  { %2539 = vmatpush1.bf16.msra.mxu0 %v2517_v27 }
 0x613   :  { %v2400_v54 = vpop.f32.mrb[116].mxu1 }
 0x614   :  { %v2402_v10 = vpop.f32.mrb[117].mxu1 }
 0x615   :  { %v2404_v57 = vpop.f32.mrb[118].mxu1 }
 0x616   :  { %v2519_v31 = vpack.c.bf16 %v2404_v57, %v2400_v54  ;;  %v2406_v6 = vpop.f32.mrb[119].mxu1 }
 0x617   :  { %v2520_v38 = vpack.c.bf16 %v2406_v6, %v2402_v10  ;;  %v2528_v6 = vpop.permute.xlu0 %2527 }
 0x619   :  { %2540 = vmatprep.subr.bf16.mxu0 %v2520_v38 }
 0x61a   :  { %2541 = vmatpush1.bf16.msra.mxu0 %v2519_v31 }
 0x61b   :  { %v2410_v33 = vpop.f32.mrb[120].mxu1 }
 0x61c   :  { %v2412_v28 = vpop.f32.mrb[121].mxu1 }
 0x61d   :  { %v2414_v7 = vpop.f32.mrb[122].mxu1 }
 0x61e   :  { %v2521_v43 = vpack.c.bf16 %v2414_v7, %v2410_v33  ;;  %v2416_v0 = vpop.f32.mrb[123].mxu1 }
 0x61f   :  { %v2522_v37 = vpack.c.bf16 %v2416_v0, %v2412_v28 }
 0x621   :  { %2542 = vmatprep.subr.bf16.mxu0 %v2522_v37 }
 0x622   :  { %2543 = vmatpush1.bf16.msra.mxu0 %v2521_v43 }
 0x623   :  { %v2420_v9 = vpop.f32.mrb[124].mxu1 }
 0x624   :  { %v2422_v29 = vpop.f32.mrb[125].mxu1 }
 0x625   :  { %v2424_v50 = vpop.f32.mrb[126].mxu1 }
 0x626   :  { %v2523_v3 = vpack.c.bf16 %v2424_v50, %v2420_v9  ;;  %v2426_v51 = vpop.f32.mrb[127].mxu1 }
 0x627   :  { %v2524_v32 = vpack.c.bf16 %v2426_v51, %v2422_v29 }
 0x629   :  { %2544 = vmatprep.subr.bf16.mxu0 %v2524_v32 }
 0x62a   :  { %2545 = vmatpush1.bf16.msra.mxu0 %v2523_v3 }
 0x62b   :  { %v2430_v34 = vpop.f32.mrb[128].mxu1 }
 0x62c   :  { %v2432_v61 = vpop.f32.mrb[129].mxu1 }
 0x62d   :  { %v2434_v16 = vpop.f32.mrb[130].mxu1  ;;  %2563 = vmatmul.mubr.bf16.vlgmr.msra.gmra.mrb[160].mxu0 %v5031_v47 }
 0x62e   :  { %v2619_v56 = vpack.c.bf16 %v2434_v16, %v2430_v34  ;;  %v2436_v19 = vpop.f32.mrb[131].mxu1 }
 0x62f   :  { %v2620_v25 = vpack.c.bf16 %v2436_v19, %v2432_v61 }
 0x631   :  { %2635 = vmatprep.subr.bf16.mxu1 %v2620_v25 }
 0x632   :  { %2636 = vmatpush1.bf16.msra.mxu1 %v2619_v56 }
 0x633   :  { %v2440_v5 = vpop.f32.mrb[132].mxu1 }
 0x634   :  { %v2442_v12 = vpop.f32.mrb[133].mxu1 }
 0x635   :  { %v2444_v42 = vpop.f32.mrb[134].mxu1 }
 0x636   :  { %v2621_v20 = vpack.c.bf16 %v2444_v42, %v2440_v5  ;;  %v2446_v24 = vpop.f32.mrb[135].mxu1 }
 0x637   :  { %v2622_v30 = vpack.c.bf16 %v2446_v24, %v2442_v12 }
 0x639   :  { %2637 = vmatprep.subr.bf16.mxu1 %v2622_v30 }
 0x63a   :  { %2638 = vmatpush1.bf16.msra.mxu1 %v2621_v20 }
 0x63b   :  { %v2450_v18 = vpop.f32.mrb[136].mxu1 }
 0x63c   :  { %v2452_v44 = vpop.f32.mrb[137].mxu1 }
 0x63d   :  { %v2454_v21 = vpop.f32.mrb[138].mxu1 }
 0x63e   :  { %v2623_v39 = vpack.c.bf16 %v2454_v21, %v2450_v18  ;;  %v2456_v55 = vpop.f32.mrb[139].mxu1 }
 0x63f   :  { %v2624_v40 = vpack.c.bf16 %v2456_v55, %v2452_v44 }
 0x641   :  { %2639 = vmatprep.subr.bf16.mxu1 %v2624_v40 }
 0x642   :  { %2640 = vmatpush1.bf16.msra.mxu1 %v2623_v39 }
 0x643   :  { %v2460_v22 = vpop.f32.mrb[140].mxu1 }
 0x644   :  { %v2462_v35 = vpop.f32.mrb[141].mxu1 }
 0x645   :  { %v2464_v58 = vpop.f32.mrb[142].mxu1 }
 0x646   :  { %v2625_v1 = vpack.c.bf16 %v2464_v58, %v2460_v22  ;;  %v2466_v4 = vpop.f32.mrb[143].mxu1 }
 0x647   :  { %v2626_v48 = vpack.c.bf16 %v2466_v4, %v2462_v35 }
 0x649   :  { %2641 = vmatprep.subr.bf16.mxu1 %v2626_v48 }
 0x64a   :  { %2642 = vmatpush1.bf16.msra.mxu1 %v2625_v1 }
 0x64b   :  { %v2470_v14 = vpop.f32.mrb[144].mxu1 }
 0x64c   :  { %v2472_v41 = vpop.f32.mrb[145].mxu1 }
 0x64d   :  { %v2474_v59 = vpop.f32.mrb[146].mxu1 }
 0x64e   :  { %v2627_v45 = vpack.c.bf16 %v2474_v59, %v2470_v14  ;;  %v2476_v36 = vpop.f32.mrb[147].mxu1  ;;  %v2613_v59 = vpop.permute.xlu1 %2612 }
 0x64f   :  { %v2628_v17 = vpack.c.bf16 %v2476_v36, %v2472_v41 }
 0x651   :  { %2643 = vmatprep.subr.bf16.mxu1 %v2628_v17 }
 0x652   :  { %2644 = vmatpush1.bf16.msra.mxu1 %v2627_v45 }
 0x653   :  { %v2480_v60 = vpop.f32.mrb[148].mxu1 }
 0x654   :  { %v2482_v52 = vpop.f32.mrb[149].mxu1 }
 0x655   :  { %v2484_v11 = vpop.f32.mrb[150].mxu1 }
 0x656   :  { %v2629_v23 = vpack.c.bf16 %v2484_v11, %v2480_v60  ;;  %v2486_v15 = vpop.f32.mrb[151].mxu1 }
 0x657   :  { %v2630_v2 = vpack.c.bf16 %v2486_v15, %v2482_v52 }
 0x659   :  { %2645 = vmatprep.subr.bf16.mxu1 %v2630_v2 }
 0x65a   :  { %2646 = vmatpush1.bf16.msra.mxu1 %v2629_v23 }
 0x65b   :  { %v2490_v62 = vpop.f32.mrb[152].mxu1 }
 0x65c   :  { %v2492_v63 = vpop.f32.mrb[153].mxu1 }
 0x65d   :  { %v2494_v49 = vpop.f32.mrb[154].mxu1 }
 0x65e   :  { %v2631_v26 = vpack.c.bf16 %v2494_v49, %v2490_v62  ;;  %v2496_v46 = vpop.f32.mrb[155].mxu1 }
 0x65f   :  { %v2632_v27 = vpack.c.bf16 %v2496_v46, %v2492_v63 }
 0x661   :  { %2647 = vmatprep.subr.bf16.mxu1 %v2632_v27 }
 0x662   :  { %2648 = vmatpush1.bf16.msra.mxu1 %v2631_v26 }
 0x663   :  { %v2500_v8 = vpop.f32.mrb[156].mxu1 }
 0x664   :  { %v2502_v13 = vpop.f32.mrb[157].mxu1 }
 0x665   :  { %v2504_v54 = vpop.f32.mrb[158].mxu1 }
 0x666   :  { %v2633_v10 = vpack.c.bf16 %v2504_v54, %v2500_v8  ;;  %v2506_v57 = vpop.f32.mrb[159].mxu1 }
 0x667   :  { %v2634_v31 = vpack.c.bf16 %v2506_v57, %v2502_v13 }
 0x669   :  { %2649 = vmatprep.subr.bf16.mxu1 %v2634_v31 }
 0x66a   :  { %2650 = vmatpush1.bf16.msra.mxu1 %v2633_v10 }
 0x66d   :  { %2668 = vmatmul.mubr.bf16.vlgmr.msra.gmra.mrb[160].mxu1 %v5031_v47 }
 0x700   :  { %v2564_v38 = vpop.f32.mrb[160].mxu0 }
 0x701   :  { %v2566_v33 = vpop.f32.mrb[161].mxu0  ;;  %v2565_v28 = vadd.f32 %v2564_v38, %v2528_v6 }
 0x702   :  { %v2567_v7 = vadd.f32 %v2566_v33, %v2528_v6  ;;  %v2568_v43 = vpop.f32.mrb[162].mxu0 }
 0x703   :  { %v2571_v0 = vrot.slane %v2565_v28, 4  ;;  %v2569_v37 = vpop.f32.mrb[163].mxu0 }
 0x704   :  { %v2577_v9 = vrot.slane %v2567_v7, 4 }
 0x705   :  { %v2572_v29 = vadd.f32 %v2571_v0, %v2565_v28 }
 0x706   :  { %v2578_v50 = vadd.f32 %v2577_v9, %v2567_v7 }
 0x707   :  { %v2573_v3 = vrot.slane %v2572_v29, 2 }
 0x708   :  { %v2579_v51 = vrot.slane %v2578_v50, 2 }
 0x709   :  { %v2574_v53 = vadd.f32 %v2573_v3, %v2572_v29 }
 0x70a   :  { %v2580_v32 = vadd.f32 %v2579_v51, %v2578_v50 }
 0x70b   :  { %v2575_v34 = vrot.slane %v2574_v53, 1 }
 0x70c   :  { %v2581_v61 = vrot.slane %v2580_v32, 1 }
 0x70d   :  { %v2576_v16 = vadd.f32 %v2575_v34, %v2574_v53 }
 0x70e   :  { %v2582_v56 = vadd.f32 %v2581_v61, %v2580_v32 }
 0x70f   :  { %v2584_v47 = vmul.f32 0.125, %v2576_v16 }
 0x710   :  { %v2585_v19 = vmul.f32 0.125, %v2582_v56 }
 0x711   :  { %v2586_v25 = vsub.f32 %v2565_v28, %v2584_v47 }
 0x712   :  { %v2587_v5 = vsub.f32 %v2567_v7, %v2585_v19 }
 0x713   :  { %v2588_v12 = vmul.f32 %v2586_v25, %v2586_v25 }
 0x714   :  { %v2589_v42 = vmul.f32 %v2587_v5, %v2587_v5 }
 0x715   :  { %v2590_v20 = vrot.slane %v2588_v12, 4 }
 0x716   :  { %v2596_v24 = vrot.slane %v2589_v42, 4 }
 0x717   :  { %v2591_v30 = vadd.f32 %v2590_v20, %v2588_v12 }
 0x718   :  { %v2597_v18 = vadd.f32 %v2596_v24, %v2589_v42 }
 0x719   :  { %v2592_v44 = vrot.slane %v2591_v30, 2 }
 0x71a   :  { %v2598_v21 = vrot.slane %v2597_v18, 2 }
 0x71b   :  { %v2593_v39 = vadd.f32 %v2592_v44, %v2591_v30 }
 0x71c   :  { %v2599_v55 = vadd.f32 %v2598_v21, %v2597_v18 }
 0x71d   :  { %v2594_v40 = vrot.slane %v2593_v39, 1 }
 0x71e   :  { %v2600_v22 = vrot.slane %v2599_v55, 1 }
 0x71f   :  { %v2595_v35 = vadd.f32 %v2594_v40, %v2593_v39 }
 0x720   :  { %v2601_v58 = vadd.f32 %v2600_v22, %v2599_v55 }
 0x721   :  { %v2602_v1 = vmul.f32 0.125, %v2595_v35 }
 0x722   :  { %v2603_v4 = vmul.f32 0.125, %v2601_v58 }
 0x723   :  { %v2604_v48 = vadd.f32 1e-05, %v2602_v1 }
 0x724   :  { %v2605_v14 = vadd.f32 1e-05, %v2603_v4 }
 0x725   :  { %3148 = vrsqrt.f32 %v2604_v48 }
 0x726   :  { %3150 = vrsqrt.f32 %v2605_v14 }
 0x72f   :  { %v3149_v41 = vpop.eup %3148 }
 0x730   :  { %v3151_v45 = vpop.eup %3150  ;;  %v2608_v36 = vmul.f32 %v3149_v41, %v2586_v25 }
 0x731   :  { %v2609_v17 = vmul.f32 %v3151_v45, %v2587_v5 }
 0x732   :  { %v2615_v60 = vmul.f32 %v2613_v59, %v2608_v36 }
 0x733   :  { %v2616_v52 = vmul.f32 %v2613_v59, %v2609_v17 }
 0x734   :  { %2617 = vst [vmem:[#allocation8] sm:$0xff] %v2615_v60 }
 0x735   :  { %2618 = vst [vmem:[#allocation8 + $0x8] sm:$0xff] %v2616_v52 }
 0x740   :  { %v2669_v11 = vpop.f32.mrb[160].mxu1 }
 0x741   :  { %v2671_v23 = vpop.f32.mrb[161].mxu1  ;;  %v2670_v15 = vadd.f32 %v2669_v11, %v2528_v6 }
 0x742   :  { %v2672_v2 = vadd.f32 %v2671_v23, %v2528_v6  ;;  %v2673_v62 = vpop.f32.mrb[162].mxu1 }
 0x743   :  { %v2676_v63 = vrot.slane %v2670_v15, 4  ;;  %v2674_v49 = vpop.f32.mrb[163].mxu1 }
 0x744   :  { %v2682_v26 = vrot.slane %v2672_v2, 4 }
 0x745   :  { %v2677_v46 = vadd.f32 %v2676_v63, %v2670_v15 }
 0x746   :  { %v2683_v27 = vadd.f32 %v2682_v26, %v2672_v2 }
 0x747   :  { %v2678_v8 = vrot.slane %v2677_v46, 2 }
 0x748   :  { %v2684_v13 = vrot.slane %v2683_v27, 2 }
 0x749   :  { %v2679_v54 = vadd.f32 %v2678_v8, %v2677_v46 }
 0x74a   :  { %v2685_v10 = vadd.f32 %v2684_v13, %v2683_v27 }
 0x74b   :  { %v2680_v57 = vrot.slane %v2679_v54, 1 }
 0x74c   :  { %v2686_v31 = vrot.slane %v2685_v10, 1 }
 0x74d   :  { %v2681_v38 = vadd.f32 %v2680_v57, %v2679_v54 }
 0x74e   :  { %v2687_v33 = vadd.f32 %v2686_v31, %v2685_v10 }
 0x74f   :  { %v2688_v28 = vmul.f32 0.125, %v2681_v38 }
 0x750   :  { %v2689_v7 = vmul.f32 0.125, %v2687_v33 }
 0x751   :  { %v2690_v43 = vsub.f32 %v2670_v15, %v2688_v28 }
 0x752   :  { %v2691_v0 = vsub.f32 %v2672_v2, %v2689_v7 }
 0x753   :  { %v2692_v37 = vmul.f32 %v2690_v43, %v2690_v43 }
 0x754   :  { %v2693_v6 = vmul.f32 %v2691_v0, %v2691_v0 }
 0x755   :  { %v2694_v9 = vrot.slane %v2692_v37, 4 }
 0x756   :  { %v2700_v29 = vrot.slane %v2693_v6, 4 }
 0x757   :  { %v2695_v50 = vadd.f32 %v2694_v9, %v2692_v37 }
 0x758   :  { %v2701_v3 = vadd.f32 %v2700_v29, %v2693_v6 }
 0x759   :  { %v2696_v51 = vrot.slane %v2695_v50, 2 }
 0x75a   :  { %v2702_v53 = vrot.slane %v2701_v3, 2 }
 0x75b   :  { %v2697_v32 = vadd.f32 %v2696_v51, %v2695_v50 }
 0x75c   :  { %v2703_v34 = vadd.f32 %v2702_v53, %v2701_v3 }
 0x75d   :  { %v2698_v61 = vrot.slane %v2697_v32, 1 }
 0x75e   :  { %v2704_v16 = vrot.slane %v2703_v34, 1 }
 0x75f   :  { %v2699_v56 = vadd.f32 %v2698_v61, %v2697_v32 }
 0x760   :  { %v2705_v47 = vadd.f32 %v2704_v16, %v2703_v34 }
 0x761   :  { %v2706_v19 = vmul.f32 0.125, %v2699_v56 }
 0x762   :  { %v2707_v25 = vmul.f32 0.125, %v2705_v47 }
 0x763   :  { %v2708_v5 = vadd.f32 1e-05, %v2706_v19 }
 0x764   :  { %v2709_v12 = vadd.f32 1e-05, %v2707_v25 }
 0x765   :  { %3152 = vrsqrt.f32 %v2708_v5 }
 0x766   :  { %3154 = vrsqrt.f32 %v2709_v12 }
 0x76f   :  { %v3153_v42 = vpop.eup %3152 }
 0x770   :  { %v3155_v20 = vpop.eup %3154  ;;  %v2712_v24 = vmul.f32 %v3153_v42, %v2690_v43 }
 0x771   :  { %v2713_v30 = vmul.f32 %v3155_v20, %v2691_v0 }
 0x772   :  { %v2714_v18 = vmul.f32 %v2712_v24, %v2613_v59 }
 0x773   :  { %v2715_v44 = vmul.f32 %v2713_v30, %v2613_v59 }
 0x774   :  { %2717 = vst [vmem:[#allocation8 + $0x10] sm:$0xff] %v2714_v18 }
 0x775   :  { %2718 = vst [vmem:[#allocation8 + $0x18] sm:$0xff] %v2715_v44 }
 0x776   :  { %3233 = shalt.err (!%p3230_p0)
}
 0x777   :  { %s3234_s16 = scalar_lea.hbm %s5056_s6, 512 }
 0x778   :  { %p3235_p1 = scmp.ne.s32.totalorder %s5056_s6, %s3234_s16  ;;  %p3238_p2 = scmp.lt.u32.totalorder %s3234_s16, %s5056_s6 }
 0x77a   :  { %p3240_p3 = pnand %p3238_p2, %p3235_p1 }
 0x77c   :  { %3243 = shalt.err (!%p3240_p3)
}
 0x77d   :  { %2730 = dma.vmem_to_hbm [thread:$0]  %s2725_s12, 512, %s5056_s6, [#allocation4], %s3252_s1, %s3252_s1, %s3253_s19  }
 0x77e   :  { %3248 = dma.done.wait [#allocation4], 512  }
 0x77f   :  { %3249 = vsyncadd [#allocation4], 4294966784 }
 0x780   :  { %2734 = vsyncpa [#allocation3], 1 }
 0x781   :  { %2735 = vsyncpa [#allocation6], 1 }
 0x782   :  { %2736 = vsyncpa [#allocation4], 1 }

</bundles_post_ra>
